<compile_context>
chip_gen: v7x
topology: tpu7x:2x2x1
jax: 0.10.0
libtpu: 0.0.40
codegen_flags: <defaults>
</compile_context>

<pallas_src>
import functools

import jax
import jax.numpy as jnp
from jax.experimental import pallas as pl
from jax.experimental.pallas import tpu as pltpu

MIN_NORM = 1e-15          # geoopt's clamp_min for the Mobius-add denominator
ARTANH_EPS = 1e-5         # geoopt clamps artanh input to (-1+eps, 1-eps) for f32


def _artanh(z):
    z = jnp.clip(z, -1.0 + ARTANH_EPS, 1.0 - ARTANH_EPS)
    return 0.5 * (jnp.log1p(z) - jnp.log1p(-z))


def _encoder_kernel(x_ref, pos_ref, wqkv_ref, bqkv_ref, wo_ref, bo_ref,
                    wfc_ref, bfc_ref, o_ref, *, num_heads, curvature):
    bt, S, D = x_ref.shape
    H = num_heads
    Dh = D // H
    G = bt * H
    c = float(curvature)
    sqrt_c = c ** 0.5

    # token embedding + hyperbolic positional encoding (plain add, as in ref)
    x = (x_ref[...].astype(jnp.float32) +
         pos_ref[...].astype(jnp.float32)[None, :, :]).reshape(bt * S, D)

    # fused Q|K|V projection: one (bt*S, D) x (D, 3D) bf16 matmul, f32 acc.
    qkv = jnp.dot(x.astype(jnp.bfloat16), wqkv_ref[...],
                  preferred_element_type=jnp.float32) + bqkv_ref[...]  # (bt*S, 3D)

    # Batched head split: (bt*S, 3D) -> three (G, S, Dh) operands, G = bt*H.
    # Only H lane-slices + one stack per tensor; the heavy S x S math below then
    # runs once, batched over G (no bt*H unrolled chains).
    def split_heads(col0):
        return jnp.stack(
            [qkv[:, col0 + h * Dh: col0 + (h + 1) * Dh].reshape(bt, S, Dh)
             for h in range(H)], axis=0).reshape(G, S, Dh)     # g = h*bt + b

    qh = split_heads(0)          # (G, S, Dh) f32
    kh = split_heads(D)
    vh = split_heads(2 * D)

    x2 = jnp.sum(qh * qh, axis=-1, keepdims=True)             # (G, S, 1)  |q_i|^2
    y2 = jnp.sum(kh * kh, axis=-1)[:, None, :]                 # (G, 1, S)  |k_j|^2
    xy = jnp.einsum('gqd,gkd->gqk',
                    qh.astype(jnp.bfloat16), kh.astype(jnp.bfloat16),
                    preferred_element_type=jnp.float32)        # (G, S, S) <q_i,k_j>

    # Closed-form || mobius_add(-q, k) || from |q|^2, |k|^2, <q,k>:
    #   num = -A*q + Bv*k,  A = 1 - 2c<q,k> + c|k|^2,  Bv = 1 - c|q|^2
    two_xy = xy + xy                                           # 2<q,k>
    if c == 1.0:                                               # fold all c-multiplies
        A = (1.0 + y2) - two_xy
        Bv = 1.0 - x2
        denom = jnp.maximum((1.0 + x2 * y2) - two_xy, MIN_NORM)
    else:
        c2xy = c * two_xy
        A = (1.0 + c * y2) - c2xy
        Bv = 1.0 - c * x2
        denom = jnp.maximum((1.0 + (c * c) * (x2 * y2)) - c2xy, MIN_NORM)
    num_sq = (A * A) * x2 - (A * Bv) * two_xy + (Bv * Bv) * y2
    n = jnp.sqrt(jnp.maximum(num_sq, 0.0))                     # ||num|| = denom*||m||
    scn = n if c == 1.0 else sqrt_c * n

    # exp(-dist) = ((1-z)/(1+z))^(1/sqrt_c) with z = sqrt_c*||m|| = scn/denom.
    # Fused form: (denom - scn)/(denom + scn); the reference artanh clip
    # z <= 1-eps becomes a floor clamp on w (the lower clip is dead, z >= 0).
    ratio = (denom - scn) * pl.reciprocal(denom + scn, approx=True)
    w = jnp.maximum(ratio, ARTANH_EPS / (2.0 - ARTANH_EPS))
    if c != 1.0:
        w = jnp.exp(jnp.log(w) * (1.0 / sqrt_c))

    # attention row-normalization: approx reciprocal on the EUP path
    w = w * pl.reciprocal(jnp.sum(w, axis=-1, keepdims=True), approx=True)

    head_out = jnp.einsum('gqk,gkd->gqd',
                          w.astype(jnp.bfloat16), vh.astype(jnp.bfloat16),
                          preferred_element_type=jnp.float32)  # (G, S, Dh)

    # reassemble heads: (G, S, Dh) -> (bt*S, D) via one lane-concat over heads
    ho = head_out.reshape(H, bt, S, Dh)
    attn = jnp.concatenate([ho[h] for h in range(H)], axis=-1).reshape(bt * S, D)

    o1 = jnp.dot(attn.astype(jnp.bfloat16), wo_ref[...],
                 preferred_element_type=jnp.float32) + bo_ref[...]
    o2 = jnp.dot(o1.astype(jnp.bfloat16), wfc_ref[...],
                 preferred_element_type=jnp.float32) + bfc_ref[...]
    # TODO(synk): dropout(p=0.1) is identity here (eval-mode semantics).
    o_ref[...] = jnp.maximum(o2, 0.0).reshape(bt, S, D)        # ReLU


def _vmem_capacity_bytes():
    try:
        return int(pltpu.get_tpu_info().vmem_capacity_bytes)
    except Exception:
        return 128 * 1024 * 1024      # v5e / v6e default


def _pick_batch_tile(B, H, S, D, vmem_budget, max_bt=8):
    # ~6 live f32 (H, S, S) slabs + qkv / per-head stacks / attn slabs per batch
    # element, plus the pipelined in/out blocks; resident weights once.
    per_b = (6 * H * S * S + 24 * S * D) * 4
    w_bytes = 2 * (5 * D * D + S * D) * 2 + 8 * D * 4
    bt = max(1, (vmem_budget - w_bytes) // max(per_b, 1))
    bt = int(min(bt, max_bt, B))
    if B >= 2:
        # keep the grid >= 2 steps: feeds both v7x TensorCores (megacore) and
        # overlaps the x_emb DMA on v5e/v6e.
        bt = min(bt, max(B // 2, 1))
    while B % bt != 0:
        bt -= 1
    return max(bt, 1)


def _build_call(kernel, B, S, D, bt, vmem_limit, *, single_buffer_consts):
    def const_spec(shape):
        if single_buffer_consts:
            # constant index map -> second pipeline buffer is pure VMEM waste
            return pl.BlockSpec(shape, lambda b: (0, 0),
                                pipeline_mode=pl.Buffered(1))
        return pl.BlockSpec(shape, lambda b: (0, 0))

    return pl.pallas_call(
        kernel,
        out_shape=jax.ShapeDtypeStruct((B, S, D), jnp.float32),
        grid=(B // bt,),
        in_specs=[
            pl.BlockSpec((bt, S, D), lambda b: (b, 0, 0)),     # x_emb (bf16)
            const_spec((S, D)),                                # pos   (bf16)
            const_spec((D, 3 * D)), const_spec((1, 3 * D)),    # Wqkv, bqkv
            const_spec((D, D)), const_spec((1, D)),            # Wo, bo
            const_spec((D, D)), const_spec((1, D)),            # Wfc, bfc
        ],
        out_specs=pl.BlockSpec((bt, S, D), lambda b: (b, 0, 0)),
        compiler_params=pltpu.CompilerParams(
            dimension_semantics=("parallel",),
            vmem_limit_bytes=vmem_limit),
    )


def hyperbolic_transformer_encoder(indices, params, *, num_heads, curvature=1.0,
                                   batch_tile=None):
    emb_tbl = params["emb"]          # (num_embeddings, D)
    pos_tbl = params["pos"]          # (max_len, D)
    B, S = indices.shape
    D = emb_tbl.shape[-1]
    H = num_heads

    # Embedding gather stays in XLA (glue); activations shipped as bf16
    # (halves the per-step input DMA and its double buffer).
    x_emb = emb_tbl[indices].astype(jnp.bfloat16)              # (B, S, D)
    pos = pos_tbl[:S].astype(jnp.bfloat16)                     # (S, D)

    # Fuse Q|K|V into one (D, 3D) bf16 weight (one wide MXU matmul, one DMA);
    # biases stay f32.
    wqkv = jnp.concatenate([params["wq"], params["wk"], params["wv"]],
                           axis=1).astype(jnp.bfloat16)        # (D, 3D)
    bqkv = jnp.concatenate([params["bq"], params["bk"], params["bv"]],
                           axis=1).astype(jnp.float32)         # (1, 3D)
    wo = params["wo"].astype(jnp.bfloat16)
    bo = params["bo"].astype(jnp.float32)
    wfc = params["wfc"].astype(jnp.bfloat16)
    bfc = params["bfc"].astype(jnp.float32)

    cap = _vmem_capacity_bytes()
    # up to ~100 MiB on 128-MiB parts (v5e/v6e), ~54 MiB on 64-MiB parts (v7x)
    vmem_limit = min(int(cap * 0.85), 100 * 1024 * 1024)
    bt = batch_tile if batch_tile is not None else _pick_batch_tile(
        B, H, S, D, vmem_limit)
    assert B % bt == 0

    kernel = functools.partial(_encoder_kernel, num_heads=num_heads,
                               curvature=curvature)
    args = (x_emb, pos, wqkv, bqkv, wo, bo, wfc, bfc)
    try:
        return _build_call(kernel, B, S, D, bt, vmem_limit,
                           single_buffer_consts=True)(*args)
    except Exception:
        # TODO(synk): this jax version rejects pl.Buffered(1); fall back to the
        # default double buffering of the resident weights (small VMEM cost).
        return _build_call(kernel, B, S, D, bt, vmem_limit,
                           single_buffer_consts=False)(*args)


# ---------------- pure-JAX reference (for a sanity check) ----------------
def _reference(indices, params, *, num_heads, curvature=1.0):
    emb = params["emb"][indices] + params["pos"][: indices.shape[1]][None]
    B, S, D = emb.shape
    Dh = D // num_heads
    c = curvature

    def lin(x, w, b):
        return x @ w + b

    q = lin(emb, params["wq"], params["bq"]).reshape(B, S, num_heads, Dh).transpose(0, 2, 1, 3)
    k = lin(emb, params["wk"], params["bk"]).reshape(B, S, num_heads, Dh).transpose(0, 2, 1, 3)
    v = lin(emb, params["wv"], params["bv"]).reshape(B, S, num_heads, Dh).transpose(0, 2, 1, 3)

    def mobius_add(x, y):
        x2 = jnp.sum(x * x, -1, keepdims=True)
        y2 = jnp.sum(y * y, -1, keepdims=True)
        xy = jnp.sum(x * y, -1, keepdims=True)
        num = (1 + 2 * c * xy + c * y2) * x + (1 - c * x2) * y
        den = 1 + 2 * c * xy + c * c * x2 * y2
        return num / jnp.maximum(den, MIN_NORM)

    qq = q[:, :, :, None, :]
    kk = k[:, :, None, :, :]
    m = mobius_add(-qq, kk)
    norm = jnp.linalg.norm(m, axis=-1)
    dist = 2.0 / (c ** 0.5) * _artanh((c ** 0.5) * norm)
    w = jnp.exp(-dist)
    w = w / jnp.sum(w, -1, keepdims=True)
    out = jnp.einsum("bhij,bhjd->bhid", w, v)
    out = out.transpose(0, 2, 1, 3).reshape(B, S, D)
    out = lin(out, params["wo"], params["bo"])
    out = lin(out, params["wfc"], params["bfc"])
    return jnp.maximum(out, 0.0)


def _expmap0(u, c):
    n = jnp.maximum(jnp.linalg.norm(u, axis=-1, keepdims=True), MIN_NORM)
    sc = c ** 0.5
    return jnp.tanh(sc * n) * u / (sc * n)


def _init_params(key, num_embeddings, D, max_len, curvature):
    ks = jax.random.split(key, 12)
    std_w = 1.0 / (D ** 0.5)
    p = {
        "emb": _expmap0(0.01 * jax.random.normal(ks[0], (num_embeddings, D), jnp.float32), curvature),
        "pos": _expmap0(0.01 * jax.random.normal(ks[1], (max_len, D), jnp.float32), curvature),
    }
    names = ["q", "k", "v", "o", "fc"]
    for i, n in enumerate(names):
        p["w" + n] = std_w * jax.random.normal(ks[2 + 2 * i], (D, D), jnp.float32)
        p["b" + n] = 0.01 * jax.random.normal(ks[3 + 2 * i], (1, D), jnp.float32)
    return p


if __name__ == "__main__":
    num_embeddings, D, num_heads, max_len, curvature = 16, 32, 4, 8, 1.0
    B, S = 2, 8

    key = jax.random.PRNGKey(0)
    pkey, ikey = jax.random.split(key)
    params = _init_params(pkey, num_embeddings, D, max_len, curvature)
    indices = jax.random.randint(ikey, (B, S), 0, num_embeddings, dtype=jnp.int32)

    out = hyperbolic_transformer_encoder(indices, params, num_heads=num_heads,
                                         curvature=curvature)
    out = jax.block_until_ready(out)

    ref = _reference(indices, params, num_heads=num_heads, curvature=curvature)
    assert out.shape == (B, S, D)
    assert jnp.allclose(out, ref, atol=1e-2, rtol=1e-2), float(jnp.max(jnp.abs(out - ref)))

    print("KERNEL_OK")
</pallas_src>

<mosaic_0001>
module attributes {stable_mosaic.version = 11 : i64} {
  func.func @_encoder_kernel(%arg0: i32, %arg1: memref<1x8x32xbf16, #tpu.memory_space<vmem>>, %arg2: memref<8x32xbf16, #tpu.memory_space<vmem>>, %arg3: memref<32x96xbf16, #tpu.memory_space<vmem>>, %arg4: memref<1x96xf32, #tpu.memory_space<vmem>>, %arg5: memref<32x32xbf16, #tpu.memory_space<vmem>>, %arg6: memref<1x32xf32, #tpu.memory_space<vmem>>, %arg7: memref<32x32xbf16, #tpu.memory_space<vmem>>, %arg8: memref<1x32xf32, #tpu.memory_space<vmem>>, %arg9: memref<1x8x32xf32, #tpu.memory_space<vmem>>) attributes {dimension_semantics = [#tpu.dimension_semantics<parallel>], iteration_bounds = array<i64: 2>, scalar_prefetch = 0 : i64, scratch_operands = 0 : i64, tpu.core_type = #tpu.core_type<tc>, window_params = [{transform_indices = @transform_0, window_bounds = array<i64: 1, 8, 32>}, {pipeline_mode = #tpu.pipeline_mode<synchronous>, transform_indices = @transform_1, window_bounds = array<i64: 8, 32>}, {pipeline_mode = #tpu.pipeline_mode<synchronous>, transform_indices = @transform_2, window_bounds = array<i64: 32, 96>}, {pipeline_mode = #tpu.pipeline_mode<synchronous>, transform_indices = @transform_3, window_bounds = array<i64: 1, 96>}, {pipeline_mode = #tpu.pipeline_mode<synchronous>, transform_indices = @transform_4, window_bounds = array<i64: 32, 32>}, {pipeline_mode = #tpu.pipeline_mode<synchronous>, transform_indices = @transform_5, window_bounds = array<i64: 1, 32>}, {pipeline_mode = #tpu.pipeline_mode<synchronous>, transform_indices = @transform_6, window_bounds = array<i64: 32, 32>}, {pipeline_mode = #tpu.pipeline_mode<synchronous>, transform_indices = @transform_7, window_bounds = array<i64: 1, 32>}, {transform_indices = @transform_8, window_bounds = array<i64: 1, 8, 32>}]} {
    %c0 = arith.constant 0 : index
    %c0_0 = arith.constant 0 : index
    %c0_1 = arith.constant 0 : index
    %0 = vector.load %arg1[%c0, %c0_0, %c0_1] : memref<1x8x32xbf16, #tpu.memory_space<vmem>>, vector<1x8x32xbf16>
    %1 = arith.extf %0 : vector<1x8x32xbf16> to vector<1x8x32xf32>
    %c0_2 = arith.constant 0 : index
    %c0_3 = arith.constant 0 : index
    %2 = vector.load %arg2[%c0_2, %c0_3] : memref<8x32xbf16, #tpu.memory_space<vmem>>, vector<8x32xbf16>
    %3 = arith.extf %2 : vector<8x32xbf16> to vector<8x32xf32>
    %4 = vector.shape_cast %3 : vector<8x32xf32> to vector<1x8x32xf32>
    %5 = arith.addf %1, %4 : vector<1x8x32xf32>
    %6 = vector.shape_cast %5 : vector<1x8x32xf32> to vector<8x32xf32>
    %7 = arith.truncf %6 : vector<8x32xf32> to vector<8x32xbf16>
    %c0_4 = arith.constant 0 : index
    %c0_5 = arith.constant 0 : index
    %8 = vector.load %arg3[%c0_4, %c0_5] : memref<32x96xbf16, #tpu.memory_space<vmem>>, vector<32x96xbf16>
    %cst = arith.constant dense<0.000000e+00> : vector<8x96xf32>
    %9 = tpu.matmul %7, %8, %cst {dimension_numbers = #tpu.dot_dimension_numbers<[1], [0], [0], [1], [0, 0, 1, 1], [], []>} : vector<8x32xbf16>, vector<32x96xbf16>, vector<8x96xf32> -> vector<8x96xf32>
    %c0_6 = arith.constant 0 : index
    %c0_7 = arith.constant 0 : index
    %10 = vector.load %arg4[%c0_6, %c0_7] : memref<1x96xf32, #tpu.memory_space<vmem>>, vector<1x96xf32>
    %11 = vector.broadcast %10 : vector<1x96xf32> to vector<8x96xf32>
    %12 = arith.addf %9, %11 : vector<8x96xf32>
    %13 = vector.extract_strided_slice %12 {offsets = [0, 0], sizes = [8, 8], strides = [1, 1]} : vector<8x96xf32> to vector<8x8xf32>
    %14 = vector.shape_cast %13 : vector<8x8xf32> to vector<1x8x8xf32>
    %15 = vector.extract_strided_slice %12 {offsets = [0, 8], sizes = [8, 8], strides = [1, 1]} : vector<8x96xf32> to vector<8x8xf32>
    %16 = vector.shape_cast %15 : vector<8x8xf32> to vector<1x8x8xf32>
    %17 = vector.extract_strided_slice %12 {offsets = [0, 16], sizes = [8, 8], strides = [1, 1]} : vector<8x96xf32> to vector<8x8xf32>
    %18 = vector.shape_cast %17 : vector<8x8xf32> to vector<1x8x8xf32>
    %19 = vector.extract_strided_slice %12 {offsets = [0, 24], sizes = [8, 8], strides = [1, 1]} : vector<8x96xf32> to vector<8x8xf32>
    %20 = vector.shape_cast %19 : vector<8x8xf32> to vector<1x8x8xf32>
    %21 = vector.shape_cast %14 : vector<1x8x8xf32> to vector<1x1x8x8xf32>
    %22 = vector.shape_cast %16 : vector<1x8x8xf32> to vector<1x1x8x8xf32>
    %23 = vector.shape_cast %18 : vector<1x8x8xf32> to vector<1x1x8x8xf32>
    %24 = vector.shape_cast %20 : vector<1x8x8xf32> to vector<1x1x8x8xf32>
    %25 = tpu.concatenate %21, %22, %23, %24 in 0 : vector<1x1x8x8xf32>, vector<1x1x8x8xf32>, vector<1x1x8x8xf32>, vector<1x1x8x8xf32> -> vector<4x1x8x8xf32>
    %26 = vector.shape_cast %25 : vector<4x1x8x8xf32> to vector<4x8x8xf32>
    %27 = vector.extract_strided_slice %12 {offsets = [0, 32], sizes = [8, 8], strides = [1, 1]} : vector<8x96xf32> to vector<8x8xf32>
    %28 = vector.shape_cast %27 : vector<8x8xf32> to vector<1x8x8xf32>
    %29 = vector.extract_strided_slice %12 {offsets = [0, 40], sizes = [8, 8], strides = [1, 1]} : vector<8x96xf32> to vector<8x8xf32>
    %30 = vector.shape_cast %29 : vector<8x8xf32> to vector<1x8x8xf32>
    %31 = vector.extract_strided_slice %12 {offsets = [0, 48], sizes = [8, 8], strides = [1, 1]} : vector<8x96xf32> to vector<8x8xf32>
    %32 = vector.shape_cast %31 : vector<8x8xf32> to vector<1x8x8xf32>
    %33 = vector.extract_strided_slice %12 {offsets = [0, 56], sizes = [8, 8], strides = [1, 1]} : vector<8x96xf32> to vector<8x8xf32>
    %34 = vector.shape_cast %33 : vector<8x8xf32> to vector<1x8x8xf32>
    %35 = vector.shape_cast %28 : vector<1x8x8xf32> to vector<1x1x8x8xf32>
    %36 = vector.shape_cast %30 : vector<1x8x8xf32> to vector<1x1x8x8xf32>
    %37 = vector.shape_cast %32 : vector<1x8x8xf32> to vector<1x1x8x8xf32>
    %38 = vector.shape_cast %34 : vector<1x8x8xf32> to vector<1x1x8x8xf32>
    %39 = tpu.concatenate %35, %36, %37, %38 in 0 : vector<1x1x8x8xf32>, vector<1x1x8x8xf32>, vector<1x1x8x8xf32>, vector<1x1x8x8xf32> -> vector<4x1x8x8xf32>
    %40 = vector.shape_cast %39 : vector<4x1x8x8xf32> to vector<4x8x8xf32>
    %41 = vector.extract_strided_slice %12 {offsets = [0, 64], sizes = [8, 8], strides = [1, 1]} : vector<8x96xf32> to vector<8x8xf32>
    %42 = vector.shape_cast %41 : vector<8x8xf32> to vector<1x8x8xf32>
    %43 = vector.extract_strided_slice %12 {offsets = [0, 72], sizes = [8, 8], strides = [1, 1]} : vector<8x96xf32> to vector<8x8xf32>
    %44 = vector.shape_cast %43 : vector<8x8xf32> to vector<1x8x8xf32>
    %45 = vector.extract_strided_slice %12 {offsets = [0, 80], sizes = [8, 8], strides = [1, 1]} : vector<8x96xf32> to vector<8x8xf32>
    %46 = vector.shape_cast %45 : vector<8x8xf32> to vector<1x8x8xf32>
    %47 = vector.extract_strided_slice %12 {offsets = [0, 88], sizes = [8, 8], strides = [1, 1]} : vector<8x96xf32> to vector<8x8xf32>
    %48 = vector.shape_cast %47 : vector<8x8xf32> to vector<1x8x8xf32>
    %49 = vector.shape_cast %42 : vector<1x8x8xf32> to vector<1x1x8x8xf32>
    %50 = vector.shape_cast %44 : vector<1x8x8xf32> to vector<1x1x8x8xf32>
    %51 = vector.shape_cast %46 : vector<1x8x8xf32> to vector<1x1x8x8xf32>
    %52 = vector.shape_cast %48 : vector<1x8x8xf32> to vector<1x1x8x8xf32>
    %53 = tpu.concatenate %49, %50, %51, %52 in 0 : vector<1x1x8x8xf32>, vector<1x1x8x8xf32>, vector<1x1x8x8xf32>, vector<1x1x8x8xf32> -> vector<4x1x8x8xf32>
    %54 = vector.shape_cast %53 : vector<4x1x8x8xf32> to vector<4x8x8xf32>
    %55 = arith.mulf %26, %26 : vector<4x8x8xf32>
    %cst_8 = arith.constant dense<0.000000e+00> : vector<4x8xf32>
    %56 = vector.multi_reduction <add>, %55, %cst_8 [2] : vector<4x8x8xf32> to vector<4x8xf32>
    %57 = vector.shape_cast %56 : vector<4x8xf32> to vector<4x8x1xf32>
    %58 = arith.mulf %40, %40 : vector<4x8x8xf32>
    %cst_9 = arith.constant dense<0.000000e+00> : vector<4x8xf32>
    %59 = vector.multi_reduction <add>, %58, %cst_9 [2] : vector<4x8x8xf32> to vector<4x8xf32>
    %60 = vector.shape_cast %59 : vector<4x8xf32> to vector<4x1x8xf32>
    %61 = arith.truncf %26 : vector<4x8x8xf32> to vector<4x8x8xbf16>
    %62 = arith.truncf %40 : vector<4x8x8xf32> to vector<4x8x8xbf16>
    "tpu.trace_start"() <{level = 10 : i32, message = "gqd,gkd->gqk"}> : () -> ()
    %cst_10 = arith.constant dense<0.000000e+00> : vector<4x8x8xf32>
    %63 = tpu.matmul %61, %62, %cst_10 {dimension_numbers = #tpu.dot_dimension_numbers<[2], [2], [1], [1], [0, 0, 0, 1, 1, 1], [0], [0]>} : vector<4x8x8xbf16>, vector<4x8x8xbf16>, vector<4x8x8xf32> -> vector<4x8x8xf32>
    "tpu.trace_stop"() : () -> ()
    %64 = arith.addf %63, %63 : vector<4x8x8xf32>
    %cst_11 = arith.constant 1.000000e+00 : f32
    %65 = vector.broadcast %cst_11 : f32 to vector<4x1x8xf32>
    %66 = arith.addf %65, %60 : vector<4x1x8xf32>
    %67 = vector.broadcast %66 : vector<4x1x8xf32> to vector<4x8x8xf32>
    %68 = arith.subf %67, %64 : vector<4x8x8xf32>
    %cst_12 = arith.constant 1.000000e+00 : f32
    %69 = vector.broadcast %cst_12 : f32 to vector<4x8x1xf32>
    %70 = arith.subf %69, %57 : vector<4x8x1xf32>
    %71 = vector.broadcast %57 : vector<4x8x1xf32> to vector<4x8x8xf32>
    %72 = vector.broadcast %60 : vector<4x1x8xf32> to vector<4x8x8xf32>
    %73 = arith.mulf %71, %72 : vector<4x8x8xf32>
    %cst_13 = arith.constant 1.000000e+00 : f32
    %74 = vector.broadcast %cst_13 : f32 to vector<4x8x8xf32>
    %75 = arith.addf %74, %73 : vector<4x8x8xf32>
    %76 = arith.subf %75, %64 : vector<4x8x8xf32>
    %cst_14 = arith.constant 1.000000e-15 : f32
    %77 = vector.broadcast %cst_14 : f32 to vector<4x8x8xf32>
    %78 = arith.maximumf %76, %77 : vector<4x8x8xf32>
    %79 = arith.mulf %68, %68 : vector<4x8x8xf32>
    %80 = vector.broadcast %57 : vector<4x8x1xf32> to vector<4x8x8xf32>
    %81 = arith.mulf %79, %80 : vector<4x8x8xf32>
    %82 = vector.broadcast %70 : vector<4x8x1xf32> to vector<4x8x8xf32>
    %83 = arith.mulf %68, %82 : vector<4x8x8xf32>
    %84 = arith.mulf %83, %64 : vector<4x8x8xf32>
    %85 = arith.subf %81, %84 : vector<4x8x8xf32>
    %86 = arith.mulf %70, %70 : vector<4x8x1xf32>
    %87 = vector.broadcast %86 : vector<4x8x1xf32> to vector<4x8x8xf32>
    %88 = vector.broadcast %60 : vector<4x1x8xf32> to vector<4x8x8xf32>
    %89 = arith.mulf %87, %88 : vector<4x8x8xf32>
    %90 = arith.addf %85, %89 : vector<4x8x8xf32>
    %cst_15 = arith.constant 0.000000e+00 : f32
    %91 = vector.broadcast %cst_15 : f32 to vector<4x8x8xf32>
    %92 = arith.maximumf %90, %91 : vector<4x8x8xf32>
    %93 = math.sqrt %92 : vector<4x8x8xf32>
    %94 = arith.subf %78, %93 : vector<4x8x8xf32>
    %95 = arith.addf %78, %93 : vector<4x8x8xf32>
    %96 = tpu.reciprocal %95 {approx = true} : vector<4x8x8xf32> -> vector<4x8x8xf32>
    %97 = arith.mulf %94, %96 : vector<4x8x8xf32>
    %cst_16 = arith.constant 5.00002488E-6 : f32
    %98 = vector.broadcast %cst_16 : f32 to vector<4x8x8xf32>
    %99 = arith.maximumf %97, %98 : vector<4x8x8xf32>
    %cst_17 = arith.constant dense<0.000000e+00> : vector<4x8xf32>
    %100 = vector.multi_reduction <add>, %99, %cst_17 [2] : vector<4x8x8xf32> to vector<4x8xf32>
    %101 = vector.shape_cast %100 : vector<4x8xf32> to vector<4x8x1xf32>
    %102 = tpu.reciprocal %101 {approx = true} : vector<4x8x1xf32> -> vector<4x8x1xf32>
    %103 = vector.broadcast %102 : vector<4x8x1xf32> to vector<4x8x8xf32>
    %104 = arith.mulf %99, %103 : vector<4x8x8xf32>
    %105 = arith.truncf %104 : vector<4x8x8xf32> to vector<4x8x8xbf16>
    %106 = arith.truncf %54 : vector<4x8x8xf32> to vector<4x8x8xbf16>
    "tpu.trace_start"() <{level = 10 : i32, message = "gqk,gkd->gqd"}> : () -> ()
    %cst_18 = arith.constant dense<0.000000e+00> : vector<4x8x8xf32>
    %107 = tpu.matmul %105, %106, %cst_18 {dimension_numbers = #tpu.dot_dimension_numbers<[2], [1], [1], [2], [0, 0, 0, 1, 1, 2], [0], [0]>} : vector<4x8x8xbf16>, vector<4x8x8xbf16>, vector<4x8x8xf32> -> vector<4x8x8xf32>
    "tpu.trace_stop"() : () -> ()
    %108 = vector.shape_cast %107 : vector<4x8x8xf32> to vector<4x1x8x8xf32>
    %109 = vector.extract_strided_slice %108 {offsets = [0, 0, 0, 0], sizes = [1, 1, 8, 8], strides = [1, 1, 1, 1]} : vector<4x1x8x8xf32> to vector<1x1x8x8xf32>
    %110 = vector.shape_cast %109 : vector<1x1x8x8xf32> to vector<1x8x8xf32>
    %111 = vector.extract_strided_slice %108 {offsets = [1, 0, 0, 0], sizes = [1, 1, 8, 8], strides = [1, 1, 1, 1]} : vector<4x1x8x8xf32> to vector<1x1x8x8xf32>
    %112 = vector.shape_cast %111 : vector<1x1x8x8xf32> to vector<1x8x8xf32>
    %113 = vector.extract_strided_slice %108 {offsets = [2, 0, 0, 0], sizes = [1, 1, 8, 8], strides = [1, 1, 1, 1]} : vector<4x1x8x8xf32> to vector<1x1x8x8xf32>
    %114 = vector.shape_cast %113 : vector<1x1x8x8xf32> to vector<1x8x8xf32>
    %115 = vector.extract_strided_slice %108 {offsets = [3, 0, 0, 0], sizes = [1, 1, 8, 8], strides = [1, 1, 1, 1]} : vector<4x1x8x8xf32> to vector<1x1x8x8xf32>
    %116 = vector.shape_cast %115 : vector<1x1x8x8xf32> to vector<1x8x8xf32>
    %117 = tpu.concatenate %110, %112, %114, %116 in 2 : vector<1x8x8xf32>, vector<1x8x8xf32>, vector<1x8x8xf32>, vector<1x8x8xf32> -> vector<1x8x32xf32>
    %118 = vector.shape_cast %117 : vector<1x8x32xf32> to vector<8x32xf32>
    %119 = arith.truncf %118 : vector<8x32xf32> to vector<8x32xbf16>
    %c0_19 = arith.constant 0 : index
    %c0_20 = arith.constant 0 : index
    %120 = vector.load %arg5[%c0_19, %c0_20] : memref<32x32xbf16, #tpu.memory_space<vmem>>, vector<32x32xbf16>
    %cst_21 = arith.constant dense<0.000000e+00> : vector<8x32xf32>
    %121 = tpu.matmul %119, %120, %cst_21 {dimension_numbers = #tpu.dot_dimension_numbers<[1], [0], [0], [1], [0, 0, 1, 1], [], []>} : vector<8x32xbf16>, vector<32x32xbf16>, vector<8x32xf32> -> vector<8x32xf32>
    %c0_22 = arith.constant 0 : index
    %c0_23 = arith.constant 0 : index
    %122 = vector.load %arg6[%c0_22, %c0_23] : memref<1x32xf32, #tpu.memory_space<vmem>>, vector<1x32xf32>
    %123 = vector.broadcast %122 : vector<1x32xf32> to vector<8x32xf32>
    %124 = arith.addf %121, %123 : vector<8x32xf32>
    %125 = arith.truncf %124 : vector<8x32xf32> to vector<8x32xbf16>
    %c0_24 = arith.constant 0 : index
    %c0_25 = arith.constant 0 : index
    %126 = vector.load %arg7[%c0_24, %c0_25] : memref<32x32xbf16, #tpu.memory_space<vmem>>, vector<32x32xbf16>
    %cst_26 = arith.constant dense<0.000000e+00> : vector<8x32xf32>
    %127 = tpu.matmul %125, %126, %cst_26 {dimension_numbers = #tpu.dot_dimension_numbers<[1], [0], [0], [1], [0, 0, 1, 1], [], []>} : vector<8x32xbf16>, vector<32x32xbf16>, vector<8x32xf32> -> vector<8x32xf32>
    %c0_27 = arith.constant 0 : index
    %c0_28 = arith.constant 0 : index
    %128 = vector.load %arg8[%c0_27, %c0_28] : memref<1x32xf32, #tpu.memory_space<vmem>>, vector<1x32xf32>
    %129 = vector.broadcast %128 : vector<1x32xf32> to vector<8x32xf32>
    %130 = arith.addf %127, %129 : vector<8x32xf32>
    %cst_29 = arith.constant 0.000000e+00 : f32
    %131 = vector.broadcast %cst_29 : f32 to vector<8x32xf32>
    %132 = arith.maximumf %130, %131 : vector<8x32xf32>
    %133 = vector.shape_cast %132 : vector<8x32xf32> to vector<1x8x32xf32>
    %c0_30 = arith.constant 0 : index
    %c0_31 = arith.constant 0 : index
    %c0_32 = arith.constant 0 : index
    %134 = vector.load %arg9[%c0_30, %c0_31, %c0_32] : memref<1x8x32xf32, #tpu.memory_space<vmem>>, vector<1x8x32xf32>
    tpu.vector_store %arg9[%c0_30, %c0_31, %c0_32], %133 {strides = array<i32>} : memref<1x8x32xf32, #tpu.memory_space<vmem>>, vector<1x8x32xf32>,
    return
  }
  func.func @transform_0(%arg0: i32) -> (i32, i32, i32) {
    %c0_i32 = arith.constant 0 : i32
    %c0_i32_0 = arith.constant 0 : i32
    %c0_i32_1 = arith.constant 0 : i32
    return %arg0, %c0_i32, %c0_i32_0 : i32, i32, i32
  }
  func.func @transform_1(%arg0: i32) -> (i32, i32) {
    %c0_i32 = arith.constant 0 : i32
    %c0_i32_0 = arith.constant 0 : i32
    %c0_i32_1 = arith.constant 0 : i32
    return %c0_i32, %c0_i32_0 : i32, i32
  }
  func.func @transform_2(%arg0: i32) -> (i32, i32) {
    %c0_i32 = arith.constant 0 : i32
    %c0_i32_0 = arith.constant 0 : i32
    %c0_i32_1 = arith.constant 0 : i32
    return %c0_i32, %c0_i32_0 : i32, i32
  }
  func.func @transform_3(%arg0: i32) -> (i32, i32) {
    %c0_i32 = arith.constant 0 : i32
    %c0_i32_0 = arith.constant 0 : i32
    %c0_i32_1 = arith.constant 0 : i32
    return %c0_i32, %c0_i32_0 : i32, i32
  }
  func.func @transform_4(%arg0: i32) -> (i32, i32) {
    %c0_i32 = arith.constant 0 : i32
    %c0_i32_0 = arith.constant 0 : i32
    %c0_i32_1 = arith.constant 0 : i32
    return %c0_i32, %c0_i32_0 : i32, i32
  }
  func.func @transform_5(%arg0: i32) -> (i32, i32) {
    %c0_i32 = arith.constant 0 : i32
    %c0_i32_0 = arith.constant 0 : i32
    %c0_i32_1 = arith.constant 0 : i32
    return %c0_i32, %c0_i32_0 : i32, i32
  }
  func.func @transform_6(%arg0: i32) -> (i32, i32) {
    %c0_i32 = arith.constant 0 : i32
    %c0_i32_0 = arith.constant 0 : i32
    %c0_i32_1 = arith.constant 0 : i32
    return %c0_i32, %c0_i32_0 : i32, i32
  }
  func.func @transform_7(%arg0: i32) -> (i32, i32) {
    %c0_i32 = arith.constant 0 : i32
    %c0_i32_0 = arith.constant 0 : i32
    %c0_i32_1 = arith.constant 0 : i32
    return %c0_i32, %c0_i32_0 : i32, i32
  }
  func.func @transform_8(%arg0: i32) -> (i32, i32, i32) {
    %c0_i32 = arith.constant 0 : i32
    %c0_i32_0 = arith.constant 0 : i32
    %c0_i32_1 = arith.constant 0 : i32
    return %arg0, %c0_i32, %c0_i32_0 : i32, i32, i32
  }
}

module attributes {stable_mosaic.version = 11 : i64} {
  func.func @_encoder_kernel(%arg0: i32, %arg1: memref<1x8x32xbf16, #tpu.memory_space<vmem>>, %arg2: memref<8x32xbf16, #tpu.memory_space<vmem>>, %arg3: memref<32x96xbf16, #tpu.memory_space<vmem>>, %arg4: memref<1x96xf32, #tpu.memory_space<vmem>>, %arg5: memref<32x32xbf16, #tpu.memory_space<vmem>>, %arg6: memref<1x32xf32, #tpu.memory_space<vmem>>, %arg7: memref<32x32xbf16, #tpu.memory_space<vmem>>, %arg8: memref<1x32xf32, #tpu.memory_space<vmem>>, %arg9: memref<1x8x32xf32, #tpu.memory_space<vmem>>) attributes {dimension_semantics = [#tpu.dimension_semantics<parallel>], iteration_bounds = array<i64: 2>, scalar_prefetch = 0 : i64, scratch_operands = 0 : i64, tpu.core_type = #tpu.core_type<tc>, window_params = [{transform_indices = @transform_0, window_bounds = array<i64: 1, 8, 32>}, {pipeline_mode = #tpu.pipeline_mode<synchronous>, transform_indices = @transform_1, window_bounds = array<i64: 8, 32>}, {pipeline_mode = #tpu.pipeline_mode<synchronous>, transform_indices = @transform_2, window_bounds = array<i64: 32, 96>}, {pipeline_mode = #tpu.pipeline_mode<synchronous>, transform_indices = @transform_3, window_bounds = array<i64: 1, 96>}, {pipeline_mode = #tpu.pipeline_mode<synchronous>, transform_indices = @transform_4, window_bounds = array<i64: 32, 32>}, {pipeline_mode = #tpu.pipeline_mode<synchronous>, transform_indices = @transform_5, window_bounds = array<i64: 1, 32>}, {pipeline_mode = #tpu.pipeline_mode<synchronous>, transform_indices = @transform_6, window_bounds = array<i64: 32, 32>}, {pipeline_mode = #tpu.pipeline_mode<synchronous>, transform_indices = @transform_7, window_bounds = array<i64: 1, 32>}, {transform_indices = @transform_8, window_bounds = array<i64: 1, 8, 32>}]} {
    %c0 = arith.constant 0 : index
    %c0_0 = arith.constant 0 : index
    %c0_1 = arith.constant 0 : index
    %0 = vector.load %arg1[%c0, %c0_0, %c0_1] : memref<1x8x32xbf16, #tpu.memory_space<vmem>>, vector<1x8x32xbf16>
    %1 = arith.extf %0 : vector<1x8x32xbf16> to vector<1x8x32xf32>
    %c0_2 = arith.constant 0 : index
    %c0_3 = arith.constant 0 : index
    %2 = vector.load %arg2[%c0_2, %c0_3] : memref<8x32xbf16, #tpu.memory_space<vmem>>, vector<8x32xbf16>
    %3 = arith.extf %2 : vector<8x32xbf16> to vector<8x32xf32>
    %4 = vector.shape_cast %3 : vector<8x32xf32> to vector<1x8x32xf32>
    %5 = arith.addf %1, %4 : vector<1x8x32xf32>
    %6 = vector.shape_cast %5 : vector<1x8x32xf32> to vector<8x32xf32>
    %7 = arith.truncf %6 : vector<8x32xf32> to vector<8x32xbf16>
    %c0_4 = arith.constant 0 : index
    %c0_5 = arith.constant 0 : index
    %8 = vector.load %arg3[%c0_4, %c0_5] : memref<32x96xbf16, #tpu.memory_space<vmem>>, vector<32x96xbf16>
    %cst = arith.constant dense<0.000000e+00> : vector<8x96xf32>
    %9 = tpu.matmul %7, %8, %cst {dimension_numbers = #tpu.dot_dimension_numbers<[1], [0], [0], [1], [0, 0, 1, 1], [], []>} : vector<8x32xbf16>, vector<32x96xbf16>, vector<8x96xf32> -> vector<8x96xf32>
    %c0_6 = arith.constant 0 : index
    %c0_7 = arith.constant 0 : index
    %10 = vector.load %arg4[%c0_6, %c0_7] : memref<1x96xf32, #tpu.memory_space<vmem>>, vector<1x96xf32>
    %11 = vector.broadcast %10 : vector<1x96xf32> to vector<8x96xf32>
    %12 = arith.addf %9, %11 : vector<8x96xf32>
    %13 = vector.extract_strided_slice %12 {offsets = [0, 0], sizes = [8, 8], strides = [1, 1]} : vector<8x96xf32> to vector<8x8xf32>
    %14 = vector.shape_cast %13 : vector<8x8xf32> to vector<1x8x8xf32>
    %15 = vector.extract_strided_slice %12 {offsets = [0, 8], sizes = [8, 8], strides = [1, 1]} : vector<8x96xf32> to vector<8x8xf32>
    %16 = vector.shape_cast %15 : vector<8x8xf32> to vector<1x8x8xf32>
    %17 = vector.extract_strided_slice %12 {offsets = [0, 16], sizes = [8, 8], strides = [1, 1]} : vector<8x96xf32> to vector<8x8xf32>
    %18 = vector.shape_cast %17 : vector<8x8xf32> to vector<1x8x8xf32>
    %19 = vector.extract_strided_slice %12 {offsets = [0, 24], sizes = [8, 8], strides = [1, 1]} : vector<8x96xf32> to vector<8x8xf32>
    %20 = vector.shape_cast %19 : vector<8x8xf32> to vector<1x8x8xf32>
    %21 = vector.shape_cast %14 : vector<1x8x8xf32> to vector<1x1x8x8xf32>
    %22 = vector.shape_cast %16 : vector<1x8x8xf32> to vector<1x1x8x8xf32>
    %23 = vector.shape_cast %18 : vector<1x8x8xf32> to vector<1x1x8x8xf32>
    %24 = vector.shape_cast %20 : vector<1x8x8xf32> to vector<1x1x8x8xf32>
    %25 = tpu.concatenate %21, %22, %23, %24 in 0 : vector<1x1x8x8xf32>, vector<1x1x8x8xf32>, vector<1x1x8x8xf32>, vector<1x1x8x8xf32> -> vector<4x1x8x8xf32>
    %26 = vector.shape_cast %25 : vector<4x1x8x8xf32> to vector<4x8x8xf32>
    %27 = vector.extract_strided_slice %12 {offsets = [0, 32], sizes = [8, 8], strides = [1, 1]} : vector<8x96xf32> to vector<8x8xf32>
    %28 = vector.shape_cast %27 : vector<8x8xf32> to vector<1x8x8xf32>
    %29 = vector.extract_strided_slice %12 {offsets = [0, 40], sizes = [8, 8], strides = [1, 1]} : vector<8x96xf32> to vector<8x8xf32>
    %30 = vector.shape_cast %29 : vector<8x8xf32> to vector<1x8x8xf32>
    %31 = vector.extract_strided_slice %12 {offsets = [0, 48], sizes = [8, 8], strides = [1, 1]} : vector<8x96xf32> to vector<8x8xf32>
    %32 = vector.shape_cast %31 : vector<8x8xf32> to vector<1x8x8xf32>
    %33 = vector.extract_strided_slice %12 {offsets = [0, 56], sizes = [8, 8], strides = [1, 1]} : vector<8x96xf32> to vector<8x8xf32>
    %34 = vector.shape_cast %33 : vector<8x8xf32> to vector<1x8x8xf32>
    %35 = vector.shape_cast %28 : vector<1x8x8xf32> to vector<1x1x8x8xf32>
    %36 = vector.shape_cast %30 : vector<1x8x8xf32> to vector<1x1x8x8xf32>
    %37 = vector.shape_cast %32 : vector<1x8x8xf32> to vector<1x1x8x8xf32>
    %38 = vector.shape_cast %34 : vector<1x8x8xf32> to vector<1x1x8x8xf32>
    %39 = tpu.concatenate %35, %36, %37, %38 in 0 : vector<1x1x8x8xf32>, vector<1x1x8x8xf32>, vector<1x1x8x8xf32>, vector<1x1x8x8xf32> -> vector<4x1x8x8xf32>
    %40 = vector.shape_cast %39 : vector<4x1x8x8xf32> to vector<4x8x8xf32>
    %41 = vector.extract_strided_slice %12 {offsets = [0, 64], sizes = [8, 8], strides = [1, 1]} : vector<8x96xf32> to vector<8x8xf32>
    %42 = vector.shape_cast %41 : vector<8x8xf32> to vector<1x8x8xf32>
    %43 = vector.extract_strided_slice %12 {offsets = [0, 72], sizes = [8, 8], strides = [1, 1]} : vector<8x96xf32> to vector<8x8xf32>
    %44 = vector.shape_cast %43 : vector<8x8xf32> to vector<1x8x8xf32>
    %45 = vector.extract_strided_slice %12 {offsets = [0, 80], sizes = [8, 8], strides = [1, 1]} : vector<8x96xf32> to vector<8x8xf32>
    %46 = vector.shape_cast %45 : vector<8x8xf32> to vector<1x8x8xf32>
    %47 = vector.extract_strided_slice %12 {offsets = [0, 88], sizes = [8, 8], strides = [1, 1]} : vector<8x96xf32> to vector<8x8xf32>
    %48 = vector.shape_cast %47 : vector<8x8xf32> to vector<1x8x8xf32>
    %49 = vector.shape_cast %42 : vector<1x8x8xf32> to vector<1x1x8x8xf32>
    %50 = vector.shape_cast %44 : vector<1x8x8xf32> to vector<1x1x8x8xf32>
    %51 = vector.shape_cast %46 : vector<1x8x8xf32> to vector<1x1x8x8xf32>
    %52 = vector.shape_cast %48 : vector<1x8x8xf32> to vector<1x1x8x8xf32>
    %53 = tpu.concatenate %49, %50, %51, %52 in 0 : vector<1x1x8x8xf32>, vector<1x1x8x8xf32>, vector<1x1x8x8xf32>, vector<1x1x8x8xf32> -> vector<4x1x8x8xf32>
    %54 = vector.shape_cast %53 : vector<4x1x8x8xf32> to vector<4x8x8xf32>
    %55 = arith.mulf %26, %26 : vector<4x8x8xf32>
    %cst_8 = arith.constant dense<0.000000e+00> : vector<4x8xf32>
    %56 = vector.multi_reduction <add>, %55, %cst_8 [2] : vector<4x8x8xf32> to vector<4x8xf32>
    %57 = vector.shape_cast %56 : vector<4x8xf32> to vector<4x8x1xf32>
    %58 = arith.mulf %40, %40 : vector<4x8x8xf32>
    %cst_9 = arith.constant dense<0.000000e+00> : vector<4x8xf32>
    %59 = vector.multi_reduction <add>, %58, %cst_9 [2] : vector<4x8x8xf32> to vector<4x8xf32>
    %60 = vector.shape_cast %59 : vector<4x8xf32> to vector<4x1x8xf32>
    %61 = arith.truncf %26 : vector<4x8x8xf32> to vector<4x8x8xbf16>
    %62 = arith.truncf %40 : vector<4x8x8xf32> to vector<4x8x8xbf16>
    "tpu.trace_start"() <{level = 10 : i32, message = "gqd,gkd->gqk"}> : () -> ()
    %cst_10 = arith.constant dense<0.000000e+00> : vector<4x8x8xf32>
    %63 = tpu.matmul %61, %62, %cst_10 {dimension_numbers = #tpu.dot_dimension_numbers<[2], [2], [1], [1], [0, 0, 0, 1, 1, 1], [0], [0]>} : vector<4x8x8xbf16>, vector<4x8x8xbf16>, vector<4x8x8xf32> -> vector<4x8x8xf32>
    "tpu.trace_stop"() : () -> ()
    %64 = arith.addf %63, %63 : vector<4x8x8xf32>
    %cst_11 = arith.constant 1.000000e+00 : f32
    %65 = vector.broadcast %cst_11 : f32 to vector<4x1x8xf32>
    %66 = arith.addf %65, %60 : vector<4x1x8xf32>
    %67 = vector.broadcast %66 : vector<4x1x8xf32> to vector<4x8x8xf32>
    %68 = arith.subf %67, %64 : vector<4x8x8xf32>
    %cst_12 = arith.constant 1.000000e+00 : f32
    %69 = vector.broadcast %cst_12 : f32 to vector<4x8x1xf32>
    %70 = arith.subf %69, %57 : vector<4x8x1xf32>
    %71 = vector.broadcast %57 : vector<4x8x1xf32> to vector<4x8x8xf32>
    %72 = vector.broadcast %60 : vector<4x1x8xf32> to vector<4x8x8xf32>
    %73 = arith.mulf %71, %72 : vector<4x8x8xf32>
    %cst_13 = arith.constant 1.000000e+00 : f32
    %74 = vector.broadcast %cst_13 : f32 to vector<4x8x8xf32>
    %75 = arith.addf %74, %73 : vector<4x8x8xf32>
    %76 = arith.subf %75, %64 : vector<4x8x8xf32>
    %cst_14 = arith.constant 1.000000e-15 : f32
    %77 = vector.broadcast %cst_14 : f32 to vector<4x8x8xf32>
    %78 = arith.maximumf %76, %77 : vector<4x8x8xf32>
    %79 = arith.mulf %68, %68 : vector<4x8x8xf32>
    %80 = vector.broadcast %57 : vector<4x8x1xf32> to vector<4x8x8xf32>
    %81 = arith.mulf %79, %80 : vector<4x8x8xf32>
    %82 = vector.broadcast %70 : vector<4x8x1xf32> to vector<4x8x8xf32>
    %83 = arith.mulf %68, %82 : vector<4x8x8xf32>
    %84 = arith.mulf %83, %64 : vector<4x8x8xf32>
    %85 = arith.subf %81, %84 : vector<4x8x8xf32>
    %86 = arith.mulf %70, %70 : vector<4x8x1xf32>
    %87 = vector.broadcast %86 : vector<4x8x1xf32> to vector<4x8x8xf32>
    %88 = vector.broadcast %60 : vector<4x1x8xf32> to vector<4x8x8xf32>
    %89 = arith.mulf %87, %88 : vector<4x8x8xf32>
    %90 = arith.addf %85, %89 : vector<4x8x8xf32>
    %cst_15 = arith.constant 0.000000e+00 : f32
    %91 = vector.broadcast %cst_15 : f32 to vector<4x8x8xf32>
    %92 = arith.maximumf %90, %91 : vector<4x8x8xf32>
    %93 = math.sqrt %92 : vector<4x8x8xf32>
    %94 = arith.subf %78, %93 : vector<4x8x8xf32>
    %95 = arith.addf %78, %93 : vector<4x8x8xf32>
    %96 = tpu.reciprocal %95 {approx = true} : vector<4x8x8xf32> -> vector<4x8x8xf32>
    %97 = arith.mulf %94, %96 : vector<4x8x8xf32>
    %cst_16 = arith.constant 5.00002488E-6 : f32
    %98 = vector.broadcast %cst_16 : f32 to vector<4x8x8xf32>
    %99 = arith.maximumf %97, %98 : vector<4x8x8xf32>
    %cst_17 = arith.constant dense<0.000000e+00> : vector<4x8xf32>
    %100 = vector.multi_reduction <add>, %99, %cst_17 [2] : vector<4x8x8xf32> to vector<4x8xf32>
    %101 = vector.shape_cast %100 : vector<4x8xf32> to vector<4x8x1xf32>
    %102 = tpu.reciprocal %101 {approx = true} : vector<4x8x1xf32> -> vector<4x8x1xf32>
    %103 = vector.broadcast %102 : vector<4x8x1xf32> to vector<4x8x8xf32>
    %104 = arith.mulf %99, %103 : vector<4x8x8xf32>
    %105 = arith.truncf %104 : vector<4x8x8xf32> to vector<4x8x8xbf16>
    %106 = arith.truncf %54 : vector<4x8x8xf32> to vector<4x8x8xbf16>
    "tpu.trace_start"() <{level = 10 : i32, message = "gqk,gkd->gqd"}> : () -> ()
    %cst_18 = arith.constant dense<0.000000e+00> : vector<4x8x8xf32>
    %107 = tpu.matmul %105, %106, %cst_18 {dimension_numbers = #tpu.dot_dimension_numbers<[2], [1], [1], [2], [0, 0, 0, 1, 1, 2], [0], [0]>} : vector<4x8x8xbf16>, vector<4x8x8xbf16>, vector<4x8x8xf32> -> vector<4x8x8xf32>
    "tpu.trace_stop"() : () -> ()
    %108 = vector.shape_cast %107 : vector<4x8x8xf32> to vector<4x1x8x8xf32>
    %109 = vector.extract_strided_slice %108 {offsets = [0, 0, 0, 0], sizes = [1, 1, 8, 8], strides = [1, 1, 1, 1]} : vector<4x1x8x8xf32> to vector<1x1x8x8xf32>
    %110 = vector.shape_cast %109 : vector<1x1x8x8xf32> to vector<1x8x8xf32>
    %111 = vector.extract_strided_slice %108 {offsets = [1, 0, 0, 0], sizes = [1, 1, 8, 8], strides = [1, 1, 1, 1]} : vector<4x1x8x8xf32> to vector<1x1x8x8xf32>
    %112 = vector.shape_cast %111 : vector<1x1x8x8xf32> to vector<1x8x8xf32>
    %113 = vector.extract_strided_slice %108 {offsets = [2, 0, 0, 0], sizes = [1, 1, 8, 8], strides = [1, 1, 1, 1]} : vector<4x1x8x8xf32> to vector<1x1x8x8xf32>
    %114 = vector.shape_cast %113 : vector<1x1x8x8xf32> to vector<1x8x8xf32>
    %115 = vector.extract_strided_slice %108 {offsets = [3, 0, 0, 0], sizes = [1, 1, 8, 8], strides = [1, 1, 1, 1]} : vector<4x1x8x8xf32> to vector<1x1x8x8xf32>
    %116 = vector.shape_cast %115 : vector<1x1x8x8xf32> to vector<1x8x8xf32>
    %117 = tpu.concatenate %110, %112, %114, %116 in 2 : vector<1x8x8xf32>, vector<1x8x8xf32>, vector<1x8x8xf32>, vector<1x8x8xf32> -> vector<1x8x32xf32>
    %118 = vector.shape_cast %117 : vector<1x8x32xf32> to vector<8x32xf32>
    %119 = arith.truncf %118 : vector<8x32xf32> to vector<8x32xbf16>
    %c0_19 = arith.constant 0 : index
    %c0_20 = arith.constant 0 : index
    %120 = vector.load %arg5[%c0_19, %c0_20] : memref<32x32xbf16, #tpu.memory_space<vmem>>, vector<32x32xbf16>
    %cst_21 = arith.constant dense<0.000000e+00> : vector<8x32xf32>
    %121 = tpu.matmul %119, %120, %cst_21 {dimension_numbers = #tpu.dot_dimension_numbers<[1], [0], [0], [1], [0, 0, 1, 1], [], []>} : vector<8x32xbf16>, vector<32x32xbf16>, vector<8x32xf32> -> vector<8x32xf32>
    %c0_22 = arith.constant 0 : index
    %c0_23 = arith.constant 0 : index
    %122 = vector.load %arg6[%c0_22, %c0_23] : memref<1x32xf32, #tpu.memory_space<vmem>>, vector<1x32xf32>
    %123 = vector.broadcast %122 : vector<1x32xf32> to vector<8x32xf32>
    %124 = arith.addf %121, %123 : vector<8x32xf32>
    %125 = arith.truncf %124 : vector<8x32xf32> to vector<8x32xbf16>
    %c0_24 = arith.constant 0 : index
    %c0_25 = arith.constant 0 : index
    %126 = vector.load %arg7[%c0_24, %c0_25] : memref<32x32xbf16, #tpu.memory_space<vmem>>, vector<32x32xbf16>
    %cst_26 = arith.constant dense<0.000000e+00> : vector<8x32xf32>
    %127 = tpu.matmul %125, %126, %cst_26 {dimension_numbers = #tpu.dot_dimension_numbers<[1], [0], [0], [1], [0, 0, 1, 1], [], []>} : vector<8x32xbf16>, vector<32x32xbf16>, vector<8x32xf32> -> vector<8x32xf32>
    %c0_27 = arith.constant 0 : index
    %c0_28 = arith.constant 0 : index
    %128 = vector.load %arg8[%c0_27, %c0_28] : memref<1x32xf32, #tpu.memory_space<vmem>>, vector<1x32xf32>
    %129 = vector.broadcast %128 : vector<1x32xf32> to vector<8x32xf32>
    %130 = arith.addf %127, %129 : vector<8x32xf32>
    %cst_29 = arith.constant 0.000000e+00 : f32
    %131 = vector.broadcast %cst_29 : f32 to vector<8x32xf32>
    %132 = arith.maximumf %130, %131 : vector<8x32xf32>
    %133 = vector.shape_cast %132 : vector<8x32xf32> to vector<1x8x32xf32>
    %c0_30 = arith.constant 0 : index
    %c0_31 = arith.constant 0 : index
    %c0_32 = arith.constant 0 : index
    %134 = vector.load %arg9[%c0_30, %c0_31, %c0_32] : memref<1x8x32xf32, #tpu.memory_space<vmem>>, vector<1x8x32xf32>
    tpu.vector_store %arg9[%c0_30, %c0_31, %c0_32], %133 {strides = array<i32>} : memref<1x8x32xf32, #tpu.memory_space<vmem>>, vector<1x8x32xf32>,
    return
  }
  func.func @transform_0(%arg0: i32) -> (i32, i32, i32) {
    %c0_i32 = arith.constant 0 : i32
    %c0_i32_0 = arith.constant 0 : i32
    %c0_i32_1 = arith.constant 0 : i32
    return %arg0, %c0_i32, %c0_i32_0 : i32, i32, i32
  }
  func.func @transform_1(%arg0: i32) -> (i32, i32) {
    %c0_i32 = arith.constant 0 : i32
    %c0_i32_0 = arith.constant 0 : i32
    %c0_i32_1 = arith.constant 0 : i32
    return %c0_i32, %c0_i32_0 : i32, i32
  }
  func.func @transform_2(%arg0: i32) -> (i32, i32) {
    %c0_i32 = arith.constant 0 : i32
    %c0_i32_0 = arith.constant 0 : i32
    %c0_i32_1 = arith.constant 0 : i32
    return %c0_i32, %c0_i32_0 : i32, i32
  }
  func.func @transform_3(%arg0: i32) -> (i32, i32) {
    %c0_i32 = arith.constant 0 : i32
    %c0_i32_0 = arith.constant 0 : i32
    %c0_i32_1 = arith.constant 0 : i32
    return %c0_i32, %c0_i32_0 : i32, i32
  }
  func.func @transform_4(%arg0: i32) -> (i32, i32) {
    %c0_i32 = arith.constant 0 : i32
    %c0_i32_0 = arith.constant 0 : i32
    %c0_i32_1 = arith.constant 0 : i32
    return %c0_i32, %c0_i32_0 : i32, i32
  }
  func.func @transform_5(%arg0: i32) -> (i32, i32) {
    %c0_i32 = arith.constant 0 : i32
    %c0_i32_0 = arith.constant 0 : i32
    %c0_i32_1 = arith.constant 0 : i32
    return %c0_i32, %c0_i32_0 : i32, i32
  }
  func.func @transform_6(%arg0: i32) -> (i32, i32) {
    %c0_i32 = arith.constant 0 : i32
    %c0_i32_0 = arith.constant 0 : i32
    %c0_i32_1 = arith.constant 0 : i32
    return %c0_i32, %c0_i32_0 : i32, i32
  }
  func.func @transform_7(%arg0: i32) -> (i32, i32) {
    %c0_i32 = arith.constant 0 : i32
    %c0_i32_0 = arith.constant 0 : i32
    %c0_i32_1 = arith.constant 0 : i32
    return %c0_i32, %c0_i32_0 : i32, i32
  }
  func.func @transform_8(%arg0: i32) -> (i32, i32, i32) {
    %c0_i32 = arith.constant 0 : i32
    %c0_i32_0 = arith.constant 0 : i32
    %c0_i32_1 = arith.constant 0 : i32
    return %arg0, %c0_i32, %c0_i32_0 : i32, i32, i32
  }
}

</mosaic_0001>

<bundles_post_ra>
// kernel: tpu_custom_call.1
= control target key start
LH: loop header
LB: loop body
LE: loop exit
PB: predicated region body
PF: predicated region fallthrough
CT: control target
= control target key end

     0   :  { %13 = vsyncpa [#allocation3], 0  ;;  %s5127_s0 = inlined_call_operand.hbm [shape: bf16[2,8,32], index: 0, kind: input, shape index: {}]   ;;  %s5128_s1 = inlined_call_operand.hbm [shape: bf16[8,32], index: 1, kind: input, shape index: {}]   ;;  %s5129_s2 = inlined_call_operand.hbm [shape: bf16[32,96], index: 2, kind: input, shape index: {}]   ;;  %s5130_s3 = inlined_call_operand.hbm [shape: f32[1,96], index: 3, kind: input, shape index: {}]   ;;  %s5131_s4 = inlined_call_operand.hbm [shape: bf16[32,32], index: 4, kind: input, shape index: {}]   ;;  %s5132_s5 = inlined_call_operand.hbm [shape: f32[1,32], index: 5, kind: input, shape index: {}]   ;;  %s5133_s6 = inlined_call_operand.hbm [shape: bf16[32,32], index: 6, kind: input, shape index: {}]   ;;  %s5134_s7 = inlined_call_operand.hbm [shape: f32[1,32], index: 7, kind: input, shape index: {}]   ;;  %s5135_s8 = inlined_call_operand.hbm [shape: f32[2,8,32], index: 8, kind: output, shape index: {}]  }
   0x1   :  { %15 = vsyncpa [#allocation3 + $0x1], 0 }
   0x2   :  { %16 = vsyncpa [#allocation6], 0 }
   0x3   :  { %17 = vsyncpa [#allocation9], 0 }
   0x4   :  { %18 = vsyncpa [#allocation12], 0 }
   0x5   :  { %19 = vsyncpa [#allocation15], 0 }
   0x6   :  { %20 = vsyncpa [#allocation4], 0 }
   0x7   :  { %22 = vsyncpa [#allocation4 + $0x1], 0  ;;  %s3732_s27 = smov 0   ;;  %s3734_s28 = smov 0  }
   0x8   :  { %s3736_s29 = smov 0   ;;  %s3738_s30 = smov 0  }
   0x9 LB: > { %s3665_s9 = smov [#allocation5]   ;;  %s3753_s11 = sadd.s32 4294967295, %s3663_s30   ;;  %s3663_s30 = sphi %s3738_s30, %s5236_s30   ;;  %s3659_s29 = sphi %s3736_s29, %s5235_s29   ;;  %s3655_s28 = sphi %s3734_s28, %s5234_s28   ;;  %s3651_s27 = sphi %s3732_s27, %s5233_s27  }
   0xa   : > { %s245_s10 = sshll.u32 %s3665_s9, 4  ;;  %p2995_p0 = scmp.ge.s32.totalorder %s3663_s30, 1  ;;  %s3758_s10 = int_to_ptr.vmem [resolvable:$true] %s245_s10 }
   0xb   : > { %p5136_p1 = scmp.eq.s32.totalorder %s3753_s11, 0  ;;  %p232_p2 = scmp.lt.s32.totalorder %s3663_s30, 3 }
   0xc   : > { %s3666_s13 = smov [#allocation8]   ;;  %s3667_s15 = smov [#allocation11]  }
   0xd   : > { %p3760_p3 = pnand %p2995_p0, %p232_p2  ;;  %s269_s14 = sshll.u32 %s3666_s13, 4  ;;  %s3767_s14 = int_to_ptr.vmem [resolvable:$true] %s269_s14 }
   0xe   : > { %s293_s16 = sshll.u32 %s3667_s15, 4  ;;  %s3668_s18 = smov [#allocation7]   ;;  %s3775_s16 = int_to_ptr.vmem [resolvable:$true] %s293_s16 }
   0xf   : > { %s5155_s12 = scalar_select %p3760_p3, 1, 0 }
  0x10   : > { %p3169_p5 = pneg %p3760_p3  ;;  %s3777_s19 = sshll.u32 %s3668_s18, 4  ;;  %s256_s19 = int_to_ptr.vmem [resolvable:$true] %s3777_s19 }
  0x11   : > { %s3355_s22 = scalar_lea.hbm %s5128_s1, 64 }
  0x12   : > { %p3771_p6 = pnand %p3169_p5, %p5136_p1  ;;  %p3356_p7 = scmp.ne.s32.totalorder %s5128_s1, %s3355_s22 }
  0x13   : > { %p3362_p11 = scmp.lt.u32.totalorder %s3355_s22, %s5128_s1 }
  0x14   : > { %p3787_p8 = pneg %p3771_p6 }
  0x16   : > { %p3358_p9 = pnand %p3787_p8, %p3356_p7 }
  0x18   : > { %p3359_p10 = pneg %p3358_p9 }
  0x1a   : > { %p3364_p12 = pnand %p3362_p11, %p3359_p10 }
  0x1c   : > { %3367 = shalt.err (!%p3364_p12)
}
  0x1d   : > { %s3368_s13 = scalar_lea.vmem %s3758_s10, 64  ;;  %p3376_p5 = scmp.lt.s32.totalorder %s3758_s10, %s3758_s10 }
  0x1e   : > { %p3369_p13 = scmp.ne.s32.totalorder %s3758_s10, %s3368_s13  ;;  %p3377_p4 = scmp.lt.s32.totalorder %s3368_s13, %s3368_s13 }
  0x20   : > { %p3371_p0 = pnand %p3369_p13, %p3787_p8  ;;  %p3378_p7 = por %p3377_p4, %p3376_p5 }
  0x22   : > { %p3372_p2 = pneg %p3371_p0 }
  0x24   : > { %p3379_p9 = pnand %p3378_p7, %p3372_p2 }
  0x26   : > { %3382 = shalt.err (!%p3379_p9)
}
  0x27   : > { %3172 = dma.hbm_to_vmem [thread:$0]  (!%p3771_p6), %s5128_s1, 64, %s3758_s10, [#allocation6]  }
  0x28   : > { %s3383_s22 = scalar_lea.hbm %s5130_s3, 16 }
  0x29   : > { %p3384_p10 = scmp.ne.s32.totalorder %s5130_s3, %s3383_s22  ;;  %p3390_p12 = scmp.lt.u32.totalorder %s3383_s22, %s5130_s3 }
  0x2b   : > { %p3386_p4 = pnand %p3384_p10, %p3787_p8 }
  0x2d   : > { %p3387_p11 = pneg %p3386_p4 }
  0x2f   : > { %p3392_p13 = pnand %p3390_p12, %p3387_p11 }
  0x31   : > { %3395 = shalt.err (!%p3392_p13)
}
  0x32   : > { %s3396_s10 = scalar_lea.vmem %s3767_s14, 16  ;;  %s3403_s13 = scalar_lea.vmem %s3767_s14, 32 }
  0x33   : > { %p3397_p0 = scmp.ne.s32.totalorder %s3767_s14, %s3396_s10  ;;  %p3404_p7 = scmp.lt.s32.totalorder %s3767_s14, %s3767_s14 }
  0x34   : > { %p3405_p9 = scmp.lt.s32.totalorder %s3403_s13, %s3396_s10 }
  0x35   : > { %p3399_p2 = pnand %p3397_p0, %p3787_p8 }
  0x36   : > { %p3406_p10 = por %p3405_p9, %p3404_p7 }
  0x37   : > { %p3400_p5 = pneg %p3399_p2 }
  0x39   : > { %p3407_p4 = pnand %p3406_p10, %p3400_p5 }
  0x3b   : > { %3410 = shalt.err (!%p3407_p4)
}
  0x3c   : > { %3178 = dma.hbm_to_vmem [thread:$0]  (!%p3771_p6), %s5130_s3, 16, %s3767_s14, [#allocation9]  }
  0x3d   : > { %s3411_s22 = scalar_lea.hbm %s5132_s5, 16 }
  0x3e   : > { %p3412_p11 = scmp.ne.s32.totalorder %s5132_s5, %s3411_s22  ;;  %p3418_p0 = scmp.lt.u32.totalorder %s3411_s22, %s5132_s5 }
  0x40   : > { %p3414_p12 = pnand %p3412_p11, %p3787_p8 }
  0x42   : > { %p3415_p13 = pneg %p3414_p12 }
  0x44   : > { %p3420_p2 = pnand %p3418_p0, %p3415_p13 }
  0x46   : > { %3423 = shalt.err (!%p3420_p2)
}
  0x47   : > { %s3424_s14 = scalar_lea.vmem %s3775_s16, 16  ;;  %s3431_s10 = scalar_lea.vmem %s3775_s16, 32 }
  0x48   : > { %p3425_p5 = scmp.ne.s32.totalorder %s3775_s16, %s3424_s14  ;;  %p3432_p10 = scmp.lt.s32.totalorder %s3775_s16, %s3775_s16 }
  0x49   : > { %p3433_p4 = scmp.lt.s32.totalorder %s3431_s10, %s3424_s14 }
  0x4a   : > { %p3427_p7 = pnand %p3425_p5, %p3787_p8 }
  0x4b   : > { %p3434_p11 = por %p3433_p4, %p3432_p10 }
  0x4c   : > { %p3428_p9 = pneg %p3427_p7 }
  0x4e   : > { %p3435_p12 = pnand %p3434_p11, %p3428_p9 }
  0x50   : > { %3438 = shalt.err (!%p3435_p12)
}
  0x51   : > { %3184 = dma.hbm_to_vmem [thread:$0]  (!%p3771_p6), %s5132_s5, 16, %s3775_s16, [#allocation12]  }
  0x52   : > { %s3439_s21 = scalar_lea.hbm %s5129_s2, 256 }
  0x53   : > { %p3440_p13 = scmp.ne.s32.totalorder %s5129_s2, %s3439_s21  ;;  %p3446_p5 = scmp.lt.u32.totalorder %s3439_s21, %s5129_s2 }
  0x55   : > { %p3442_p0 = pnand %p3440_p13, %p3787_p8 }
  0x57   : > { %p3443_p2 = pneg %p3442_p0 }
  0x59   : > { %p3448_p7 = pnand %p3446_p5, %p3443_p2 }
  0x5b   : > { %3451 = shalt.err (!%p3448_p7)
}
  0x5c   : > { %s3452_s9 = scalar_lea.vmem %s256_s19, 256  ;;  %p3460_p11 = scmp.lt.s32.totalorder %s256_s19, %s256_s19 }
  0x5d   : > { %p3453_p9 = scmp.ne.s32.totalorder %s256_s19, %s3452_s9  ;;  %p3461_p12 = scmp.lt.s32.totalorder %s3452_s9, %s3452_s9 }
  0x5f   : > { %p3455_p10 = pnand %p3453_p9, %p3787_p8  ;;  %p3462_p1 = por %p3461_p12, %p3460_p11 }
  0x61   : > { %p3456_p4 = pneg %p3455_p10 }
  0x63   : > { %p3463_p3 = pnand %p3462_p1, %p3456_p4 }
  0x65   : > { %3466 = shalt.err (!%p3463_p3)
}
  0x66   : > { %s3669_s16 = smov 64   ;;  %s3670_s14 = smov 4  }
  0x67   : > { %3175 = dma.hbm_to_vmem [thread:$0]  (!%p3771_p6), %s5129_s2, 256, %s256_s19, [#allocation6], %s3669_s16, %s3669_s16, %s3670_s14  }
  0x68   : > { %s3671_s15 = smov [#allocation10]   ;;  %s3672_s20 = smov [#allocation13]  }
  0x69   : > { %s279_s18 = sshll.u32 %s3671_s15, 4  ;;  %s303_s21 = sshll.u32 %s3672_s20, 4  ;;  %s280_s18 = int_to_ptr.vmem [resolvable:$true] %s279_s18  ;;  %s3878_s21 = int_to_ptr.vmem [resolvable:$true] %s303_s21 }
  0x6a   : > { %s3467_s24 = scalar_lea.hbm %s5131_s4, 256 }
  0x6b   : > { %p3468_p1 = scmp.ne.s32.totalorder %s5131_s4, %s3467_s24  ;;  %p3474_p0 = scmp.lt.u32.totalorder %s3467_s24, %s5131_s4 }
  0x6d   : > { %p3470_p3 = pnand %p3468_p1, %p3787_p8 }
  0x6f   : > { %p3471_p13 = pneg %p3470_p3 }
  0x71   : > { %p3476_p2 = pnand %p3474_p0, %p3471_p13 }
  0x73   : > { %3479 = shalt.err (!%p3476_p2)
}
  0x74   : > { %s3480_s13 = scalar_lea.vmem %s280_s18, 256  ;;  %p3488_p10 = scmp.lt.s32.totalorder %s280_s18, %s280_s18 }
  0x75   : > { %p3481_p5 = scmp.ne.s32.totalorder %s280_s18, %s3480_s13  ;;  %p3489_p4 = scmp.lt.s32.totalorder %s3480_s13, %s3480_s13 }
  0x77   : > { %p3483_p7 = pnand %p3481_p5, %p3787_p8  ;;  %p3490_p11 = por %p3489_p4, %p3488_p10 }
  0x79   : > { %p3484_p9 = pneg %p3483_p7 }
  0x7b   : > { %p3491_p12 = pnand %p3490_p11, %p3484_p9 }
  0x7d   : > { %3494 = shalt.err (!%p3491_p12)
}
  0x7e   : > { %3181 = dma.hbm_to_vmem [thread:$0]  (!%p3771_p6), %s5131_s4, 256, %s280_s18, [#allocation9], %s3669_s16, %s3669_s16, %s3670_s14  }
  0x7f   : > { %s3495_s24 = scalar_lea.hbm %s5133_s6, 256 }
  0x80   : > { %p3496_p1 = scmp.ne.s32.totalorder %s5133_s6, %s3495_s24  ;;  %p3502_p0 = scmp.lt.u32.totalorder %s3495_s24, %s5133_s6 }
  0x82   : > { %p3498_p3 = pnand %p3496_p1, %p3787_p8 }
  0x84   : > { %p3499_p13 = pneg %p3498_p3 }
  0x86   : > { %p3504_p2 = pnand %p3502_p0, %p3499_p13 }
  0x88   : > { %3507 = shalt.err (!%p3504_p2)
}
  0x89   : > { %s3508_s18 = scalar_lea.vmem %s3878_s21, 256  ;;  %p3516_p10 = scmp.lt.s32.totalorder %s3878_s21, %s3878_s21 }
  0x8a   : > { %p3509_p5 = scmp.ne.s32.totalorder %s3878_s21, %s3508_s18  ;;  %p3517_p4 = scmp.lt.s32.totalorder %s3508_s18, %s3508_s18 }
  0x8c   : > { %p3511_p7 = pnand %p3509_p5, %p3787_p8  ;;  %p3518_p11 = por %p3517_p4, %p3516_p10 }
  0x8e   : > { %p3512_p9 = pneg %p3511_p7 }
  0x90   : > { %p3519_p12 = pnand %p3518_p11, %p3512_p9 }
  0x92   : > { %3522 = shalt.err (!%p3519_p12)
}
  0x93   : > { %3187 = dma.hbm_to_vmem [thread:$0]  (!%p3771_p6), %s5133_s6, 256, %s3878_s21, [#allocation12], %s3669_s16, %s3669_s16, %s3670_s14  }
  0x94   : > { %s3673_s20 = smov [#allocation14]   ;;  %s3523_s26 = scalar_lea.hbm %s5134_s7, 16 }
  0x95   : > { %s317_s22 = sshll.u32 %s3673_s20, 4  ;;  %p3524_p1 = scmp.ne.s32.totalorder %s5134_s7, %s3523_s26  ;;  %s318_s22 = int_to_ptr.vmem [resolvable:$true] %s317_s22 }
  0x96   : > { %p3530_p0 = scmp.lt.u32.totalorder %s3523_s26, %s5134_s7 }
  0x97   : > { %p3526_p3 = pnand %p3524_p1, %p3787_p8 }
  0x99   : > { %p3527_p13 = pneg %p3526_p3 }
  0x9b   : > { %p3532_p2 = pnand %p3530_p0, %p3527_p13 }
  0x9d   : > { %3535 = shalt.err (!%p3532_p2)
}
  0x9e   : > { %s3536_s16 = scalar_lea.vmem %s318_s22, 16  ;;  %s3543_s14 = scalar_lea.vmem %s318_s22, 32 }
  0x9f   : > { %p3537_p5 = scmp.ne.s32.totalorder %s318_s22, %s3536_s16  ;;  %p3544_p10 = scmp.lt.s32.totalorder %s318_s22, %s318_s22 }
  0xa0   : > { %p3545_p4 = scmp.lt.s32.totalorder %s3543_s14, %s3536_s16 }
  0xa1   : > { %p3539_p7 = pnand %p3537_p5, %p3787_p8 }
  0xa2   : > { %p3546_p11 = por %p3545_p4, %p3544_p10 }
  0xa3   : > { %p3540_p9 = pneg %p3539_p7 }
  0xa5   : > { %p3547_p12 = pnand %p3546_p11, %p3540_p9 }
  0xa7   : > { %3550 = shalt.err (!%p3547_p12)
}
  0xa8   : > { %3190 = dma.hbm_to_vmem [thread:$0]  (!%p3771_p6), %s5134_s7, 16, %s318_s22, [#allocation15]  }
  0xa9   : > { %s2994_s25 = sadd.s32 4294967294, %s3663_s30   ;;  %s3947_s17 = sadd.s32 1, %s3663_s30  }
  0xaa   : > { %s35_s15 = sadd.s32 1, %s3659_s29  ;;  %s32_s20 = ssub.s32 %s3663_s30, %s3947_s17 }
  0xab   : > { %p42_p8 = scmp.ne.s32.totalorder %s3659_s29, %s3655_s28  ;;  %p33_p1 = scmp.eq.s32.totalorder %s32_s20, 0 }
  0xac   : > { %p43_p3 = scmp.eq.s32.totalorder %s3663_s30, 0  ;;  %p48_p13 = scmp.ne.s32.totalorder %s3655_s28, %s3651_s27 }
  0xad   : > { %p219_p0 = scmp.eq.s32.totalorder %s3753_s11, 1  ;;  %p5158_p5 = scmp.eq.s32.totalorder %s3753_s11, 0 }
  0xae   : > { %s3959_s23 = scalar_select %p33_p1, %s3659_s29, %s35_s15  }
  0xaf   : > { %p44_p2 = por %p43_p3, %p42_p8  ;;  %p3963_p7 = por %p5158_p5, %p48_p13 }
  0xb0   : > { %p3967_p6 = por %p219_p0, %p42_p8  ;;  %p225_p9 = scmp.eq.s32.totalorder %s2994_s25, 1 }
  0xb1   : > { %p3206_p10 = scmp.lt.s32.totalorder %s3663_s30, 2  ;;  %s328_s26 = sand.u32 1, %s3659_s29  }
  0xb2   : > { %s5160_s22 = scalar_select %p3967_p6, 1, 0 }
  0xb3   : > { %p3973_p4 = por %p225_p9, %p48_p13  ;;  %s3004_s10 = sshll.u32 %s328_s26, 2 }
  0xb4   : > { %s3005_s19 = sshll.u32 %s3663_s30, 6  ;;  %s332_s21 = scalar_lea.vmem [#allocation2], %s3004_s10 }
  0xb5   : > { %s5161_s9 = scalar_select %p3973_p4, 1, 0 }
  0xb6   : > { %s3981_s14 = scalar_lea.hbm %s5127_s0, %s3005_s19  ;;  %s339_s13 = sshll.u32 %s332_s21, 4  ;;  %s3987_s13 = int_to_ptr.vmem [resolvable:$true] %s339_s13 }
  0xb7   : > { %p3983_p11 = pnand %p3206_p10, %p44_p2  ;;  %s329_s15 = scalar_lea.sflag [#allocation3], %s328_s26 }
  0xb8   : > { %s3551_s20 = scalar_lea.hbm %s3981_s14, 64  ;;  %s3556_s18 = scalar_lea.hbm %s5127_s0, 128 }
  0xb9   : > { %p3552_p12 = scmp.ne.s32.totalorder %s3981_s14, %s3551_s20  ;;  %p3553_p8 = pneg %p3983_p11 }
  0xba   : > { %p3557_p13 = scmp.lt.u32.totalorder %s3981_s14, %s5127_s0  ;;  %p3558_p0 = scmp.lt.u32.totalorder %s3556_s18, %s3551_s20 }
  0xbb   : > { %p3554_p1 = pnand %p3553_p8, %p3552_p12  ;;  %p3560_p5 = scmp.lt.u32.totalorder %s3551_s20, %s3981_s14 }
  0xbc   : > { %p3559_p2 = por %p3558_p0, %p3557_p13 }
  0xbd   : > { %p3555_p3 = pneg %p3554_p1 }
  0xbe   : > { %p3561_p9 = por %p3560_p5, %p3559_p2 }
  0xc0   : > { %p3562_p10 = pnand %p3561_p9, %p3555_p3 }
  0xc2   : > { %3565 = shalt.err (!%p3562_p10)
}
  0xc3   : > { %s3566_s26 = scalar_lea.vmem %s3987_s13, 64  ;;  %s3674_s19 = smov [#allocation2]  }
  0xc4   : > { %p3567_p12 = scmp.ne.s32.totalorder %s3987_s13, %s3566_s26  ;;  %s3571_s10 = sshll.u32 %s3674_s19, 4  ;;  %s3572_s10 = int_to_ptr.vmem [resolvable:$false] %s3571_s10 }
  0xc5   : > { %s3573_s16 = scalar_lea.vmem %s3572_s10, 128  ;;  %p3574_p6 = scmp.lt.s32.totalorder %s3987_s13, %s3572_s10 }
  0xc6   : > { %p3569_p1 = pnand %p3567_p12, %p3553_p8  ;;  %p3575_p13 = scmp.lt.s32.totalorder %s3573_s16, %s3566_s26 }
  0xc8   : > { %p3570_p4 = pneg %p3569_p1  ;;  %p3576_p0 = por %p3575_p13, %p3574_p6 }
  0xca   : > { %p3577_p2 = pnand %p3576_p0, %p3570_p4 }
  0xcc   : > { %3580 = shalt.err (!%p3577_p2)
}
  0xcd   : > { %3194 = dma.hbm_to_vmem [thread:$0]  (!%p3983_p11), %s3981_s14, 64, %s3987_s13, %s329_s15  }
  0xce   : > { %p5163_p3 = scmp.ne.s32.totalorder %s5155_s12, 0 }
  0xd0   : > { %348 = sbr.rel (%p5163_p3) target bundleno = 2247 (0x8c7), region = 52 }
  0xd7   : > { %s4017_s20 = sand.u32 1, %s3655_s28  }
  0xd8   : > { %s3007_s18 = sshll.u32 %s4017_s20, 2  ;;  %s351_s21 = scalar_lea.sflag [#allocation3], %s4017_s20 }
  0xd9   : > { %s354_s26 = scalar_lea.vmem [#allocation2], %s3007_s18 }
  0xda   : > { %3626 = dma.done.wait (%p3963_p7), %s351_s21, 64  }
  0xdb   : > { %3628 = vsyncadd (%p3963_p7), %s351_s21, 4294967232  ;;  %p5164_p6 = scmp.eq.s32.totalorder %s3753_s11, 0 }
  0xdd   : > { %3630 = dma.done.wait (%p5164_p6), [#allocation6], 320   ;;  %p5165_p4 = pmov %p5164_p6 }
  0xdf   : > { %3632 = vsyncadd (%p5165_p4), [#allocation6], 4294966976  ;;  %p5166_p11 = pmov %p5165_p4 }
  0xe0   : > { %p5167_p8 = pmov %p5165_p4 }
  0xe1   : > { %3634 = dma.done.wait (%p5166_p11), [#allocation9], 272  }
  0xe2   : > { %3636 = vsyncadd (%p5167_p8), [#allocation9], 4294967024  ;;  %p5168_p5 = pmov %p5165_p4 }
  0xe3   : > { %p5169_p9 = pmov %p5165_p4 }
  0xe4   : > { %3638 = dma.done.wait (%p5168_p5), [#allocation12], 272  }
  0xe5   : > { %3640 = vsyncadd (%p5169_p9), [#allocation12], 4294967024  ;;  %p5170_p7 = pmov %p5165_p4 }
  0xe6   : > { %p5171_p10 = pmov %p5165_p4 }
  0xe7   : > { %3642 = dma.done.wait (%p5170_p7), [#allocation15], 16  }
  0xe8   : > { %3644 = vsyncadd (%p5171_p10), [#allocation15], 4294967280  ;;  %v5139_v0 = vmov 0.0   ;;  %vm3676_vm0 = vmmov 0   ;;  %v3269_v1 = vld [vmem:[#allocation7] sm:$0xff]   ;;  %v3270_v2 = vld [vmem:[#allocation7 + $0x8] sm:$0xff]   ;;  %v756_v51 = vlaneseq }
  0xe9   : > { %3065 = vmatprep.subr.bf16.mxu0 %v5139_v0  ;;  %3069 = vmatprep.mubr.msk.bf16.mxu0 %vm3676_vm0, %v5139_v0  ;;  %v416_v3 = vld [vmem:[%s354_s26] sm:$0xf]  ;;  %v418_v4 = vld [vmem:[#allocation5] sm:$0xf]  ;;  %vm445_vm1 = vcmask 261120   ;;  %s3677_s12 = smov 104  }
  0xea   : > { %3073 = vmatprep.subr.bf16.mxu1 %v5139_v0  ;;  %3075 = vmatprep.mubr.msk.bf16.mxu1 %vm3676_vm0, %v5139_v0  ;;  %v417_v5 = vunpack.c.l.bf16 %v416_v3  ;;  %v419_v6 = vunpack.c.l.bf16 %v418_v4  ;;  %v3016_v9 = vld [vmem:[#allocation8] ss:$0 sm:$0xff]  ;;  %s3678_s24 = smov 120   ;;  %s3679_s14 = smov 112   ;;  %vm503_vm2 = vcmask 64512   ;;  %v1053_v52 = vand.u32 127, %v756_v51 }
  0xeb   : > { %3066 = vmatpush3.bf16.msra.mxu0 %v3269_v1  ;;  %s3680_s13 = smov 96   ;;  %v757_v53 = vshrl.u32 %v756_v51, 7  ;;  %s3682_s25 = smov 64  }
  0xec   : > { %3067 = vmatprep.subr.bf16.mxu0 %v5139_v0  ;;  %v420_v7 = vadd.f32 %v419_v6, %v417_v5  ;;  %s3683_s15 = smov 16   ;;  %s3684_s19 = smov 8  }
  0xed   : > { %v4103_v56 = vsub.s32 %v1053_v52, %v757_v53  ;;  %v4112_v62 = vsub.s32 0, %v757_v53  ;;  %v4114_v63 = vsub.s32 1, %v757_v53  ;;  %v4124_v6 = vsub.s32 3, %v757_v53  ;;  %s3685_s10 = smov 24   ;;  %s3015_s16 = sshll.u32 %s4017_s20, 3 }
  0xee   : > { %v421_v8 = vpack.c.bf16 %v420_v7, %v420_v7  ;;  %v4126_v7 = vsub.s32 2, %v757_v53  ;;  %s3037_s18 = sshll.u32 %s3753_s11, 7  ;;  %s414_s21 = scalar_lea.vmem [#allocation16], %s3015_s16 }
  0xef   : > { %3068 = vmatpush3.bf16.msra.mxu0 %v3270_v2  ;;  %5176 = vst [vmem:[#allocation27_spill] sm:$0xff] %v4103_v56  ;;  %s2857_s26 = sshll.u32 %s414_s21, 4  ;;  %s2844_s11 = scalar_lea.sflag [#allocation4], %s4017_s20  ;;  %s5084_s26 = int_to_ptr.vmem [resolvable:$true] %s2857_s26 }
  0xf0   : > { %3079 = vmatprep.subr.bf16.mxu0 %v5139_v0  ;;  %p5230_p1 = scmp.ne.s32.totalorder %s5160_s22, 0 }
  0xf2   : > { %3070 = vmatmul.mubr.msk.bf16.vlgmr.msra.gmra.mrb[0].mxu0 %vm445_vm1, %v421_v8 }
  0xf3   : > { %3081 = vmatprep.mubr.msk.bf16.mxu0 %vm3676_vm0, %v5139_v0 }
 0x1c5   : > { %v483_v10 = vpop.f32.mrb[0].mxu0 }
 0x1c6   : > { %v484_v11 = vadd.f32 %v3016_v9, %v483_v10  ;;  %v3071_v12 = vpop.f32.mrb[1].mxu0  ;;  %v4130_v10 = vsub.s32 4, %v757_v53 }
 0x1c7   : > { %v486_v13 = vpop.f32.mrb[2].mxu0 }
 0x1c8   : > { %496 = vrot.lane.b32.xlu1 %v484_v11, %s3677_s12  ;;  %490 = vrot.lane.b32.xlu0 %v484_v11, %s3678_s24  ;;  %v3072_v14 = vpop.f32.mrb[3].mxu0  ;;  %v4052_v15 = vpack.c.bf16 %v484_v11, %v484_v11  ;;  %v499_v25 = vmul.f32 %v484_v11, %v484_v11  ;;  %v4135_v13 = vsub.s32 5, %v757_v53 }
 0x1ca   : > { %5172 = vst [vmem:[#allocation23_spill] sm:$0xff] %v4052_v15  ;;  %v504_v28 = vsel %vm503_vm2, %v499_v25, 0.0 }
 0x1cc   : > { %493 = vrot.lane.b32.xlu0 %v484_v11, %s3679_s14  ;;  %549 = vrot.lane.b32.xlu1 %v4052_v15, %s3680_s13  ;;  %s5082_s14 = scalar_lea.hbm %s5135_s8, %s3037_s18 }
 0x23a   : > { %v497_v16 = vpop.permute.xlu1 %496  ;;  %v491_v17 = vpop.permute.xlu0 %490 }
 0x23b   : > { %v4055_v18 = vpack.c.bf16 %v491_v17, %v491_v17  ;;  %v4058_v21 = vpack.c.bf16 %v497_v16, %v497_v16  ;;  %v500_v24 = vmul.f32 %v491_v17, %v491_v17  ;;  %v502_v26 = vmul.f32 %v497_v16, %v497_v16 }
 0x23c   : > { %v4140_v17 = vsub.s32 6, %v757_v53 }
 0x23d   : > { %5173 = vst [vmem:[#allocation24_spill] sm:$0xff] %v4055_v18  ;;  %598 = vrot.lane.b32.xlu0 %v4055_v18, %s3680_s13  ;;  %5174 = vst [vmem:[#allocation25_spill] sm:$0xff] %v4058_v21  ;;  %v507_v27 = vsel %vm503_vm2, %v500_v24, 0.0  ;;  %v513_v30 = vsel %vm503_vm2, %v502_v26, 0.0 }
 0x23e   : > { %v494_v19 = vpop.permute.xlu0 %493  ;;  %v550_v20 = vpop.permute.xlu1 %549 }
 0x23f   : > { %v4060_v22 = vpack.c.bf16 %v494_v19, %v494_v19  ;;  %v555_v23 = vsel %vm503_vm2, %v550_v20, 0  ;;  %v501_v29 = vmul.f32 %v494_v19, %v494_v19 }
 0x240   : > { %3074 = vmatpush3.bf16.xpose.msra.mxu1 %v555_v23 }
 0x241   : > { %5175 = vst [vmem:[#allocation26_spill] sm:$0xff] %v4060_v22  ;;  %696 = vrot.lane.b32.xlu0 %v4058_v21, %s3680_s13  ;;  %647 = vrot.lane.b32.xlu1 %v4060_v22, %s3680_s13  ;;  %v510_v42 = vsel %vm503_vm2, %v501_v29, 0.0 }
 0x242   : > { %3085 = vmatprep.subr.bf16.mxu1 %v5139_v0 }
 0x245   : > { %522 = vrot.lane.b32.xlu0 %v500_v24, %s3680_s13  ;;  %520 = vrot.lane.b32.xlu1 %v499_v25, %s3680_s13  ;;  %v4147_v24 = vsub.s32 7, %v757_v53 }
 0x247   : > { %3076 = vmatmul.mubr.msk.bf16.vlgmr.msra.gmra.mrb[0].mxu1 %vm503_vm2, %v4052_v15 }
 0x248   : > { %3087 = vmatprep.mubr.msk.bf16.mxu1 %vm3676_vm0, %v5139_v0 }
 0x249   : > { %526 = vrot.lane.b32.xlu0 %v502_v26, %s3680_s13 }
 0x268   : > { %508 = vadd.xlane.f32.xlu0 %v507_v27 }
 0x269   : > { %505 = vadd.xlane.f32.xlu1 %v504_v28 }
 0x27a   : > { %524 = vrot.lane.b32.xlu1 %v501_v29, %s3680_s13  ;;  %s3581_s13 = scalar_lea.vmem %s5084_s26, 128 }
 0x27b   : > { %p3582_p12 = scmp.ne.s32.totalorder %s5084_s26, %s3581_s13 }
 0x27d   : > { %p3583_p13 = pnand %p3582_p12, %p5230_p1 }
 0x27f   : > { %p3584_p0 = pneg %p3583_p13 }
 0x29e   : > { %514 = vadd.xlane.f32.xlu1 %v513_v30 }
 0x2af   : > { %v599_v31 = vpop.permute.xlu0 %598 }
 0x2b0   : > { %v604_v32 = vsel %vm503_vm2, %v599_v31, 0 }
 0x2b1   : > { %3080 = vmatpush3.bf16.xpose.msra.mxu0 %v604_v32 }
 0x2b2   : > { %3091 = vmatprep.subr.bf16.mxu0 %v5139_v0 }
 0x2b3   : > { %v697_v33 = vpop.permute.xlu0 %696  ;;  %v648_v34 = vpop.permute.xlu1 %647 }
 0x2b4   : > { %v653_v35 = vsel %vm503_vm2, %v648_v34, 0  ;;  %v702_v38 = vsel %vm503_vm2, %v697_v33, 0 }
 0x2b5   : > { %3086 = vmatpush3.bf16.xpose.msra.mxu1 %v653_v35 }
 0x2b6   : > { %3097 = vmatprep.subr.bf16.mxu1 %v5139_v0 }
 0x2b7   : > { %v523_v36 = vpop.permute.xlu0 %522  ;;  %v521_v37 = vpop.permute.xlu1 %520 }
 0x2b8   : > { %3082 = vmatmul.mubr.msk.bf16.vlgmr.msra.gmra.mrb[4].mxu0 %vm503_vm2, %v4055_v18  ;;  %v532_v39 = vsel %vm503_vm2, %v521_v37, 0.0  ;;  %v535_v40 = vsel %vm503_vm2, %v523_v36, 0.0  ;;  %v3681_v36 = vmov 0  }
 0x2b9   : > { %3092 = vmatpush3.bf16.xpose.msra.mxu0 %v702_v38  ;;  %533 = vadd.xlane.f32.xlu0 %v532_v39 }
 0x2ba   : > { %536 = vadd.xlane.f32.xlu1 %v535_v40  ;;  %3093 = vmatprep.mubr.msk.bf16.mxu0 %vm3676_vm0, %v5139_v0 }
 0x2bb   : > { %v527_v41 = vpop.permute.xlu0 %526  ;;  %3103 = vmatprep.subr.bf16.mxu0 %v5139_v0  ;;  %3267 = vset.pattern.permute.xlu1 %v3681_v36 }
 0x2bc   : > { %3088 = vmatmul.mubr.msk.bf16.vlgmr.msra.gmra.mrb[4].mxu1 %vm503_vm2, %v4060_v22  ;;  %v541_v43 = vsel %vm503_vm2, %v527_v41, 0.0  ;;  %3268 = vset.pattern.permute.xlu0 %v3681_v36 }
 0x2bd   : > { %511 = vadd.xlane.f32.xlu0 %v510_v42  ;;  %3099 = vmatprep.mubr.msk.bf16.mxu1 %vm3676_vm0, %v5139_v0 }
 0x2be   : > { %542 = vadd.xlane.f32.xlu1 %v541_v43 }
 0x2c0   : > { %3094 = vmatmul.mubr.msk.bf16.vlgmr.msra.gmra.mrb[8].mxu0 %vm503_vm2, %v4058_v21 }
 0x2c1   : > { %3105 = vmatprep.mubr.msk.bf16.mxu0 %vm3676_vm0, %v5139_v0 }
 0x2f5   : > { %v4098_v54 = vpop.xlane.xlu0 %508 }
 0x2f6   : > { %v4095_v44 = vpop.xlane.xlu1 %505  ;;  %v4155_v28 = vsub.f32 1.0, %v4098_v54 }
 0x2f7   : > { %v4101_v55 = vsub.f32 1.0, %v4095_v44 }
 0x2f8   : > { %v1610_v32 = vmul.f32 %v4155_v28, %v4155_v28 }
 0x2f9   : > { %v1609_v59 = vmul.f32 %v4101_v55, %v4101_v55 }
 0x2fa   : > { %v525_v45 = vpop.permute.xlu1 %524 }
 0x2fb   : > { %v538_v46 = vsel %vm503_vm2, %v525_v45, 0.0 }
 0x2fc   : > { %539 = vadd.xlane.f32.xlu0 %v538_v46 }
 0x31a   : > { %v591_v47 = vpop.f32.mrb[0].mxu1 }
 0x31b   : > { %v3077_v48 = vpop.f32.mrb[1].mxu1  ;;  %v4116_v1 = vadd.f32 %v591_v47, %v591_v47 }
 0x31c   : > { %v594_v49 = vpop.f32.mrb[2].mxu1 }
 0x31d   : > { %v3078_v50 = vpop.f32.mrb[3].mxu1  ;;  %5177 = vst [vmem:[#allocation28_spill] sm:$0xff] %v4116_v1  ;;  %v759_v12 = vrot.slane %v4116_v1, %v4112_v62  ;;  %v780_v16 = vrot.slane %v4116_v1, %v4124_v6  ;;  %v787_v20 = vrot.slane %v4116_v1, %v4130_v10  ;;  %v794_v26 = vrot.slane %v4116_v1, %v4135_v13 }
 0x31e   : > { %v766_v30 = vrot.slane %v4116_v1, %v4114_v63  ;;  %v801_v31 = vrot.slane %v4116_v1, %v4140_v17  ;;  %v773_v34 = vrot.slane %v4116_v1, %v4126_v7  ;;  %v808_v35 = vrot.slane %v4116_v1, %v4147_v24 }
 0x32b   : > { %v4145_v23 = vpop.xlane.xlu1 %514 }
 0x32c   : > { %v4185_v49 = vsub.f32 1.0, %v4145_v23 }
 0x346   : > { %v4105_v57 = vpop.xlane.xlu0 %533 }
 0x347   : > { %v1057_v58 = vrot.slane %v4105_v57, %v4103_v56  ;;  %v4152_v27 = vpop.xlane.xlu1 %536 }
 0x348   : > { %v1061_v29 = vrot.slane %v4152_v27, %v4103_v56 }
 0x349   : > { %v1105_v60 = vmul.f32 %v1057_v58, %v4095_v44  ;;  %v1613_v61 = vmul.f32 %v1609_v59, %v1057_v58  ;;  %v1612_v59 = vmul.f32 %v4185_v49, %v4185_v49 }
 0x34a   : > { %v1614_v33 = vmul.f32 %v1610_v32, %v1061_v29  ;;  %v4176_v45 = vpop.xlane.xlu0 %511 }
 0x34b   : > { %v4118_v2 = vadd.f32 1.0, %v1105_v60  ;;  %v1624_v3 = vrot.slane %v1613_v61, %v4112_v62  ;;  %v1631_v4 = vrot.slane %v1613_v61, %v4114_v63  ;;  %v1645_v8 = vrot.slane %v1613_v61, %v4124_v6  ;;  %v4182_v48 = vpop.xlane.xlu1 %542 }
 0x34c   : > { %v1638_v9 = vrot.slane %v1613_v61, %v4126_v7  ;;  %v1652_v11 = vrot.slane %v1613_v61, %v4130_v10  ;;  %v1659_v14 = vrot.slane %v1613_v61, %v4135_v13  ;;  %v1666_v19 = vrot.slane %v1613_v61, %v4140_v17 }
 0x34d   : > { %5178 = vst [vmem:[#allocation29_spill] sm:$0xff] %v4118_v2  ;;  %1626 = vbcast.lane.b32.xlu1 %v1624_v3, 256  ;;  %1633 = vbcast.lane.b32.xlu0 %v1631_v4, 256  ;;  %v1673_v25 = vrot.slane %v1613_v61, %v4147_v24  ;;  %v1687_v37 = vrot.slane %v1614_v33, %v4114_v63  ;;  %v4180_v47 = vsub.f32 1.0, %v4176_v45 }
 0x34e   : > { %v1680_v38 = vrot.slane %v1614_v33, %v4112_v62  ;;  %v1694_v39 = vrot.slane %v1614_v33, %v4126_v7  ;;  %v1701_v40 = vrot.slane %v1614_v33, %v4124_v6  ;;  %v1708_v41 = vrot.slane %v1614_v33, %v4130_v10 }
 0x34f   : > { %v1715_v42 = vrot.slane %v1614_v33, %v4135_v13  ;;  %v1722_v43 = vrot.slane %v1614_v33, %v4140_v17  ;;  %v1729_v46 = vrot.slane %v1614_v33, %v4147_v24  ;;  %v1069_v51 = vrot.slane %v4182_v48, %v4103_v56 }
 0x350   : > { %v1611_v52 = vmul.f32 %v4180_v47, %v4180_v47 }
 0x351   : > { %1647 = vbcast.lane.b32.xlu1 %v1645_v8, 256  ;;  %1640 = vbcast.lane.b32.xlu0 %v1638_v9, 256  ;;  %v4199_v4 = vmul.f32 %v1612_v59, %v1069_v51 }
 0x355   : > { %1654 = vbcast.lane.b32.xlu1 %v1652_v11, 256  ;;  %761 = vbcast.lane.b32.xlu0 %v759_v12, 256  ;;  %v1106_v12 = vmul.f32 %v1061_v29, %v4098_v54  ;;  %v1792_v29 = vrot.slane %v4199_v4, %v4112_v62 }
 0x357   : > { %v4216_v33 = vadd.f32 1.0, %v1106_v12 }
 0x359   : > { %1661 = vbcast.lane.b32.xlu1 %v1659_v14, 256  ;;  %782 = vbcast.lane.b32.xlu0 %v780_v16, 256  ;;  %5181 = vst [vmem:[#allocation32_spill] sm:$0xff] %v4216_v33 }
 0x35d   : > { %1668 = vbcast.lane.b32.xlu1 %v1666_v19, 256  ;;  %789 = vbcast.lane.b32.xlu0 %v787_v20, 256 }
 0x361   : > { %1675 = vbcast.lane.b32.xlu1 %v1673_v25, 256  ;;  %796 = vbcast.lane.b32.xlu0 %v794_v26, 256 }
 0x365   : > { %768 = vbcast.lane.b32.xlu1 %v766_v30, 256  ;;  %803 = vbcast.lane.b32.xlu0 %v801_v31, 256  ;;  %v1108_v30 = vmul.f32 %v1069_v51, %v4145_v23 }
 0x369   : > { %775 = vbcast.lane.b32.xlu1 %v773_v34, 256  ;;  %810 = vbcast.lane.b32.xlu0 %v808_v35, 256 }
 0x36d   : > { %1689 = vbcast.lane.b32.xlu0 %v1687_v37, 256  ;;  %1682 = vbcast.lane.b32.xlu1 %v1680_v38, 256 }
 0x371   : > { %1696 = vbcast.lane.b32.xlu0 %v1694_v39, 256 }
 0x375   : > { %1703 = vbcast.lane.b32.xlu0 %v1701_v40, 256 }
 0x379   : > { %1710 = vbcast.lane.b32.xlu0 %v1708_v41, 256  ;;  %v4226_v41 = vadd.f32 1.0, %v1108_v30 }
 0x37b   : > { %5184 = vst [vmem:[#allocation35_spill] sm:$0xff] %v4226_v41 }
 0x37d   : > { %1717 = vbcast.lane.b32.xlu0 %v1715_v42, 256 }
 0x381   : > { %1724 = vbcast.lane.b32.xlu0 %v1722_v43, 256  ;;  %v1799_v43 = vrot.slane %v4199_v4, %v4114_v63 }
 0x385   : > { %1731 = vbcast.lane.b32.xlu0 %v1729_v46, 256 }
 0x389   : > { %v4187_v50 = vpop.xlane.xlu0 %539 }
 0x38a   : > { %v1065_v53 = vrot.slane %v4187_v50, %v4103_v56 }
 0x38b   : > { %v640_v58 = vpop.f32.mrb[4].mxu0 }
 0x38c   : > { %v4197_v60 = vmul.f32 %v1611_v52, %v1065_v53  ;;  %v3083_v61 = vpop.f32.mrb[5].mxu0  ;;  %v1107_v14 = vmul.f32 %v1065_v53, %v4176_v45  ;;  %v4207_v20 = vadd.f32 %v640_v58, %v640_v58  ;;  %v1806_v52 = vrot.slane %v4199_v4, %v4126_v7 }
 0x38d   : > { %v643_v3 = vpop.f32.mrb[6].mxu0  ;;  %v1813_v58 = vrot.slane %v4199_v4, %v4124_v6 }
 0x38e   : > { %v3084_v8 = vpop.f32.mrb[7].mxu0  ;;  %v1743_v9 = vrot.slane %v4197_v60, %v4114_v63  ;;  %v1736_v11 = vrot.slane %v4197_v60, %v4112_v62  ;;  %5179 = vst [vmem:[#allocation30_spill] sm:$0xff] %v4207_v20  ;;  %v1750_v32 = vrot.slane %v4197_v60, %v4126_v7  ;;  %v4218_v34 = vadd.f32 1.0, %v1107_v14 }
 0x38f   : > { %v689_v16 = vpop.f32.mrb[4].mxu1  ;;  %v1757_v46 = vrot.slane %v4197_v60, %v4124_v6  ;;  %v1764_v53 = vrot.slane %v4197_v60, %v4130_v10  ;;  %v1771_v59 = vrot.slane %v4197_v60, %v4135_v13  ;;  %v822_v61 = vrot.slane %v4207_v20, %v4114_v63 }
 0x390   : > { %v3089_v19 = vpop.f32.mrb[5].mxu1  ;;  %1745 = vbcast.lane.b32.xlu0 %v1743_v9, 256  ;;  %1738 = vbcast.lane.b32.xlu1 %v1736_v11, 256  ;;  %v4209_v25 = vadd.f32 %v689_v16, %v689_v16  ;;  %5182 = vst [vmem:[#allocation33_spill] sm:$0xff] %v4218_v34  ;;  %v815_v3 = vrot.slane %v4207_v20, %v4112_v62 }
 0x391   : > { %v692_v26 = vpop.f32.mrb[6].mxu1  ;;  %v829_v8 = vrot.slane %v4207_v20, %v4126_v7  ;;  %v864_v9 = vrot.slane %v4207_v20, %v4147_v24  ;;  %v836_v11 = vrot.slane %v4207_v20, %v4124_v6  ;;  %v843_v14 = vrot.slane %v4207_v20, %v4130_v10 }
 0x392   : > { %5180 = vst [vmem:[#allocation31_spill] sm:$0xff] %v4209_v25  ;;  %v3090_v31 = vpop.f32.mrb[7].mxu1  ;;  %v878_v12 = vrot.slane %v4209_v25, %v4114_v63  ;;  %v850_v19 = vrot.slane %v4207_v20, %v4135_v13  ;;  %v857_v30 = vrot.slane %v4207_v20, %v4140_v17 }
 0x393   : > { %v738_v35 = vpop.f32.mrb[8].mxu0 }
 0x394   : > { %v4220_v36 = vadd.f32 %v738_v35, %v738_v35  ;;  %1752 = vbcast.lane.b32.xlu1 %v1750_v32, 256  ;;  %1794 = vbcast.lane.b32.xlu0 %v1792_v29, 256  ;;  %v3095_v37 = vpop.f32.mrb[9].mxu0  ;;  %v871_v32 = vrot.slane %v4209_v25, %v4112_v62  ;;  %v885_v35 = vrot.slane %v4209_v25, %v4126_v7 }
 0x395   : > { %v741_v38 = vpop.f32.mrb[10].mxu0 }
 0x396   : > { %5183 = vst [vmem:[#allocation34_spill] sm:$0xff] %v4220_v36  ;;  %v3096_v42 = vpop.f32.mrb[11].mxu0  ;;  %v927_v16 = vrot.slane %v4220_v36, %v4112_v62  ;;  %v941_v26 = vrot.slane %v4220_v36, %v4126_v7  ;;  %v948_v31 = vrot.slane %v4220_v36, %v4124_v6  ;;  %v955_v29 = vrot.slane %v4220_v36, %v4130_v10 }
 0x397   : > { %v962_v37 = vrot.slane %v4220_v36, %v4135_v13  ;;  %v976_v18 = vrot.slane %v4220_v36, %v4147_v24 }
 0x398   : > { %1801 = vbcast.lane.b32.xlu1 %v1799_v43, 256  ;;  %1759 = vbcast.lane.b32.xlu0 %v1757_v46, 256  ;;  %v892_v43 = vrot.slane %v4209_v25, %v4124_v6  ;;  %v969_v46 = vrot.slane %v4220_v36, %v4140_v17 }
 0x39c   : > { %1808 = vbcast.lane.b32.xlu1 %v1806_v52, 256  ;;  %1766 = vbcast.lane.b32.xlu0 %v1764_v53, 256 }
 0x3a0   : > { %1815 = vbcast.lane.b32.xlu1 %v1813_v58, 256  ;;  %1773 = vbcast.lane.b32.xlu0 %v1771_v59, 256  ;;  %v4285_v58 = vadd.f32 1.0, %v4105_v57  ;;  %v899_v59 = vrot.slane %v4209_v25, %v4130_v10  ;;  %v1160_v57 = vrot.slane %v4095_v44, %v4112_v62 }
 0x3a4   : > { %824 = vbcast.lane.b32.xlu1 %v822_v61, 256  ;;  %817 = vbcast.lane.b32.xlu0 %v815_v3, 256  ;;  %v1778_v61 = vrot.slane %v4197_v60, %v4140_v17 }
 0x3a8   : > { %831 = vbcast.lane.b32.xlu1 %v829_v8, 256  ;;  %866 = vbcast.lane.b32.xlu0 %v864_v9, 256  ;;  %v1356_v9 = vrot.slane %v4101_v55, %v4112_v62 }
 0x3ac   : > { %838 = vbcast.lane.b32.xlu1 %v836_v11, 256  ;;  %880 = vbcast.lane.b32.xlu0 %v878_v12, 256 }
 0x3b0   : > { %845 = vbcast.lane.b32.xlu1 %v843_v14, 256  ;;  %929 = vbcast.lane.b32.xlu0 %v927_v16, 256  ;;  %v906_v16 = vrot.slane %v4209_v25, %v4135_v13 }
 0x3b4   : > { %852 = vbcast.lane.b32.xlu1 %v850_v19, 256  ;;  %943 = vbcast.lane.b32.xlu0 %v941_v26, 256  ;;  %v1785_v19 = vrot.slane %v4197_v60, %v4147_v24  ;;  %v1841_v60 = vrot.slane %v4199_v4, %v4147_v24 }
 0x3b8   : > { %859 = vbcast.lane.b32.xlu1 %v857_v30, 256  ;;  %950 = vbcast.lane.b32.xlu0 %v948_v31, 256 }
 0x3bc   : > { %873 = vbcast.lane.b32.xlu1 %v871_v32, 256  ;;  %957 = vbcast.lane.b32.xlu0 %v955_v29, 256 }
 0x3bf   : > { %v4274_v38 = vpop.permute.xlu0 %1633  ;;  %v1627_v42 = vpop.permute.xlu1 %1626 }
 0x3c0   : > { %887 = vbcast.lane.b32.xlu1 %v885_v35, 256  ;;  %964 = vbcast.lane.b32.xlu0 %v962_v37, 256  ;;  %v1368_v37 = vrot.slane %v4101_v55, %v4124_v6 }
 0x3c3   : > { %v4280_v52 = vpop.permute.xlu0 %1640  ;;  %v4282_v53 = vpop.permute.xlu1 %1647 }
 0x3c4   : > { %894 = vbcast.lane.b32.xlu1 %v892_v43, 256  ;;  %971 = vbcast.lane.b32.xlu0 %v969_v46, 256  ;;  %v913_v43 = vrot.slane %v4209_v25, %v4140_v17 }
 0x3c7   : > { %v762_v3 = vpop.permute.xlu0 %761  ;;  %v4291_v8 = vpop.permute.xlu1 %1654 }
 0x3c8   : > { %v1012_v11 = vsub.f32 %v4285_v58, %v762_v3  ;;  %901 = vbcast.lane.b32.xlu1 %v899_v59, 256  ;;  %1780 = vbcast.lane.b32.xlu0 %v1778_v61, 256 }
 0x3ca   : > { %v1121_v12 = vmul.f32 %v1012_v11, %v1012_v11  ;;  %v1513_v14 = vmul.f32 %v1356_v9, %v1012_v11 }
 0x3cb   : > { %v783_v26 = vpop.permute.xlu0 %782  ;;  %v4302_v30 = vpop.permute.xlu1 %1661 }
 0x3cc   : > { %v1317_v31 = vmul.f32 %v1160_v57, %v1121_v12  ;;  %v1545_v32 = vmul.f32 %v1513_v14, %v762_v3  ;;  %v1015_v29 = vsub.f32 %v4285_v58, %v783_v26  ;;  %908 = vbcast.lane.b32.xlu1 %v906_v16, 256  ;;  %1787 = vbcast.lane.b32.xlu0 %v1785_v19, 256 }
 0x3cd   : > { %v1172_v57 = vrot.slane %v4095_v44, %v4124_v6  ;;  %v920_v12 = vrot.slane %v4209_v25, %v4147_v24  ;;  %v1372_v16 = vrot.slane %v4101_v55, %v4130_v10 }
 0x3ce   : > { %v1577_v35 = vsub.f32 %v1317_v31, %v1545_v32  ;;  %v1124_v9 = vmul.f32 %v1015_v29, %v1015_v29  ;;  %v1516_v3 = vmul.f32 %v1368_v37, %v1015_v29 }
 0x3cf   : > { %v790_v46 = vpop.permute.xlu0 %789  ;;  %v4309_v59 = vpop.permute.xlu1 %1668 }
 0x3d0   : > { %v1877_v61 = vadd.f32 %v1627_v42, %v1577_v35  ;;  %915 = vbcast.lane.b32.xlu1 %v913_v43, 256  ;;  %v1016_v11 = vsub.f32 %v4285_v58, %v790_v46  ;;  %1843 = vbcast.lane.b32.xlu0 %v1841_v60, 256  ;;  %v1320_v42 = vmul.f32 %v1172_v57, %v1124_v9 }
 0x3d1   : > { %v1548_v32 = vmul.f32 %v1516_v3, %v783_v26  ;;  %v934_v43 = vrot.slane %v4220_v36, %v4114_v63  ;;  %v1176_v60 = vrot.slane %v4095_v44, %v4130_v10  ;;  %v1180_v9 = vrot.slane %v4095_v44, %v4135_v13 }
 0x3d2   : > { %v4318_v14 = vmax.f32 %v1877_v61, 0.0  ;;  %v1125_v29 = vmul.f32 %v1016_v11, %v1016_v11  ;;  %v1517_v35 = vmul.f32 %v1372_v16, %v1016_v11  ;;  %v1376_v26 = vrot.slane %v4101_v55, %v4135_v13 }
 0x3d3   : > { %v797_v19 = vpop.permute.xlu0 %796  ;;  %v4322_v31 = vpop.permute.xlu1 %1675  ;;  %v1580_v0 = vsub.f32 %v1320_v42, %v1548_v32  ;;  %v1360_v57 = vrot.slane %v4101_v55, %v4114_v63  ;;  %v1820_v42 = vrot.slane %v4199_v4, %v4130_v10  ;;  %v1380_v32 = vrot.slane %v4101_v55, %v4140_v17 }
 0x3d4   : > { %922 = vbcast.lane.b32.xlu1 %v920_v12, 256  ;;  %v1017_v37 = vsub.f32 %v4285_v58, %v797_v19  ;;  %3275 = vrsqrt.f32 %v4318_v14  ;;  %v1321_v3 = vmul.f32 %v1176_v60, %v1125_v29  ;;  %v1549_v11 = vmul.f32 %v1517_v35, %v790_v46 }
 0x3d5   : > { %v1880_v5 = vadd.f32 %v4282_v53, %v1580_v0  ;;  %vm1943_vm3 = vcmp.eq.f32.partialorder %v4318_v14, inf  ;;  %vm1945_vm4 = vcmp.eq.f32.partialorder %v4318_v14, 0.0 }
 0x3d6   : > { %v1126_v16 = vmul.f32 %v1017_v37, %v1017_v37  ;;  %v1518_v40 = vmul.f32 %v1376_v26, %v1017_v37  ;;  %v1168_v37 = vrot.slane %v4095_v44, %v4126_v7  ;;  %v1364_v26 = vrot.slane %v4101_v55, %v4126_v7 }
 0x3d7   : > { %v804_v61 = vpop.permute.xlu0 %803  ;;  %v769_v51 = vpop.permute.xlu1 %768  ;;  %v1581_v41 = vsub.f32 %v1321_v3, %v1549_v11  ;;  %v1384_v3 = vrot.slane %v4101_v55, %v4147_v24 }
 0x3d8   : > { %936 = vbcast.lane.b32.xlu1 %v934_v43, 256  ;;  %v1013_v12 = vsub.f32 %v4285_v58, %v769_v51  ;;  %v1018_v39 = vsub.f32 %v4285_v58, %v804_v61  ;;  %v1164_v43 = vrot.slane %v4095_v44, %v4114_v63 }
 0x3da   : > { %v1122_v29 = vmul.f32 %v1013_v12, %v1013_v12  ;;  %v1514_v46 = vmul.f32 %v1360_v57, %v1013_v12  ;;  %v1322_v57 = vmul.f32 %v1180_v9, %v1126_v16  ;;  %v1550_v12 = vmul.f32 %v1518_v40, %v797_v19 }
 0x3db   : > { %v811_v35 = vpop.permute.xlu0 %810  ;;  %v776_v60 = vpop.permute.xlu1 %775  ;;  %v1127_v34 = vmul.f32 %v1018_v39, %v1018_v39  ;;  %v1519_v20 = vmul.f32 %v1380_v32, %v1018_v39  ;;  %v4361_v19 = vmax.f32 %v1880_v5, 0.0  ;;  %v1188_v5 = vrot.slane %v4095_v44, %v4147_v24 }
 0x3dc   : > { %1822 = vbcast.lane.b32.xlu1 %v1820_v42, 256  ;;  %v1318_v21 = vmul.f32 %v1164_v43, %v1122_v29  ;;  %v1546_v22 = vmul.f32 %v1514_v46, %v769_v51  ;;  %v1014_v25 = vsub.f32 %v4285_v58, %v776_v60  ;;  %v1019_v53 = vsub.f32 %v4285_v58, %v811_v35 }
 0x3dd   : > { %v1184_v42 = vrot.slane %v4095_v44, %v4140_v17  ;;  %v1827_v51 = vrot.slane %v4199_v4, %v4135_v13  ;;  %v1582_v58 = vsub.f32 %v1322_v57, %v1550_v12  ;;  %v1551_v11 = vmul.f32 %v1519_v20, %v804_v61 }
 0x3de   : > { %v1578_v0 = vsub.f32 %v1318_v21, %v1546_v22  ;;  %v1123_v33 = vmul.f32 %v1014_v25, %v1014_v25  ;;  %v1515_v1 = vmul.f32 %v1364_v26, %v1014_v25  ;;  %v3276_v40 = vpop.eup %3275  ;;  %v1881_v25 = vadd.f32 %v4291_v8, %v1581_v41 }
 0x3df   : > { %v4353_v2 = vpop.permute.xlu0 %1689  ;;  %v1323_v9 = vmul.f32 %v1184_v42, %v1127_v34  ;;  %v1128_v32 = vmul.f32 %v1019_v53, %v1019_v53  ;;  %v1520_v43 = vmul.f32 %v1384_v3, %v1019_v53  ;;  %v1942_v29 = vmul.f32 %v3276_v40, %v4318_v14 }
 0x3e0   : > { %978 = vbcast.lane.b32.xlu1 %v976_v18, 256  ;;  %v1878_v21 = vadd.f32 %v4274_v38, %v1578_v0  ;;  %v1319_v22 = vmul.f32 %v1168_v37, %v1123_v33  ;;  %v1547_v39 = vmul.f32 %v1515_v1, %v776_v60  ;;  %v1834_v1 = vrot.slane %v4199_v4, %v4140_v17 }
 0x3e1   : > { %v4373_v34 = vmax.f32 %v1881_v25, 0.0  ;;  %v1882_v20 = vadd.f32 %v4302_v30, %v1582_v58  ;;  %v1583_v41 = vsub.f32 %v1323_v9, %v1551_v11  ;;  %v1324_v38 = vmul.f32 %v1188_v5, %v1128_v32 }
 0x3e2   : > { %v1910_v16 = vmax.f32 %v1878_v21, 0.0  ;;  %v1579_v55 = vsub.f32 %v1319_v22, %v1547_v39  ;;  %v1552_v8 = vmul.f32 %v1520_v43, %v811_v35  ;;  %v1944_v44 = vsel %vm1943_vm3, %v4318_v14, %v1942_v29 }
 0x3e3   : > { %v4365_v18 = vpop.permute.xlu0 %1696  ;;  %v1946_v4 = vand.u32 2147483648, %v4318_v14  ;;  %v1883_v30 = vadd.f32 %v4309_v59, %v1583_v41  ;;  %vm1964_vm9 = vcmp.eq.f32.partialorder %v4361_v19, inf  ;;  %v1967_v43 = vand.u32 2147483648, %v4361_v19 }
 0x3e4   : > { %1829 = vbcast.lane.b32.xlu1 %v1827_v51, 256  ;;  %v1879_v33 = vadd.f32 %v4280_v52, %v1579_v55  ;;  %3277 = vrsqrt.f32 %v1910_v16  ;;  %v1914_v52 = vmax.f32 %v1882_v20, 0.0  ;;  %v1584_v60 = vsub.f32 %v1324_v38, %v1552_v8  ;;  %v4404_v20 = vpop.permute.xlu1 %1682 }
 0x3e5   : > { %3279 = vrsqrt.f32 %v4361_v19  ;;  %v1947_v37 = vsel %vm1945_vm4, %v1946_v4, %v1944_v44  ;;  %v4387_v57 = vmax.f32 %v1883_v30, 0.0  ;;  %vm1950_vm5 = vcmp.eq.f32.partialorder %v1910_v16, inf }
 0x3e6   : > { %v1911_v61 = vmax.f32 %v1879_v33, 0.0  ;;  %v1884_v12 = vadd.f32 %v4322_v31, %v1584_v60  ;;  %v1953_v14 = vand.u32 2147483648, %v1910_v16  ;;  %vm1952_vm6 = vcmp.eq.f32.partialorder %v1910_v16, 0.0 }
 0x3e7   : > { %v4378_v46 = vpop.permute.xlu0 %1703  ;;  %vm1966_vm10 = vcmp.eq.f32.partialorder %v4361_v19, 0.0  ;;  %vm1971_vm11 = vcmp.eq.f32.partialorder %v4373_v34, inf  ;;  %vm1973_vm12 = vcmp.eq.f32.partialorder %v4373_v34, 0.0  ;;  %vm1978_vm13 = vcmp.eq.f32.partialorder %v1914_v52, inf }
 0x3e8   : > { %1836 = vbcast.lane.b32.xlu1 %v1834_v1, 256  ;;  %3281 = vrsqrt.f32 %v1911_v61  ;;  %v1916_v51 = vmax.f32 %v1884_v12, 0.0  ;;  %vm1957_vm7 = vcmp.eq.f32.partialorder %v1911_v61, inf  ;;  %v1960_v31 = vand.u32 2147483648, %v1911_v61 }
 0x3e9   : > { %3283 = vrsqrt.f32 %v4373_v34  ;;  %vm1959_vm8 = vcmp.eq.f32.partialorder %v1911_v61, 0.0  ;;  %v1974_v1 = vand.u32 2147483648, %v4373_v34  ;;  %v1981_v44 = vand.u32 2147483648, %v1914_v52 }
 0x3ea   : > { %3285 = vrsqrt.f32 %v1914_v52  ;;  %vm1980_vm14 = vcmp.eq.f32.partialorder %v1914_v52, 0.0  ;;  %vm1985_vm15 = vcmp.eq.f32.partialorder %v4387_v57, inf  ;;  %vm1987_vm3 = vcmp.eq.f32.partialorder %v4387_v57, 0.0 }
 0x3eb   : > { %v4385_v26 = vpop.permute.xlu0 %1710  ;;  %3287 = vrsqrt.f32 %v4387_v57  ;;  %vm1992_vm4 = vcmp.eq.f32.partialorder %v1916_v51, inf }
 0x3ec   : > { %2198 = vperm.xlu1 %3267, %v1947_v37   ;;  %3289 = vrsqrt.f32 %v1916_v51 }
 0x3ee   : > { %v3278_v35 = vpop.eup %3277 }
 0x3ef   : > { %v3280_v0 = vpop.eup %3279  ;;  %v1949_v53 = vmul.f32 %v3278_v35, %v1910_v16  ;;  %v4390_v42 = vpop.permute.xlu0 %1717  ;;  %v1988_v35 = vand.u32 2147483648, %v4387_v57 }
 0x3f0   : > { %v1963_v39 = vmul.f32 %v3280_v0, %v4361_v19 }
 0x3f1   : > { %v1951_v3 = vsel %vm1950_vm5, %v1910_v16, %v1949_v53  ;;  %vm1994_vm5 = vcmp.eq.f32.partialorder %v1916_v51, 0.0 }
 0x3f2   : > { %v3282_v59 = vpop.eup %3281  ;;  %v1954_v40 = vsel %vm1952_vm6, %v1953_v14, %v1951_v3  ;;  %v1965_v11 = vsel %vm1964_vm9, %v4361_v19, %v1963_v39 }
 0x3f3   : > { %v3284_v21 = vpop.eup %3283  ;;  %2201 = vperm.xlu0 %3268, %v1954_v40   ;;  %v1956_v22 = vmul.f32 %v3282_v59, %v1911_v61  ;;  %v4395_v9 = vpop.permute.xlu0 %1724  ;;  %v1968_v55 = vsel %vm1966_vm10, %v1967_v43, %v1965_v11  ;;  %v1200_v11 = vrot.slane %v4098_v54, %v4126_v7  ;;  %v1416_v43 = vrot.slane %v4155_v28, %v4147_v24 }
 0x3f4   : > { %v1970_v16 = vmul.f32 %v3284_v21, %v4373_v34  ;;  %v3286_v32 = vpop.eup %3285 }
 0x3f5   : > { %v1958_v25 = vsel %vm1957_vm7, %v1911_v61, %v1956_v22  ;;  %v1977_v5 = vmul.f32 %v3286_v32, %v1914_v52  ;;  %v3288_v33 = vpop.eup %3287 }
 0x3f6   : > { %v1961_v58 = vsel %vm1959_vm8, %v1960_v31, %v1958_v25  ;;  %v1972_v29 = vsel %vm1971_vm11, %v4373_v34, %v1970_v16  ;;  %v1984_v8 = vmul.f32 %v3288_v33, %v4387_v57  ;;  %v3290_v61 = vpop.eup %3289  ;;  %v1392_v25 = vrot.slane %v4155_v28, %v4114_v63 }
 0x3f7   : > { %2204 = vperm.xlu1 %3267, %v1961_v58   ;;  %v4406_v41 = vpop.permute.xlu0 %1731  ;;  %v1975_v38 = vsel %vm1973_vm12, %v1974_v1, %v1972_v29  ;;  %v1979_v19 = vsel %vm1978_vm13, %v1914_v52, %v1977_v5  ;;  %v1991_v34 = vmul.f32 %v3290_v61, %v1916_v51  ;;  %v1995_v52 = vand.u32 2147483648, %v1916_v51 }
 0x3f8   : > { %v1982_v60 = vsel %vm1980_vm14, %v1981_v44, %v1979_v19  ;;  %v1986_v37 = vsel %vm1985_vm15, %v4387_v57, %v1984_v8  ;;  %v1196_v57 = vrot.slane %v4098_v54, %v4114_v63  ;;  %v1192_v58 = vrot.slane %v4098_v54, %v4112_v62 }
 0x3f9   : > { %v1989_v53 = vsel %vm1987_vm3, %v1988_v35, %v1986_v37  ;;  %v1993_v14 = vsel %vm1992_vm4, %v1916_v51, %v1991_v34  ;;  %v1388_v51 = vrot.slane %v4155_v28, %v4112_v62  ;;  %v1396_v16 = vrot.slane %v4155_v28, %v4126_v7 }
 0x3fa   : > { %v1996_v40 = vsel %vm1994_vm5, %v1995_v52, %v1993_v14  ;;  %v4453_v29 = vadd.f32 1.0, %v4152_v27  ;;  %v1400_v5 = vrot.slane %v4155_v28, %v4124_v6  ;;  %v1452_v35 = vrot.slane %v4185_v49, %v4112_v62 }
 0x3fb   : > { %2207 = vperm.xlu1 %3267, %v1968_v55   ;;  %v4516_v14 = vadd.f32 1.0, %v4182_v48  ;;  %v5185_v48 = vrot.slane %v4098_v54, %v4124_v6 }
 0x3ff   : > { %2210 = vperm.xlu1 %3267, %v1975_v38  }
 0x402   : > { %v4410_v4 = vpop.permute.xlu0 %1745  ;;  %v4412_v30 = vpop.permute.xlu1 %1738 }
 0x403   : > { %2213 = vperm.xlu1 %3267, %v1982_v60  }
 0x406   : > { %v4417_v12 = vpop.permute.xlu0 %1794  ;;  %v4419_v0 = vpop.permute.xlu1 %1752 }
 0x407   : > { %2216 = vperm.xlu1 %3267, %v1989_v53  }
 0x40a   : > { %v4422_v3 = vpop.permute.xlu0 %1759  ;;  %v4424_v59 = vpop.permute.xlu1 %1801 }
 0x40b   : > { %2219 = vperm.xlu1 %3267, %v1996_v40  }
 0x40e   : > { %v4426_v21 = vpop.permute.xlu0 %1766  ;;  %v4428_v22 = vpop.permute.xlu1 %1808 }
 0x412   : > { %v4430_v39 = vpop.permute.xlu0 %1773  ;;  %v4432_v31 = vpop.permute.xlu1 %1815 }
 0x416   : > { %v825_v38 = vpop.permute.xlu1 %824  ;;  %v818_v19 = vpop.permute.xlu0 %817 }
 0x417   : > { %v1021_v60 = vsub.f32 %v4453_v29, %v825_v38  ;;  %v1020_v37 = vsub.f32 %v4453_v29, %v818_v19 }
 0x419   : > { %v1130_v27 = vmul.f32 %v1021_v60, %v1021_v60  ;;  %v1522_v44 = vmul.f32 %v1392_v25, %v1021_v60  ;;  %v1129_v8 = vmul.f32 %v1020_v37, %v1020_v37  ;;  %v1521_v61 = vmul.f32 %v1388_v51, %v1020_v37 }
 0x41a   : > { %v832_v34 = vpop.permute.xlu1 %831  ;;  %v867_v33 = vpop.permute.xlu0 %866 }
 0x41b   : > { %v1326_v1 = vmul.f32 %v1196_v57, %v1130_v27  ;;  %v1554_v40 = vmul.f32 %v1522_v44, %v825_v38  ;;  %v1325_v32 = vmul.f32 %v1192_v58, %v1129_v8  ;;  %v1553_v25 = vmul.f32 %v1521_v61, %v818_v19 }
 0x41c   : > { %v1022_v51 = vsub.f32 %v4453_v29, %v832_v34  ;;  %v1027_v60 = vsub.f32 %v4453_v29, %v867_v33 }
 0x41d   : > { %v1586_v55 = vsub.f32 %v1326_v1, %v1554_v40  ;;  %v1585_v36 = vsub.f32 %v1325_v32, %v1553_v25  ;;  %v4508_v1 = vadd.f32 1.0, %v4187_v50  ;;  %v1228_v50 = vrot.slane %v4176_v45, %v4114_v63 }
 0x41e   : > { %v1131_v58 = vmul.f32 %v1022_v51, %v1022_v51  ;;  %v1523_v38 = vmul.f32 %v1396_v16, %v1022_v51  ;;  %v839_v19 = vpop.permute.xlu1 %838  ;;  %v4501_v8 = vpop.permute.xlu0 %880  ;;  %v1136_v44 = vmul.f32 %v1027_v60, %v1027_v60  ;;  %v1528_v52 = vmul.f32 %v1416_v43, %v1027_v60 }
 0x41f   : > { %v4511_v32 = vadd.f32 %v4353_v2, %v1586_v55  ;;  %v1023_v40 = vsub.f32 %v4453_v29, %v839_v19  ;;  %v1885_v16 = vadd.f32 %v4404_v20, %v1585_v36  ;;  %v1424_v2 = vrot.slane %v4180_v47, %v4114_v63 }
 0x420   : > { %v1327_v25 = vmul.f32 %v1200_v11, %v1131_v58  ;;  %v1555_v51 = vmul.f32 %v1523_v38, %v832_v34  ;;  %v1029_v55 = vsub.f32 %v4508_v1, %v4501_v8  ;;  %v5186_v38 = vrot.slane %v4098_v54, %v4147_v24 }
 0x421   : > { %v1132_v61 = vmul.f32 %v1023_v40, %v1023_v40  ;;  %v1524_v57 = vmul.f32 %v1400_v5, %v1023_v40  ;;  %v4531_v60 = vmax.f32 %v1885_v16, 0.0  ;;  %v1420_v16 = vrot.slane %v4180_v47, %v4112_v62 }
 0x422   : > { %v1587_v27 = vsub.f32 %v1327_v25, %v1555_v51  ;;  %v846_v53 = vpop.permute.xlu1 %845  ;;  %v930_v36 = vpop.permute.xlu0 %929  ;;  %v1332_v40 = vmul.f32 %v5186_v38, %v1136_v44  ;;  %v1560_v25 = vmul.f32 %v1528_v52, %v867_v33  ;;  %v5188_v52 = vrot.slane %v4098_v54, %v4130_v10 }
 0x423   : > { %v1328_v11 = vmul.f32 %v5185_v48, %v1132_v61  ;;  %v1556_v43 = vmul.f32 %v1524_v57, %v839_v19  ;;  %v1024_v5 = vsub.f32 %v4453_v29, %v846_v53  ;;  %v1036_v34 = vsub.f32 %v4516_v14, %v930_v36 }
 0x424   : > { %v4534_v58 = vadd.f32 %v4365_v18, %v1587_v27  ;;  %v5187_v61 = vrot.slane %v4155_v28, %v4130_v10  ;;  %v1592_v18 = vsub.f32 %v1332_v40, %v1560_v25  ;;  %3291 = vrsqrt.f32 %v4531_v60 }
 0x425   : > { %v1588_v51 = vsub.f32 %v1328_v11, %v1556_v43  ;;  %v1133_v37 = vmul.f32 %v1024_v5, %v1024_v5  ;;  %v1145_v19 = vmul.f32 %v1036_v34, %v1036_v34  ;;  %v1537_v48 = vmul.f32 %v1452_v35, %v1036_v34 }
 0x426   : > { %v1525_v57 = vmul.f32 %v5187_v61, %v1024_v5  ;;  %v853_v20 = vpop.permute.xlu1 %852  ;;  %v944_v56 = vpop.permute.xlu0 %943  ;;  %v5189_v35 = vrot.slane %v4145_v23, %v4112_v62  ;;  %v1530_v27 = vmul.f32 %v1424_v2, %v1029_v55  ;;  %v5191_v40 = vrot.slane %v4185_v49, %v4126_v7 }
 0x427   : > { %v4549_v33 = vadd.f32 %v4378_v46, %v1588_v51  ;;  %v1329_v44 = vmul.f32 %v5188_v52, %v1133_v37  ;;  %v1569_v5 = vmul.f32 %v1537_v48, %v930_v36  ;;  %v1025_v34 = vsub.f32 %v4453_v29, %v853_v20 }
 0x428   : > { %v1557_v11 = vmul.f32 %v1525_v57, %v846_v53  ;;  %v1341_v43 = vmul.f32 %v5189_v35, %v1145_v19  ;;  %v1038_v38 = vsub.f32 %v4516_v14, %v944_v56  ;;  %v1138_v46 = vmul.f32 %v1029_v55, %v1029_v55 }
 0x429   : > { %v1134_v53 = vmul.f32 %v1025_v34, %v1025_v34  ;;  %v5190_v57 = vrot.slane %v4155_v28, %v4135_v13  ;;  %v5192_v55 = vrot.slane %v4098_v54, %v4135_v13  ;;  %vm1999_vm6 = vcmp.eq.f32.partialorder %v4531_v60, inf }
 0x42a   : > { %v1589_v51 = vsub.f32 %v1329_v44, %v1557_v11  ;;  %v1601_v37 = vsub.f32 %v1341_v43, %v1569_v5  ;;  %v860_v36 = vpop.permute.xlu1 %859  ;;  %v951_v48 = vpop.permute.xlu0 %950  ;;  %v1147_v35 = vmul.f32 %v1038_v38, %v1038_v38  ;;  %v1539_v25 = vmul.f32 %v5191_v40, %v1038_v38 }
 0x42b   : > { %v1526_v19 = vmul.f32 %v5190_v57, %v1025_v34  ;;  %v1026_v44 = vsub.f32 %v4453_v29, %v860_v36  ;;  %v1330_v11 = vmul.f32 %v5192_v55, %v1134_v53  ;;  %v1039_v5 = vsub.f32 %v4516_v14, %v951_v48 }
 0x42c   : > { %v4566_v52 = vadd.f32 %v4385_v26, %v1589_v51  ;;  %v4573_v2 = vadd.f32 %v4417_v12, %v1601_v37  ;;  %v1334_v34 = vmul.f32 %v1228_v50, %v1138_v46  ;;  %v5193_v26 = vrot.slane %v4145_v23, %v4126_v7 }
 0x42d   : > { %v1558_v43 = vmul.f32 %v1526_v19, %v853_v20  ;;  %v1571_v57 = vmul.f32 %v1539_v25, %v944_v56  ;;  %v1135_v61 = vmul.f32 %v1026_v44, %v1026_v44  ;;  %v1562_v38 = vmul.f32 %v1530_v27, %v4501_v8 }
 0x42e   : > { %v1343_v51 = vmul.f32 %v5193_v26, %v1147_v35  ;;  %v5194_v12 = vrot.slane %v4155_v28, %v4140_v17  ;;  %v1148_v40 = vmul.f32 %v1039_v5, %v1039_v5  ;;  %v874_v15 = vpop.permute.xlu1 %873  ;;  %v5195_v20 = vrot.slane %v4098_v54, %v4140_v17 }
 0x42f   : > { %v1590_v29 = vsub.f32 %v1330_v11, %v1558_v43  ;;  %v5196_v46 = vrot.slane %v4185_v49, %v4124_v6  ;;  %v1028_v56 = vsub.f32 %v4508_v1, %v874_v15  ;;  %v1892_v8 = vadd.f32 %v4406_v41, %v1592_v18  ;;  %v3292_v18 = vpop.eup %3291 }
 0x430   : > { %v1527_v37 = vmul.f32 %v5194_v12, %v1026_v44  ;;  %v1603_v53 = vsub.f32 %v1343_v51, %v1571_v57  ;;  %v1331_v50 = vmul.f32 %v5195_v20, %v1135_v61  ;;  %v5197_v28 = vrot.slane %v4145_v23, %v4124_v6 }
 0x431   : > { %v1540_v19 = vmul.f32 %v5196_v46, %v1039_v5  ;;  %v1890_v27 = vadd.f32 %v4390_v42, %v1590_v29  ;;  %v1137_v54 = vmul.f32 %v1028_v56, %v1028_v56  ;;  %v1529_v61 = vmul.f32 %v1420_v16, %v1028_v56 }
 0x432   : > { %v1559_v35 = vmul.f32 %v1527_v37, %v860_v36  ;;  %v1344_v25 = vmul.f32 %v5197_v28, %v1148_v40  ;;  %v1903_v44 = vadd.f32 %v4428_v22, %v1603_v53  ;;  %v888_v43 = vpop.permute.xlu1 %887  ;;  %v1432_v5 = vrot.slane %v4180_v47, %v4124_v6 }
 0x433   : > { %v1572_v55 = vmul.f32 %v1540_v19, %v951_v48  ;;  %v1240_v41 = vrot.slane %v4176_v45, %v4130_v10  ;;  %v1436_v42 = vrot.slane %v4180_v47, %v4130_v10  ;;  %v4606_v36 = vmax.f32 %v4511_v32, 0.0  ;;  %v958_v48 = vpop.permute.xlu0 %957 }
 0x434   : > { %v1591_v11 = vsub.f32 %v1331_v50, %v1559_v35  ;;  %v1594_v26 = vsub.f32 %v1334_v34, %v1562_v38  ;;  %v1244_v16 = vrot.slane %v4176_v45, %v4135_v13  ;;  %v4610_v51 = vmax.f32 %v1892_v8, 0.0 }
 0x435   : > { %v1604_v22 = vsub.f32 %v1344_v25, %v1572_v55  ;;  %v1998_v29 = vmul.f32 %v3292_v18, %v4531_v60  ;;  %v5198_v32 = vrot.slane %v4176_v45, %v4112_v62  ;;  %v1561_v38 = vmul.f32 %v1529_v61, %v874_v15 }
 0x436   : > { %v1891_v57 = vadd.f32 %v4395_v9, %v1591_v11  ;;  %v2002_v37 = vand.u32 2147483648, %v4531_v60  ;;  %v1040_v40 = vsub.f32 %v4516_v14, %v958_v48  ;;  %v1030_v53 = vsub.f32 %v4508_v1, %v888_v43  ;;  %v895_v20 = vpop.permute.xlu1 %894 }
 0x437   : > { %v4616_v12 = vadd.f32 %v4432_v31, %v1604_v22  ;;  %v1333_v34 = vmul.f32 %v5198_v32, %v1137_v54  ;;  %v2000_v9 = vsel %vm1999_vm6, %v4531_v60, %v1998_v29  ;;  %vm2001_vm7 = vcmp.eq.f32.partialorder %v4531_v60, 0.0 }
 0x438   : > { %v1894_v50 = vadd.f32 %v4410_v4, %v1594_v26  ;;  %v2003_v31 = vsel %vm2001_vm7, %v2002_v37, %v2000_v9  ;;  %3293 = vrsqrt.f32 %v4606_v36  ;;  %v1440_v62 = vrot.slane %v4180_v47, %v4135_v13 }
 0x439   : > { %v4631_v15 = vmax.f32 %v4534_v58, 0.0  ;;  %2222 = vperm.xlu1 %3267, %v2003_v31   ;;  %v1248_v46 = vrot.slane %v4176_v45, %v4140_v17  ;;  %v1444_v19 = vrot.slane %v4180_v47, %v4140_v17  ;;  %v1252_v60 = vrot.slane %v4176_v45, %v4147_v24 }
 0x43a   : > { %v4640_v4 = vmax.f32 %v4549_v33, 0.0  ;;  %v1593_v56 = vsub.f32 %v1333_v34, %v1561_v38  ;;  %v1031_v8 = vsub.f32 %v4508_v1, %v895_v20  ;;  %v1448_v58 = vrot.slane %v4180_v47, %v4147_v24  ;;  %v902_v61 = vpop.permute.xlu1 %901  ;;  %v4664_v34 = vpop.permute.xlu0 %964 }
 0x43b   : > { %v5199_v35 = vrot.slane %v4185_v49, %v4130_v10  ;;  %v1139_v25 = vmul.f32 %v1030_v53, %v1030_v53  ;;  %v5200_v55 = vrot.slane %v4180_v47, %v4126_v7  ;;  %3295 = vrsqrt.f32 %v4610_v51 }
 0x43c   : > { %v4652_v33 = vmax.f32 %v1894_v50, 0.0  ;;  %v4655_v11 = vmax.f32 %v4566_v52, 0.0  ;;  %v1140_v18 = vmul.f32 %v1031_v8, %v1031_v8  ;;  %v1532_v26 = vmul.f32 %v1432_v5, %v1031_v8 }
 0x43d   : > { %v1541_v28 = vmul.f32 %v5199_v35, %v1040_v40  ;;  %v1531_v54 = vmul.f32 %v5200_v55, %v1030_v53  ;;  %v4658_v22 = vmax.f32 %v4573_v2, 0.0  ;;  %v4660_v29 = vmax.f32 %v1890_v27, 0.0 }
 0x43e   : > { %v4662_v32 = vmul.f32 %v1040_v40, %v1040_v40  ;;  %3297 = vrsqrt.f32 %v4631_v15  ;;  %v4667_v38 = vmax.f32 %v1903_v44, 0.0  ;;  %v1893_v37 = vadd.f32 %v4412_v30, %v1593_v56  ;;  %v909_v31 = vpop.permute.xlu1 %908 }
 0x43f   : > { %v5201_v52 = vrot.slane %v4176_v45, %v4124_v6  ;;  %v1564_v5 = vmul.f32 %v1532_v26, %v895_v20  ;;  %v4673_v9 = vmul.f32 %v1541_v28, %v958_v48  ;;  %v5202_v2 = vrot.slane %v4176_v45, %v4126_v7 }
 0x440   : > { %v1563_v40 = vmul.f32 %v1531_v54, %v888_v43  ;;  %v1032_v50 = vsub.f32 %v4508_v1, %v902_v61  ;;  %v4679_v8 = vmax.f32 %v1891_v57, 0.0  ;;  %v1041_v30 = vsub.f32 %v4516_v14, %v4664_v34 }
 0x441   : > { %v1336_v53 = vmul.f32 %v5201_v52, %v1140_v18  ;;  %v1335_v27 = vmul.f32 %v5202_v2, %v1139_v25  ;;  %3299 = vrsqrt.f32 %v4652_v33  ;;  %vm2006_vm8 = vcmp.eq.f32.partialorder %v4606_v36, inf }
 0x442   : > { %vm2008_vm9 = vcmp.eq.f32.partialorder %v4606_v36, 0.0  ;;  %v1141_v6 = vmul.f32 %v1032_v50, %v1032_v50  ;;  %v1533_v7 = vmul.f32 %v1436_v42, %v1032_v50  ;;  %v3294_v43 = vpop.eup %3293  ;;  %v4689_v48 = vmax.f32 %v1893_v37, 0.0  ;;  %v916_v55 = vpop.permute.xlu1 %915 }
 0x443   : > { %v1596_v44 = vsub.f32 %v1336_v53, %v1564_v5  ;;  %v2009_v57 = vand.u32 2147483648, %v4606_v36  ;;  %3301 = vrsqrt.f32 %v4640_v4  ;;  %v1595_v56 = vsub.f32 %v1335_v27, %v1563_v40 }
 0x444   : > { %v2005_v35 = vmul.f32 %v3294_v43, %v4606_v36  ;;  %v1337_v28 = vmul.f32 %v1240_v41, %v1141_v6  ;;  %v1565_v25 = vmul.f32 %v1533_v7, %v902_v61  ;;  %v4700_v42 = vmul.f32 %v1041_v30, %v1041_v30 }
 0x445   : > { %v4693_v20 = vadd.f32 %v4422_v3, %v1596_v44  ;;  %vm2048_vm10 = vcmp.eq.f32.partialorder %v4610_v51, inf  ;;  %vm2050_vm11 = vcmp.eq.f32.partialorder %v4610_v51, 0.0  ;;  %v1033_v3 = vsub.f32 %v4508_v1, %v909_v31  ;;  %v3296_v54 = vpop.eup %3295 }
 0x446   : > { %v2007_v18 = vsel %vm2006_vm8, %v4606_v36, %v2005_v35  ;;  %v5203_v26 = vrot.slane %v4185_v49, %v4135_v13  ;;  %v1597_v41 = vsub.f32 %v1337_v28, %v1565_v25  ;;  %3303 = vrsqrt.f32 %v4655_v11  ;;  %v4726_v36 = vpop.permute.xlu1 %922 }
 0x447   : > { %v2010_v61 = vsel %vm2008_vm9, %v2009_v57, %v2007_v18  ;;  %v2047_v52 = vmul.f32 %v3296_v54, %v4610_v51  ;;  %v1142_v53 = vmul.f32 %v1033_v3, %v1033_v3  ;;  %v1534_v5 = vmul.f32 %v1440_v62, %v1033_v3  ;;  %v4747_v18 = vpop.permute.xlu0 %971 }
 0x448   : > { %v4711_v37 = vmul.f32 %v5203_v26, %v1041_v30  ;;  %v3298_v2 = vpop.eup %3297  ;;  %2225 = vperm.xlu0 %3268, %v2010_v61   ;;  %v2051_v27 = vand.u32 2147483648, %v4610_v51  ;;  %vm2013_vm12 = vcmp.eq.f32.partialorder %v4631_v15, inf  ;;  %v4723_v40 = vadd.f32 %v4426_v21, %v1597_v41 }
 0x449   : > { %v1034_v50 = vsub.f32 %v4508_v1, %v916_v55  ;;  %v2049_v30 = vsel %vm2048_vm10, %v4610_v51, %v2047_v52  ;;  %v2012_v44 = vmul.f32 %v3298_v2, %v4631_v15  ;;  %v1338_v62 = vmul.f32 %v1244_v16, %v1142_v53 }
 0x44a   : > { %v1566_v6 = vmul.f32 %v1534_v5, %v909_v31  ;;  %v2052_v7 = vsel %vm2050_vm11, %v2051_v27, %v2049_v30  ;;  %vm2015_vm13 = vcmp.eq.f32.partialorder %v4631_v15, 0.0  ;;  %v2016_v21 = vand.u32 2147483648, %v4631_v15  ;;  %v937_v3 = vpop.permute.xlu1 %936 }
 0x44b   : > { %v1143_v43 = vmul.f32 %v1034_v50, %v1034_v50  ;;  %v3300_v57 = vpop.eup %3299  ;;  %2243 = vperm.xlu1 %3267, %v2052_v7   ;;  %v2014_v35 = vsel %vm2013_vm12, %v4631_v15, %v2012_v44  ;;  %v1535_v25 = vmul.f32 %v1444_v19, %v1034_v50  ;;  %3305 = vrsqrt.f32 %v4660_v29  ;;  %v1781_v47 = vpop.permute.xlu0 %1780 }
 0x44c   : > { %v1598_v28 = vsub.f32 %v1338_v62, %v1566_v6  ;;  %v1895_v16 = vadd.f32 %v4419_v0, %v1595_v56  ;;  %v2017_v51 = vsel %vm2015_vm13, %v2016_v21, %v2014_v35  ;;  %v2061_v31 = vmul.f32 %v3300_v57, %v4652_v33 }
 0x44d   : > { %vm2062_vm14 = vcmp.eq.f32.partialorder %v4652_v33, inf  ;;  %v3302_v54 = vpop.eup %3301  ;;  %2228 = vperm.xlu0 %3268, %v2017_v51   ;;  %vm2064_vm15 = vcmp.eq.f32.partialorder %v4652_v33, 0.0  ;;  %v2065_v15 = vand.u32 2147483648, %v4652_v33  ;;  %vm2020_vm3 = vcmp.eq.f32.partialorder %v4640_v4, inf }
 0x44e   : > { %v1898_v19 = vadd.f32 %v4430_v39, %v1598_v28  ;;  %v2063_v0 = vsel %vm2062_vm14, %v4652_v33, %v2061_v31  ;;  %v2019_v56 = vmul.f32 %v3302_v54, %v4640_v4  ;;  %v2023_v26 = vand.u32 2147483648, %v4640_v4 }
 0x44f   : > { %3307 = vrsqrt.f32 %v4679_v8  ;;  %v2066_v41 = vsel %vm2064_vm15, %v2065_v15, %v2063_v0  ;;  %v1339_v61 = vmul.f32 %v1248_v46, %v1143_v43  ;;  %v1567_v52 = vmul.f32 %v1535_v25, %v916_v55 }
 0x450   : > { %v1035_v53 = vsub.f32 %v4508_v1, %v4726_v36  ;;  %v3304_v5 = vpop.eup %3303  ;;  %v4762_v2 = vmax.f32 %v1895_v16, 0.0  ;;  %v1042_v39 = vsub.f32 %v4516_v14, %v4747_v18  ;;  %2249 = vperm.xlu1 %3267, %v2066_v41   ;;  %v2021_v33 = vsel %vm2020_vm3, %v4640_v4, %v2019_v56  ;;  %v4773_v1 = vpop.permute.xlu1 %1822 }
 0x451   : > { %vm2022_vm4 = vcmp.eq.f32.partialorder %v4640_v4, 0.0  ;;  %v4769_v27 = vmax.f32 %v4693_v20, 0.0  ;;  %v2026_v46 = vmul.f32 %v3304_v5, %v4655_v11  ;;  %vm2027_vm5 = vcmp.eq.f32.partialorder %v4655_v11, inf }
 0x452   : > { %v2024_v50 = vsel %vm2022_vm4, %v2023_v26, %v2021_v33  ;;  %vm2029_vm6 = vcmp.eq.f32.partialorder %v4655_v11, 0.0  ;;  %v2030_v55 = vand.u32 2147483648, %v4655_v11  ;;  %v1037_v30 = vsub.f32 %v4516_v14, %v937_v3 }
 0x453   : > { %2231 = vperm.xlu0 %3268, %v2024_v50   ;;  %3309 = vrsqrt.f32 %v4689_v48  ;;  %v2028_v4 = vsel %vm2027_vm5, %v4655_v11, %v2026_v46  ;;  %v1599_v20 = vsub.f32 %v1339_v61, %v1567_v52  ;;  %v1144_v44 = vmul.f32 %v1035_v53, %v1035_v53 }
 0x454   : > { %v1536_v62 = vmul.f32 %v1448_v58, %v1035_v53  ;;  %v4785_v6 = vmul.f32 %v4711_v37, %v4664_v34  ;;  %v2031_v7 = vsel %vm2029_vm6, %v2030_v55, %v2028_v4  ;;  %v1146_v21 = vmul.f32 %v1037_v30, %v1037_v30  ;;  %v979_v54 = vpop.permute.xlu1 %978 }
 0x455   : > { %v5204_v43 = vrot.slane %v4185_v49, %v4114_v63  ;;  %v3306_v35 = vpop.eup %3305  ;;  %v4790_v28 = vmul.f32 %v1042_v39, %v1042_v39  ;;  %v4793_v11 = vmax.f32 %v4723_v40, 0.0  ;;  %vm2034_vm7 = vcmp.eq.f32.partialorder %v4660_v29, inf }
 0x456   : > { %3311 = vrsqrt.f32 %v4762_v2  ;;  %v2033_v58 = vmul.f32 %v3306_v35, %v4660_v29  ;;  %v2037_v34 = vand.u32 2147483648, %v4660_v29  ;;  %v5205_v37 = vrot.slane %v4145_v23, %v4114_v63 }
 0x457   : > { %v1538_v57 = vmul.f32 %v5204_v43, %v1037_v30  ;;  %2234 = vperm.xlu0 %3268, %v2031_v7   ;;  %v1899_v51 = vadd.f32 %v1781_v47, %v1599_v20  ;;  %v1340_v40 = vmul.f32 %v1252_v60, %v1144_v44  ;;  %v1568_v31 = vmul.f32 %v1536_v62, %v4726_v36 }
 0x458   : > { %v1342_v25 = vmul.f32 %v5205_v37, %v1146_v21  ;;  %3313 = vrsqrt.f32 %v4769_v27  ;;  %v5206_v0 = vrot.slane %v4185_v49, %v4140_v17  ;;  %v4810_v26 = vmax.f32 %v1898_v19, 0.0 }
 0x459   : > { %v1570_v16 = vmul.f32 %v1538_v57, %v937_v3  ;;  %v3308_v15 = vpop.eup %3307  ;;  %v2035_v63 = vsel %vm2034_vm7, %v4660_v29, %v2033_v58  ;;  %vm2036_vm8 = vcmp.eq.f32.partialorder %v4660_v29, 0.0  ;;  %vm2041_vm9 = vcmp.eq.f32.partialorder %v4679_v8, inf }
 0x45a   : > { %v1543_v56 = vmul.f32 %v5206_v0, %v1042_v39  ;;  %v2038_v45 = vsel %vm2036_vm8, %v2037_v34, %v2035_v63  ;;  %v2040_v60 = vmul.f32 %v3308_v15, %v4679_v8  ;;  %v5207_v36 = vrot.slane %v4145_v23, %v4130_v10  ;;  %v1788_v39 = vpop.permute.xlu0 %1787 }
 0x45b   : > { %2237 = vperm.xlu0 %3268, %v2038_v45   ;;  %v2044_v19 = vand.u32 2147483648, %v4679_v8  ;;  %v1602_v41 = vsub.f32 %v1342_v25, %v1570_v16  ;;  %v1043_v61 = vsub.f32 %v4516_v14, %v979_v54  ;;  %3315 = vrsqrt.f32 %v4793_v11 }
 0x45c   : > { %v1345_v3 = vmul.f32 %v5207_v36, %v4662_v32  ;;  %v4825_v52 = vmax.f32 %v1899_v51, 0.0  ;;  %v1600_v29 = vsub.f32 %v1340_v40, %v1568_v31  ;;  %v2042_v53 = vsel %vm2041_vm9, %v4679_v8, %v2040_v60  ;;  %v1830_v51 = vpop.permute.xlu1 %1829 }
 0x45d   : > { %vm2043_vm10 = vcmp.eq.f32.partialorder %v4679_v8, 0.0  ;;  %v3310_v5 = vpop.eup %3309  ;;  %vm2055_vm11 = vcmp.eq.f32.partialorder %v4689_v48, inf  ;;  %v1152_v10 = vmul.f32 %v1043_v61, %v1043_v61  ;;  %v5208_v32 = vrot.slane %v4185_v49, %v4147_v24 }
 0x45e   : > { %v2045_v33 = vsel %vm2043_vm10, %v2044_v19, %v2042_v53  ;;  %v2054_v14 = vmul.f32 %v3310_v5, %v4689_v48  ;;  %vm2057_vm12 = vcmp.eq.f32.partialorder %v4689_v48, 0.0  ;;  %v2058_v46 = vand.u32 2147483648, %v4689_v48 }
 0x45f   : > { %v1544_v50 = vmul.f32 %v5208_v32, %v1043_v61  ;;  %v1605_v55 = vsub.f32 %v1345_v3, %v4673_v9  ;;  %2240 = vperm.xlu0 %3268, %v2045_v33   ;;  %v1902_v8 = vadd.f32 %v4424_v59, %v1602_v41  ;;  %v5209_v30 = vrot.slane %v4145_v23, %v4147_v24 }
 0x460   : > { %3317 = vrsqrt.f32 %v4810_v26  ;;  %v3312_v49 = vpop.eup %3311  ;;  %v1900_v44 = vadd.f32 %v1788_v39, %v1600_v29  ;;  %v2056_v62 = vsel %vm2055_vm11, %v4689_v48, %v2054_v14  ;;  %vm2069_vm13 = vcmp.eq.f32.partialorder %v4762_v2, inf  ;;  %v1844_v48 = vpop.permute.xlu0 %1843 }
 0x461   : > { %v1348_v4 = vmul.f32 %v5209_v30, %v1152_v10  ;;  %v1576_v20 = vmul.f32 %v1544_v50, %v979_v54  ;;  %v1905_v7 = vadd.f32 %v4773_v1, %v1605_v55  ;;  %v2059_v21 = vsel %vm2057_vm12, %v2058_v46, %v2056_v62  ;;  %v1837_v3 = vpop.permute.xlu1 %1836 }
 0x462   : > { %v2068_v9 = vmul.f32 %v3312_v49, %v4762_v2  ;;  %3319 = vrsqrt.f32 %v4825_v52  ;;  %v3314_v59 = vpop.eup %3313  ;;  %vm2071_vm14 = vcmp.eq.f32.partialorder %v4762_v2, 0.0  ;;  %v2072_v24 = vand.u32 2147483648, %v4762_v2 }
 0x463   : > { %v1608_v43 = vsub.f32 %v1348_v4, %v1576_v20  ;;  %vm2076_vm15 = vcmp.eq.f32.partialorder %v4769_v27, inf  ;;  %v2079_v57 = vand.u32 2147483648, %v4769_v27  ;;  %v4851_v35 = vmax.f32 %v1902_v8, 0.0  ;;  %2246 = vperm.xlu0 %3268, %v2059_v21  }
 0x464   : > { %v2070_v1 = vsel %vm2069_vm13, %v4762_v2, %v2068_v9  ;;  %v2075_v47 = vmul.f32 %v3314_v59, %v4769_v27  ;;  %v5210_v58 = vrot.slane %v4145_v23, %v4135_v13  ;;  %v4859_v37 = vmax.f32 %v1905_v7, 0.0 }
 0x465   : > { %v2073_v25 = vsel %vm2071_vm14, %v2072_v24, %v2070_v1  ;;  %v1908_v16 = vadd.f32 %v1844_v48, %v1608_v43  ;;  %3321 = vrsqrt.f32 %v4658_v22  ;;  %v3316_v40 = vpop.eup %3315  ;;  %v4863_v31 = vmax.f32 %v4616_v12, 0.0 }
 0x466   : > { %v1346_v34 = vmul.f32 %v5210_v58, %v4700_v42  ;;  %v4865_v54 = vmax.f32 %v1900_v44, 0.0  ;;  %v2077_v2 = vsel %vm2076_vm15, %v4769_v27, %v2075_v47  ;;  %vm2078_vm3 = vcmp.eq.f32.partialorder %v4769_v27, 0.0 }
 0x467   : > { %v1575_v13 = vmul.f32 %v1543_v56, %v4747_v18  ;;  %v2080_v42 = vsel %vm2078_vm3, %v2079_v57, %v2077_v2  ;;  %v2082_v15 = vmul.f32 %v3316_v40, %v4793_v11  ;;  %vm2083_vm4 = vcmp.eq.f32.partialorder %v4793_v11, inf  ;;  %2252 = vperm.xlu0 %3268, %v2073_v25  }
 0x468   : > { %2255 = vperm.xlu1 %3267, %v2080_v42   ;;  %v2086_v12 = vand.u32 2147483648, %v4793_v11  ;;  %v1606_v0 = vsub.f32 %v1346_v34, %v4785_v6  ;;  %v5211_v63 = vrot.slane %v4145_v23, %v4140_v17  ;;  %3323 = vrsqrt.f32 %v4851_v35 }
 0x469   : > { %3325 = vrsqrt.f32 %v4859_v37  ;;  %v4882_v18 = vmax.f32 %v1908_v16, 0.0  ;;  %v2084_v27 = vsel %vm2083_vm4, %v4793_v11, %v2082_v15  ;;  %vm2085_vm5 = vcmp.eq.f32.partialorder %v4793_v11, 0.0 }
 0x46a   : > { %v1347_v45 = vmul.f32 %v5211_v63, %v4790_v28  ;;  %v3318_v56 = vpop.eup %3317  ;;  %v2087_v60 = vsel %vm2085_vm5, %v2086_v12, %v2084_v27  ;;  %v1906_v36 = vadd.f32 %v1830_v51, %v1606_v0  ;;  %3327 = vrsqrt.f32 %v4865_v54 }
 0x46b   : > { %v2089_v6 = vmul.f32 %v3318_v56, %v4810_v26  ;;  %3329 = vrsqrt.f32 %v4667_v38  ;;  %vm2090_vm6 = vcmp.eq.f32.partialorder %v4810_v26, inf  ;;  %v2093_v23 = vand.u32 2147483648, %v4810_v26  ;;  %v4920_v9 = vpop.permute.xlu1 %2198 }
 0x46c   : > { %v3320_v17 = vpop.eup %3319  ;;  %2258 = vperm.xlu1 %3267, %v2087_v60   ;;  %v1607_v28 = vsub.f32 %v1347_v45, %v1575_v13  ;;  %3331 = vrsqrt.f32 %v4863_v31  ;;  %vm2092_vm7 = vcmp.eq.f32.partialorder %v4810_v26, 0.0  ;;  %v4896_v41 = vmax.f32 %v1906_v36, 0.0 }
 0x46d   : > { %v2091_v11 = vsel %vm2090_vm6, %v4810_v26, %v2089_v6  ;;  %v2096_v19 = vmul.f32 %v3320_v17, %v4825_v52  ;;  %3333 = vrsqrt.f32 %v4882_v18  ;;  %vm2097_vm8 = vcmp.eq.f32.partialorder %v4825_v52, inf  ;;  %v5213_v6 = vld [vmem:[#allocation27_spill] sm:$0xff] }
 0x46e   : > { %v2094_v61 = vsel %vm2092_vm7, %v2093_v23, %v2091_v11  ;;  %v1907_v29 = vadd.f32 %v1837_v3, %v1607_v28  ;;  %v2100_v39 = vand.u32 2147483648, %v4825_v52  ;;  %vm2099_vm9 = vcmp.eq.f32.partialorder %v4825_v52, 0.0 }
 0x46f   : > { %v3322_v53 = vpop.eup %3321  ;;  %v2098_v5 = vsel %vm2097_vm8, %v4825_v52, %v2096_v19  ;;  %3335 = vrsqrt.f32 %v4896_v41  ;;  %vm2111_vm10 = vcmp.eq.f32.partialorder %v4658_v22, inf  ;;  %vm2118_vm11 = vcmp.eq.f32.partialorder %v4851_v35, inf }
 0x470   : > { %2261 = vperm.xlu1 %3267, %v2094_v61   ;;  %v2110_v26 = vmul.f32 %v3322_v53, %v4658_v22  ;;  %v2101_v33 = vsel %vm2099_vm9, %v2100_v39, %v2098_v5  ;;  %v4904_v32 = vmax.f32 %v1907_v29, 0.0  ;;  %v2121_v52 = vand.u32 2147483648, %v4851_v35 }
 0x471   : > { %v2114_v30 = vand.u32 2147483648, %v4658_v22  ;;  %vm2120_vm12 = vcmp.eq.f32.partialorder %v4851_v35, 0.0  ;;  %vm2113_vm13 = vcmp.eq.f32.partialorder %v4658_v22, 0.0  ;;  %vm2104_vm14 = vcmp.eq.f32.partialorder %v4865_v54, inf }
 0x472   : > { %v3324_v10 = vpop.eup %3323  ;;  %v2112_v55 = vsel %vm2111_vm10, %v4658_v22, %v2110_v26  ;;  %3337 = vrsqrt.f32 %v4904_v32  ;;  %vm2125_vm15 = vcmp.eq.f32.partialorder %v4667_v38, inf  ;;  %v2128_v22 = vand.u32 2147483648, %v4667_v38  ;;  %v2202_v56 = vpop.permute.xlu0 %2201 }
 0x473   : > { %v3326_v50 = vpop.eup %3325  ;;  %v2117_v14 = vmul.f32 %v3324_v10, %v4851_v35  ;;  %v2115_v21 = vsel %vm2113_vm13, %v2114_v30, %v2112_v55  ;;  %v2107_v48 = vand.u32 2147483648, %v4865_v54  ;;  %vm2127_vm3 = vcmp.eq.f32.partialorder %v4667_v38, 0.0  ;;  %v5215_v55 = vld [vmem:[#allocation28_spill] sm:$0xff] }
 0x474   : > { %v3328_v46 = vpop.eup %3327  ;;  %2264 = vperm.xlu1 %3267, %v2101_v33   ;;  %vm2160_vm4 = vcmp.eq.f32.partialorder %v4882_v18, inf  ;;  %vm2106_vm5 = vcmp.eq.f32.partialorder %v4865_v54, 0.0  ;;  %vm2132_vm6 = vcmp.eq.f32.partialorder %v4863_v31, inf  ;;  %v2163_v34 = vand.u32 2147483648, %v4882_v18 }
 0x475   : > { %v3330_v8 = vpop.eup %3329  ;;  %v2119_v4 = vsel %vm2118_vm11, %v4851_v35, %v2117_v14  ;;  %v2103_v20 = vmul.f32 %v3328_v46, %v4865_v54  ;;  %v2138_v25 = vmul.f32 %v3326_v50, %v4859_v37  ;;  %vm2162_vm7 = vcmp.eq.f32.partialorder %v4882_v18, 0.0  ;;  %v5214_v46 = vld [vmem:[#allocation29_spill] sm:$0xff] }
 0x476   : > { %v3332_v49 = vpop.eup %3331  ;;  %v2122_v44 = vsel %vm2120_vm12, %v2121_v52, %v2119_v4  ;;  %v2124_v62 = vmul.f32 %v3330_v8, %v4667_v38  ;;  %v2205_v16 = vpop.permute.xlu1 %2204  ;;  %vm2134_vm8 = vcmp.eq.f32.partialorder %v4863_v31, 0.0  ;;  %vm2139_vm9 = vcmp.eq.f32.partialorder %v4859_v37, inf }
 0x477   : > { %v3334_v7 = vpop.eup %3333  ;;  %2273 = vperm.xlu0 %3268, %v2122_v44   ;;  %v2131_v43 = vmul.f32 %v3332_v49, %v4863_v31  ;;  %v2105_v59 = vsel %vm2104_vm14, %v4865_v54, %v2103_v20  ;;  %v2140_v2 = vsel %vm2139_vm9, %v4859_v37, %v2138_v25  ;;  %v2142_v12 = vand.u32 2147483648, %v4859_v37 }
 0x478   : > { %2270 = vperm.xlu1 %3267, %v2115_v21   ;;  %v2126_v24 = vsel %vm2125_vm15, %v4667_v38, %v2124_v62  ;;  %v2159_v57 = vmul.f32 %v3334_v7, %v4882_v18  ;;  %v2108_v47 = vsel %vm2106_vm5, %v2107_v48, %v2105_v59  ;;  %v2135_v38 = vand.u32 2147483648, %v4863_v31 }
 0x479   : > { %v2129_v35 = vsel %vm2127_vm3, %v2128_v22, %v2126_v24  ;;  %v2133_v58 = vsel %vm2132_vm6, %v4863_v31, %v2131_v43  ;;  %v3336_v51 = vpop.eup %3335  ;;  %vm2141_vm10 = vcmp.eq.f32.partialorder %v4859_v37, 0.0  ;;  %vm2146_vm11 = vcmp.eq.f32.partialorder %v4896_v41, inf }
 0x47a   : > { %v2161_v1 = vsel %vm2160_vm4, %v4882_v18, %v2159_v57  ;;  %v2136_v54 = vsel %vm2134_vm8, %v2135_v38, %v2133_v58  ;;  %v2145_v13 = vmul.f32 %v3336_v51, %v4896_v41  ;;  %v2208_v42 = vpop.permute.xlu1 %2207  ;;  %v2143_v0 = vsel %vm2141_vm10, %v2142_v12, %v2140_v2  ;;  %v5212_v18 = vld [vmem:[#allocation23_spill] sm:$0xff]  ;;  %v5218_v12 = vld [vmem:[#allocation30_spill] sm:$0xff] }
 0x47b   : > { %2276 = vperm.xlu0 %3268, %v2129_v35   ;;  %v2164_v40 = vsel %vm2162_vm7, %v2163_v34, %v2161_v1  ;;  %v2149_v27 = vand.u32 2147483648, %v4896_v41  ;;  %vm2148_vm12 = vcmp.eq.f32.partialorder %v4896_v41, 0.0  ;;  %vm2153_vm13 = vcmp.eq.f32.partialorder %v4904_v32, inf }
 0x47c   : > { %2267 = vperm.xlu1 %3267, %v2108_v47   ;;  %v3338_v15 = vpop.eup %3337  ;;  %v2147_v31 = vsel %vm2146_vm11, %v4896_v41, %v2145_v13  ;;  %v2300_v3 = vrot.slane %v2202_v56, %v5213_v6  ;;  %v2156_v17 = vand.u32 2147483648, %v4904_v32  ;;  %vm1070_vm14 = vcmask 1041409  }
 0x47d   : > { %v2152_v63 = vmul.f32 %v3338_v15, %v4904_v32  ;;  %v2150_v60 = vsel %vm2148_vm12, %v2149_v27, %v2147_v31  ;;  %v2304_v23 = vrot.slane %v2205_v16, %v5213_v6  ;;  %vm2155_vm15 = vcmp.eq.f32.partialorder %v4904_v32, 0.0  ;;  %v5217_v15 = vld [vmem:[#allocation32_spill] sm:$0xff] }
 0x47e   : > { %v2211_v45 = vpop.permute.xlu1 %2210  ;;  %v2296_v28 = vrot.slane %v4920_v9, %v5213_v6  ;;  %vm1071_vm3 = vcmask 1042434   ;;  %v2308_v11 = vrot.slane %v2208_v42, %v5213_v6  ;;  %vm1073_vm4 = vcmask 1043459  }
 0x47f   : > { %2279 = vperm.xlu0 %3268, %v2136_v54   ;;  %v2154_v37 = vsel %vm2153_vm13, %v4904_v32, %v2152_v63  ;;  %v2312_v41 = vrot.slane %v2211_v45, %v5213_v6  ;;  %vm1075_vm5 = vcmask 1044484   ;;  %vm1077_vm6 = vcmask 1045509  }
 0x480   : > { %2291 = vperm.xlu1 %3267, %v2164_v40   ;;  %v2157_v19 = vsel %vm2155_vm15, %v2156_v17, %v2154_v37  ;;  %v2421_v29 = vsel %vm1070_vm14, %v2300_v3, %v2296_v28  ;;  %vm1079_vm7 = vcmask 1046534   ;;  %vm1081_vm8 = vcmask 1047559  }
 0x481   : > { %v2422_v5 = vsel %vm1071_vm3, %v2304_v23, %v2421_v29  ;;  %v5216_v52 = vsub.f32 %v5214_v46, %v5215_v55  ;;  %vm2502_vm9 = vcmask 1043456   ;;  %vm2705_vm10 = vcmask 195584  }
 0x482   : > { %v2214_v36 = vpop.permute.xlu1 %2213  ;;  %v2423_v26 = vsel %vm1073_vm4, %v2308_v11, %v2422_v5 }
 0x483   : > { %2282 = vperm.xlu0 %3268, %v2143_v0   ;;  %v2316_v53 = vrot.slane %v2214_v36, %v5213_v6  ;;  %v2424_v33 = vsel %vm1075_vm5, %v2312_v41, %v2423_v26  ;;  %v1117_v8 = vmax.f32 %v5216_v52, 1e-15  ;;  %v5219_v0 = vsub.f32 %v5217_v15, %v5218_v12  ;;  %v5225_v12 = vld [vmem:[#allocation25_spill] sm:$0xff] }
 0x484   : > { %2497 = vrot.lane.b32.xlu1 %v5212_v18, %s3682_s25 }
 0x485   : > { %v2425_v32 = vsel %vm1077_vm6, %v2316_v53, %v2424_v33  ;;  %v1118_v31 = vmax.f32 %v5219_v0, 1e-15 }
 0x486   : > { %v2217_v61 = vpop.permute.xlu1 %2216 }
 0x487   : > { %2285 = vperm.xlu0 %3268, %v2150_v60   ;;  %v2320_v39 = vrot.slane %v2217_v61, %v5213_v6 }
 0x489   : > { %v2426_v14 = vsel %vm1079_vm7, %v2320_v39, %v2425_v32 }
 0x48a   : > { %v2220_v10 = vpop.permute.xlu1 %2219 }
 0x48b   : > { %2288 = vperm.xlu0 %3268, %v2157_v19   ;;  %v2324_v50 = vrot.slane %v2220_v10, %v5213_v6 }
 0x48d   : > { %v2427_v30 = vsel %vm1081_vm8, %v2324_v50, %v2426_v14 }
 0x48e   : > { %v2457_v4 = vadd.f32 %v2427_v30, %v1117_v8  ;;  %v2453_v20 = vsub.f32 %v1117_v8, %v2427_v30 }
 0x490   : > { %3339 = vrcp.f32 %v2457_v4 }
 0x49a   : > { %v3340_v49 = vpop.eup %3339 }
 0x49b   : > { %v4974_v44 = vmul.f32 %v3340_v49, %v2453_v20  ;;  %v5220_v20 = vld [vmem:[#allocation33_spill] sm:$0xff]  ;;  %v5221_v49 = vld [vmem:[#allocation31_spill] sm:$0xff] }
 0x49d   : > { %v2469_v62 = vmax.f32 %v4974_v44, 5.000025e-06 }
 0x49f   : > { %v2473_v7 = vsel %vm503_vm2, %v2469_v62, 0.0 }
 0x4aa   : > { %2474 = vadd.xlane.f32.xlu0 %v2473_v7  ;;  %v5222_v7 = vsub.f32 %v5220_v20, %v5221_v49 }
 0x4b8   : > { %v2223_v59 = vpop.permute.xlu1 %2222 }
 0x4b9   : > { %v2328_v22 = vrot.slane %v2223_v59, %v5213_v6 }
 0x4c7   : > { %v2226_v21 = vpop.permute.xlu0 %2225 }
 0x4c8   : > { %v2332_v57 = vrot.slane %v2226_v21, %v5213_v6  ;;  %v1119_v21 = vmax.f32 %v5222_v7, 1e-15 }
 0x4ca   : > { %v2428_v58 = vsel %vm1070_vm14, %v2332_v57, %v2328_v22  ;;  %v2244_v34 = vpop.permute.xlu1 %2243 }
 0x4cb   : > { %v2356_v2 = vrot.slane %v2244_v34, %v5213_v6 }
 0x4cc   : > { %v2229_v9 = vpop.permute.xlu0 %2228 }
 0x4cd   : > { %v2336_v48 = vrot.slane %v2229_v9, %v5213_v6 }
 0x4cf   : > { %v2429_v16 = vsel %vm1071_vm3, %v2336_v48, %v2428_v58  ;;  %v2250_v63 = vpop.permute.xlu1 %2249 }
 0x4d0   : > { %v2364_v29 = vrot.slane %v2250_v63, %v5213_v6 }
 0x4d2   : > { %v2232_v43 = vpop.permute.xlu0 %2231 }
 0x4d3   : > { %v2340_v35 = vrot.slane %v2232_v43, %v5213_v6 }
 0x4d5   : > { %v2430_v51 = vsel %vm1073_vm4, %v2340_v35, %v2429_v16  ;;  %v5224_v16 = vld [vmem:[#allocation26_spill] sm:$0xff] }
 0x4d6   : > { %v2235_v24 = vpop.permute.xlu0 %2234 }
 0x4d7   : > { %v2344_v47 = vrot.slane %v2235_v24, %v5213_v6 }
 0x4d9   : > { %v2431_v40 = vsel %vm1075_vm5, %v2344_v47, %v2430_v51 }
 0x4da   : > { %v2238_v1 = vpop.permute.xlu0 %2237 }
 0x4db   : > { %v2348_v25 = vrot.slane %v2238_v1, %v5213_v6 }
 0x4dd   : > { %v2432_v13 = vsel %vm1077_vm6, %v2348_v25, %v2431_v40  ;;  %v5223_v25 = vmov 0.0  }
 0x4de   : > { %v2241_v38 = vpop.permute.xlu0 %2240 }
 0x4df   : > { %v2352_v54 = vrot.slane %v2241_v38, %v5213_v6 }
 0x4e1   : > { %v2433_v42 = vsel %vm1079_vm7, %v2352_v54, %v2432_v13 }
 0x4e2   : > { %v2434_v45 = vsel %vm1081_vm8, %v2356_v2, %v2433_v42  ;;  %v2247_v60 = vpop.permute.xlu0 %2246 }
 0x4e3   : > { %v2458_v18 = vadd.f32 %v2434_v45, %v1118_v31  ;;  %v2454_v36 = vsub.f32 %v1118_v31, %v2434_v45  ;;  %v2360_v19 = vrot.slane %v2247_v60, %v5213_v6  ;;  %v5227_v60 = vld [vmem:[#allocation34_spill] sm:$0xff] }
 0x4e5   : > { %3341 = vrcp.f32 %v2458_v18  ;;  %v2435_v33 = vsel %vm1070_vm14, %v2364_v29, %v2360_v19 }
 0x4e6   : > { %v2253_v23 = vpop.permute.xlu0 %2252 }
 0x4e7   : > { %v2256_v27 = vpop.permute.xlu1 %2255  ;;  %v2368_v41 = vrot.slane %v2253_v23, %v5213_v6 }
 0x4e8   : > { %v2372_v53 = vrot.slane %v2256_v27, %v5213_v6 }
 0x4e9   : > { %v2436_v32 = vsel %vm1071_vm3, %v2368_v41, %v2435_v33 }
 0x4ea   : > { %v2437_v14 = vsel %vm1073_vm4, %v2372_v53, %v2436_v32 }
 0x4eb   : > { %v2259_v56 = vpop.permute.xlu1 %2258 }
 0x4ec   : > { %v2376_v39 = vrot.slane %v2259_v56, %v5213_v6  ;;  %v5226_v56 = vld [vmem:[#allocation35_spill] sm:$0xff] }
 0x4ee   : > { %v2438_v55 = vsel %vm1075_vm5, %v2376_v39, %v2437_v14 }
 0x4ef   : > { %v2262_v37 = vpop.permute.xlu1 %2261  ;;  %v3342_v3 = vpop.eup %3341 }
 0x4f0   : > { %v4998_v17 = vmul.f32 %v3342_v3, %v2454_v36  ;;  %v2380_v10 = vrot.slane %v2262_v37, %v5213_v6  ;;  %v5228_v37 = vsub.f32 %v5226_v56, %v5227_v60 }
 0x4f2   : > { %v2470_v28 = vmax.f32 %v4998_v17, 5.000025e-06  ;;  %v2439_v8 = vsel %vm1077_vm6, %v2380_v10, %v2438_v55  ;;  %v1120_v36 = vmax.f32 %v5228_v37, 1e-15 }
 0x4f3   : > { %v2265_v11 = vpop.permute.xlu1 %2264 }
 0x4f4   : > { %v2476_v61 = vsel %vm503_vm2, %v2470_v28, 0.0  ;;  %v2384_v50 = vrot.slane %v2265_v11, %v5213_v6 }
 0x4f5   : > { %2477 = vadd.xlane.f32.xlu1 %v2476_v61 }
 0x4f6   : > { %v2274_v5 = vpop.permute.xlu0 %2273  ;;  %v2440_v4 = vsel %vm1079_vm7, %v2384_v50, %v2439_v8 }
 0x4f7   : > { %v2271_v26 = vpop.permute.xlu1 %2270  ;;  %v2396_v48 = vrot.slane %v2274_v5, %v5213_v6  ;;  %v5229_v5 = vld [vmem:[#allocation24_spill] sm:$0xff] }
 0x4f8   : > { %v2392_v47 = vrot.slane %v2271_v26, %v5213_v6 }
 0x4fa   : > { %v2277_v46 = vpop.permute.xlu0 %2276  ;;  %v2442_v38 = vsel %vm1070_vm14, %v2396_v48, %v2392_v47 }
 0x4fb   : > { %v2268_v52 = vpop.permute.xlu1 %2267  ;;  %v2400_v1 = vrot.slane %v2277_v46, %v5213_v6 }
 0x4fc   : > { %v2388_v30 = vrot.slane %v2268_v52, %v5213_v6 }
 0x4fd   : > { %v2443_v54 = vsel %vm1071_vm3, %v2400_v1, %v2442_v38 }
 0x4fe   : > { %v2441_v9 = vsel %vm1081_vm8, %v2388_v30, %v2440_v4  ;;  %v2280_v43 = vpop.permute.xlu0 %2279 }
 0x4ff   : > { %v2459_v59 = vadd.f32 %v2441_v9, %v1119_v21  ;;  %v2292_v24 = vpop.permute.xlu1 %2291  ;;  %v2404_v58 = vrot.slane %v2280_v43, %v5213_v6  ;;  %v2455_v2 = vsub.f32 %v1119_v21, %v2441_v9 }
 0x500   : > { %v2420_v63 = vrot.slane %v2292_v24, %v5213_v6 }
 0x501   : > { %3343 = vrcp.f32 %v2459_v59  ;;  %v2444_v13 = vsel %vm1073_vm4, %v2404_v58, %v2443_v54  ;;  %v3272_v58 = vld [vmem:[#allocation10 + $0x8] sm:$0xff]  }
 0x502   : > { %v2283_v22 = vpop.permute.xlu0 %2282 }
 0x503   : > { %v2498_v57 = vpop.permute.xlu1 %2497  ;;  %v2408_v51 = vrot.slane %v2283_v22, %v5213_v6 }
 0x504   : > { %v2504_v35 = vsel %vm2502_vm9, %v2498_v57, 0  ;;  %v3271_v57 = vld [vmem:[#allocation10] sm:$0xff]  }
 0x505   : > { %3098 = vmatpush3.bf16.msra.mxu1 %v2504_v35  ;;  %v2445_v0 = vsel %vm1075_vm5, %v2408_v51, %v2444_v13 }
 0x506   : > { %v2286_v34 = vpop.permute.xlu0 %2285  ;;  %3109 = vmatprep.subr.bf16.mxu1 %v5223_v25  ;;  %2594 = vrot.lane.b32.xlu1 %v5224_v16, %s3682_s25 }
 0x507   : > { %v2412_v40 = vrot.slane %v2286_v34, %v5213_v6  ;;  %v3273_v34 = vld [vmem:[#allocation13] sm:$0xff]  }
 0x509   : > { %v2446_v45 = vsel %vm1077_vm6, %v2412_v40, %v2445_v0 }
 0x50a   : > { %v2289_v42 = vpop.permute.xlu0 %2288  ;;  %2642 = vrot.lane.b32.xlu1 %v5225_v12, %s3682_s25 }
 0x50b   : > { %v3344_v15 = vpop.eup %3343  ;;  %v2416_v31 = vrot.slane %v2289_v42, %v5213_v6 }
 0x50c   : > { %v2467_v18 = vmul.f32 %v3344_v15, %v2455_v2 }
 0x50d   : > { %v2447_v27 = vsel %vm1079_vm7, %v2416_v31, %v2446_v45 }
 0x50e   : > { %v2471_v3 = vmax.f32 %v2467_v18, 5.000025e-06  ;;  %v2448_v23 = vsel %vm1081_vm8, %v2420_v63, %v2447_v27  ;;  %v3028_v27 = vld [vmem:[#allocation11] ss:$0 sm:$0xff] }
 0x50f   : > { %v2460_v11 = vadd.f32 %v2448_v23, %v1120_v36  ;;  %v2456_v41 = vsub.f32 %v1120_v36, %v2448_v23 }
 0x510   : > { %v2479_v19 = vsel %vm503_vm2, %v2471_v3, 0.0 }
 0x511   : > { %2480 = vadd.xlane.f32.xlu0 %v2479_v19  ;;  %3345 = vrcp.f32 %v2460_v11  ;;  %v3032_v11 = vld [vmem:[#allocation14] ss:$0 sm:$0xff] }
 0x51b   : > { %v3346_v61 = vpop.eup %3345 }
 0x51c   : > { %v2468_v6 = vmul.f32 %v3346_v61, %v2456_v41 }
 0x51e   : > { %v2472_v29 = vmax.f32 %v2468_v6, 5.000025e-06 }
 0x520   : > { %v2482_v53 = vsel %vm503_vm2, %v2472_v29, 0.0 }
 0x521   : > { %2483 = vadd.xlane.f32.xlu0 %v2482_v53 }
 0x537   : > { %2546 = vrot.lane.b32.xlu0 %v5229_v5, %s3682_s25  ;;  %v2475_v39 = vpop.xlane.xlu0 %2474  ;;  %s3686_s25 = smov [#allocation16]  }
 0x538   : > { %3347 = vrcp.f32 %v2475_v39 }
 0x542   : > { %v3348_v26 = vpop.eup %3347 }
 0x543   : > { %v2489_v33 = vmul.f32 %v3348_v26, %v2469_v62 }
 0x545   : > { %v2493_v10 = vpack.c.bf16 %v2489_v33, %v2489_v33 }
 0x547   : > { %3100 = vmatmul.mubr.msk.bf16.vlgmr.msra.gmra.mrb[8].mxu1 %vm503_vm2, %v2493_v10 }
 0x548   : > { %3111 = vmatprep.mubr.msk.bf16.mxu1 %vm3676_vm0, %v5223_v25 }
 0x582   : > { %v2478_v32 = vpop.xlane.xlu1 %2477 }
 0x586   : > { %v2595_v50 = vpop.permute.xlu1 %2594 }
 0x587   : > { %v2600_v14 = vsel %vm2502_vm9, %v2595_v50, 0 }
 0x588   : > { %3110 = vmatpush3.bf16.msra.mxu1 %v2600_v14 }
 0x589   : > { %3121 = vmatprep.subr.bf16.mxu1 %v5223_v25 }
 0x58a   : > { %v2643_v49 = vpop.permute.xlu1 %2642 }
 0x58b   : > { %v2648_v21 = vsel %vm2502_vm9, %v2643_v49, 0 }
 0x59e   : > { %v2481_v46 = vpop.xlane.xlu0 %2480 }
 0x59f   : > { %3349 = vrcp.f32 %v2481_v46 }
 0x5a0   : > { %3351 = vrcp.f32 %v2478_v32 }
 0x5a9   : > { %v3350_v55 = vpop.eup %3349 }
 0x5aa   : > { %v2491_v52 = vmul.f32 %v3350_v55, %v2471_v3  ;;  %v3352_v62 = vpop.eup %3351 }
 0x5ab   : > { %v2490_v30 = vmul.f32 %v3352_v62, %v2470_v28 }
 0x5ac   : > { %v2495_v44 = vpack.c.bf16 %v2491_v52, %v2491_v52 }
 0x5ad   : > { %v2494_v7 = vpack.c.bf16 %v2490_v30, %v2490_v30 }
 0x5ae   : > { %3112 = vmatmul.mubr.msk.bf16.vlgmr.msra.gmra.mrb[12].mxu1 %vm503_vm2, %v2495_v44  ;;  %v2484_v8 = vpop.xlane.xlu0 %2483 }
 0x5af   : > { %3353 = vrcp.f32 %v2484_v8  ;;  %3125 = vmatprep.mubr.msk.bf16.mxu1 %vm3676_vm0, %v5223_v25  ;;  %3122 = vmatpush3.bf16.msra.mxu1 %v3271_v57 }
 0x5b0   : > { %3123 = vmatprep.subr.bf16.mxu1 %v5223_v25 }
 0x5b2   : > { %v2547_v4 = vpop.permute.xlu0 %2546 }
 0x5b3   : > { %v2552_v20 = vsel %vm2502_vm9, %v2547_v4, 0  ;;  %3124 = vmatpush3.bf16.msra.mxu1 %v3272_v58 }
 0x5b4   : > { %3104 = vmatpush3.bf16.msra.mxu0 %v2552_v20 }
 0x5b5   : > { %3115 = vmatprep.subr.bf16.mxu0 %v5223_v25 }
 0x5b7   : > { %3106 = vmatmul.mubr.msk.bf16.vlgmr.msra.gmra.mrb[12].mxu0 %vm503_vm2, %v2494_v7 }
 0x5b8   : > { %3116 = vmatpush3.bf16.msra.mxu0 %v2648_v21  ;;  %3117 = vmatprep.mubr.msk.bf16.mxu0 %vm3676_vm0, %v5223_v25 }
 0x5b9   : > { %v3354_v9 = vpop.eup %3353  ;;  %3129 = vmatprep.subr.bf16.mxu0 %v5223_v25 }
 0x5ba   : > { %v2492_v17 = vmul.f32 %v3354_v9, %v2472_v29 }
 0x5bc   : > { %v2496_v28 = vpack.c.bf16 %v2492_v17, %v2492_v17 }
 0x5bf   : > { %3118 = vmatmul.mubr.msk.bf16.vlgmr.msra.gmra.mrb[16].mxu0 %vm503_vm2, %v2496_v28 }
 0x5c0   : > { %3133 = vmatprep.mubr.msk.bf16.mxu0 %vm3676_vm0, %v5223_v25  ;;  %3130 = vmatpush3.bf16.msra.mxu0 %v3273_v34  ;;  %vm2703_vm0 = vcmask 130048  }
 0x5c1   : > { %3131 = vmatprep.subr.bf16.mxu0 %v5223_v25  ;;  %v3274_v25 = vld [vmem:[#allocation13 + $0x8] sm:$0xff]  }
 0x5c4   : > { %3132 = vmatpush3.bf16.msra.mxu0 %v3274_v25 }
 0x61a   : > { %v2540_v43 = vpop.f32.mrb[8].mxu1 }
 0x61b   : > { %v3101_v59 = vpop.f32.mrb[9].mxu1 }
 0x61c   : > { %v2543_v24 = vpop.f32.mrb[10].mxu1 }
 0x61d   : > { %v3102_v22 = vpop.f32.mrb[11].mxu1 }
 0x681   : > { %v2636_v48 = vpop.f32.mrb[12].mxu1 }
 0x682   : > { %2695 = vrot.lane.b32.xlu1 %v2636_v48, %s3683_s15  ;;  %v3113_v35 = vpop.f32.mrb[13].mxu1  ;;  %s3585_s15 = sshll.u32 %s3686_s25, 4  ;;  %s3586_s15 = int_to_ptr.vmem [resolvable:$false] %s3585_s15 }
 0x683   : > { %v2639_v1 = vpop.f32.mrb[14].mxu1  ;;  %p3588_p2 = scmp.lt.s32.totalorder %s5084_s26, %s3586_s15 }
 0x684   : > { %v3114_v47 = vpop.f32.mrb[15].mxu1 }
 0x68a   : > { %v2588_v16 = vpop.f32.mrb[12].mxu0 }
 0x68b   : > { %2691 = vrot.lane.b32.xlu0 %v2588_v16, %s3684_s19  ;;  %v3107_v51 = vpop.f32.mrb[13].mxu0  ;;  %s3587_s19 = scalar_lea.vmem %s3586_s15, 256 }
 0x68c   : > { %v2591_v38 = vpop.f32.mrb[14].mxu0  ;;  %p3589_p3 = scmp.lt.s32.totalorder %s3587_s19, %s3581_s13 }
 0x68d   : > { %v3108_v40 = vpop.f32.mrb[15].mxu0 }
 0x68e   : > { %p3590_p6 = por %p3589_p3, %p3588_p2 }
 0x690   : > { %p3591_p4 = pnand %p3590_p6, %p3584_p0 }
 0x692   : > { %v2684_v54 = vpop.f32.mrb[16].mxu0 }
 0x693   : > { %2699 = vrot.lane.b32.xlu0 %v2684_v54, %s3685_s10  ;;  %v3119_v2 = vpop.f32.mrb[17].mxu0 }
 0x694   : > { %v2687_v13 = vpop.f32.mrb[18].mxu0 }
 0x695   : > { %v3120_v42 = vpop.f32.mrb[19].mxu0 }
 0x6f4   : > { %v2696_v0 = vpop.permute.xlu1 %2695 }
 0x6fd   : > { %v2692_v15 = vpop.permute.xlu0 %2691 }
 0x6fe   : > { %v2702_v12 = vsel %vm503_vm2, %v2540_v43, %v2692_v15 }
 0x6ff   : > { %v2704_v31 = vsel %vm2703_vm0, %v2702_v12, %v2696_v0 }
 0x705   : > { %v2700_v63 = vpop.permute.xlu0 %2699 }
 0x706   : > { %v2706_v45 = vsel %vm2705_vm10, %v2704_v31, %v2700_v63 }
 0x707   : > { %v2707_v18 = vpack.c.bf16 %v2706_v45, %v2706_v45 }
 0x709   : > { %3126 = vmatmul.mubr.msk.bf16.vlgmr.msra.gmra.mrb[16].mxu1 %vm445_vm1, %v2707_v18 }
 0x7dc   : > { %v2768_v56 = vpop.f32.mrb[16].mxu1 }
 0x7dd   : > { %v2769_v60 = vadd.f32 %v3028_v27, %v2768_v56  ;;  %v3127_v37 = vpop.f32.mrb[17].mxu1 }
 0x7de   : > { %v2771_v36 = vpop.f32.mrb[18].mxu1 }
 0x7df   : > { %v2774_v3 = vpack.c.bf16 %v2769_v60, %v2769_v60  ;;  %v3128_v23 = vpop.f32.mrb[19].mxu1 }
 0x7e1   : > { %3134 = vmatmul.mubr.msk.bf16.vlgmr.msra.gmra.mrb[20].mxu0 %vm445_vm1, %v2774_v3 }
 0x8b4   : > { %v2835_v19 = vpop.f32.mrb[20].mxu0 }
 0x8b5   : > { %v2836_v41 = vadd.f32 %v3032_v11, %v2835_v19  ;;  %v3135_v61 = vpop.f32.mrb[21].mxu0 }
 0x8b6   : > { %v2838_v6 = vpop.f32.mrb[22].mxu0 }
 0x8b7   : > { %v2841_v29 = vmax.f32 %v2836_v41, 0.0  ;;  %v3136_v53 = vpop.f32.mrb[23].mxu0 }
 0x8b9   : > { %2842 = vst.msk [vmem:[%s414_s21] sm:$0xff] %vm445_vm1, %v2841_v29 }
 0x8ba   : > { %3594 = shalt.err (!%p3591_p4)
}
 0x8bb   : > { %s3595_s20 = scalar_lea.hbm %s5082_s14, 128  ;;  %s3599_s18 = scalar_lea.hbm %s5135_s8, 256 }
 0x8bc   : > { %p3596_p11 = scmp.ne.s32.totalorder %s5082_s14, %s3595_s20  ;;  %p3600_p9 = scmp.lt.u32.totalorder %s5082_s14, %s5135_s8 }
 0x8bd   : > { %p3601_p7 = scmp.lt.u32.totalorder %s3599_s18, %s3595_s20  ;;  %p3603_p12 = scmp.lt.u32.totalorder %s3595_s20, %s5082_s14 }
 0x8be   : > { %p3597_p8 = pnand %p3596_p11, %p5230_p1 }
 0x8bf   : > { %p3602_p10 = por %p3601_p7, %p3600_p9 }
 0x8c0   : > { %p3598_p5 = pneg %p3597_p8 }
 0x8c1   : > { %p3604_p13 = por %p3603_p12, %p3602_p10 }
 0x8c3   : > { %p3605_p0 = pnand %p3604_p13, %p3598_p5 }
 0x8c5   : > { %3608 = shalt.err (!%p3605_p0)
}
 0x8c6   : > { %3167 = dma.vmem_to_hbm [thread:$0]  (%p5230_p1), %s5084_s26, 128, %s5082_s14, %s2844_s11  }
 0x8c7 PF: > { %s2869_s24 = sand.u32 1, %s3651_s27   ;;  %p5231_p2 = scmp.ne.s32.totalorder %s5161_s9, 0 }
 0x8c8   : > { %p5232_p3 = scmp.ge.s32.totalorder %s3663_s30, 2  ;;  %s2870_s13 = scalar_lea.sflag [#allocation4], %s2869_s24 }
 0x8ca   : > { %p3196_p6 = pnand %p5232_p3, %p5231_p2 }
 0x8cc   : > { %3646 = dma.done.wait (!%p3196_p6), %s2870_s13, 128  }
 0x8cd   : > { %3648 = vsyncadd (!%p3196_p6), %s2870_s13, 4294967168  ;;  %p25_p4 = scmp.ge.s32.totalorder %s3947_s17, 4   ;;  %s5233_s27 = smov %s3655_s28 }
 0x8ce   : > { %s5234_s28 = smov %s3659_s29  ;;  %s5235_s29 = smov %s3959_s23 }
 0x8cf   : > { %s5236_s30 = smov %s3947_s17  ;;  %27 = sbr.rel (!%p25_p4) target bundleno = 9 (0x9), region = 125 }
 0x8d6   :  { %2875 = vsyncpa [#allocation3], 1 }
 0x8d7   :  { %2877 = vsyncpa [#allocation3 + $0x1], 1 }
 0x8d8   :  { %2878 = vsyncpa [#allocation6], 1 }
 0x8d9   :  { %2879 = vsyncpa [#allocation9], 1 }
 0x8da   :  { %2880 = vsyncpa [#allocation12], 1 }
 0x8db   :  { %2881 = vsyncpa [#allocation15], 1 }
 0x8dc   :  { %2882 = vsyncpa [#allocation4], 1 }
 0x8dd   :  { %2884 = vsyncpa [#allocation4 + $0x1], 1 }

// kernel: tpu_custom_call.1
= control target key start
LH: loop header
LB: loop body
LE: loop exit
PB: predicated region body
PF: predicated region fallthrough
CT: control target
= control target key end

     0   :  { %13 = vsyncpa [#allocation3], 0  ;;  %s5127_s0 = inlined_call_operand.hbm [shape: bf16[2,8,32], index: 0, kind: input, shape index: {}]   ;;  %s5128_s1 = inlined_call_operand.hbm [shape: bf16[8,32], index: 1, kind: input, shape index: {}]   ;;  %s5129_s2 = inlined_call_operand.hbm [shape: bf16[32,96], index: 2, kind: input, shape index: {}]   ;;  %s5130_s3 = inlined_call_operand.hbm [shape: f32[1,96], index: 3, kind: input, shape index: {}]   ;;  %s5131_s4 = inlined_call_operand.hbm [shape: bf16[32,32], index: 4, kind: input, shape index: {}]   ;;  %s5132_s5 = inlined_call_operand.hbm [shape: f32[1,32], index: 5, kind: input, shape index: {}]   ;;  %s5133_s6 = inlined_call_operand.hbm [shape: bf16[32,32], index: 6, kind: input, shape index: {}]   ;;  %s5134_s7 = inlined_call_operand.hbm [shape: f32[1,32], index: 7, kind: input, shape index: {}]   ;;  %s5135_s8 = inlined_call_operand.hbm [shape: f32[2,8,32], index: 8, kind: output, shape index: {}]  }
   0x1   :  { %15 = vsyncpa [#allocation3 + $0x1], 0 }
   0x2   :  { %16 = vsyncpa [#allocation6], 0 }
   0x3   :  { %17 = vsyncpa [#allocation9], 0 }
   0x4   :  { %18 = vsyncpa [#allocation12], 0 }
   0x5   :  { %19 = vsyncpa [#allocation15], 0 }
   0x6   :  { %20 = vsyncpa [#allocation4], 0 }
   0x7   :  { %22 = vsyncpa [#allocation4 + $0x1], 0  ;;  %s3732_s27 = smov 0   ;;  %s3734_s28 = smov 0  }
   0x8   :  { %s3736_s29 = smov 0   ;;  %s3738_s30 = smov 0  }
   0x9 LB: > { %s3665_s9 = smov [#allocation5]   ;;  %s3753_s11 = sadd.s32 4294967295, %s3663_s30   ;;  %s3663_s30 = sphi %s3738_s30, %s5236_s30   ;;  %s3659_s29 = sphi %s3736_s29, %s5235_s29   ;;  %s3655_s28 = sphi %s3734_s28, %s5234_s28   ;;  %s3651_s27 = sphi %s3732_s27, %s5233_s27  }
   0xa   : > { %s245_s10 = sshll.u32 %s3665_s9, 4  ;;  %p2995_p0 = scmp.ge.s32.totalorder %s3663_s30, 1  ;;  %s3758_s10 = int_to_ptr.vmem [resolvable:$true] %s245_s10 }
   0xb   : > { %p5136_p1 = scmp.eq.s32.totalorder %s3753_s11, 0  ;;  %p232_p2 = scmp.lt.s32.totalorder %s3663_s30, 3 }
   0xc   : > { %s3666_s13 = smov [#allocation8]   ;;  %s3667_s15 = smov [#allocation11]  }
   0xd   : > { %p3760_p3 = pnand %p2995_p0, %p232_p2  ;;  %s269_s14 = sshll.u32 %s3666_s13, 4  ;;  %s3767_s14 = int_to_ptr.vmem [resolvable:$true] %s269_s14 }
   0xe   : > { %s293_s16 = sshll.u32 %s3667_s15, 4  ;;  %s3668_s18 = smov [#allocation7]   ;;  %s3775_s16 = int_to_ptr.vmem [resolvable:$true] %s293_s16 }
   0xf   : > { %s5155_s12 = scalar_select %p3760_p3, 1, 0 }
  0x10   : > { %p3169_p5 = pneg %p3760_p3  ;;  %s3777_s19 = sshll.u32 %s3668_s18, 4  ;;  %s256_s19 = int_to_ptr.vmem [resolvable:$true] %s3777_s19 }
  0x11   : > { %s3355_s22 = scalar_lea.hbm %s5128_s1, 64 }
  0x12   : > { %p3771_p6 = pnand %p3169_p5, %p5136_p1  ;;  %p3356_p7 = scmp.ne.s32.totalorder %s5128_s1, %s3355_s22 }
  0x13   : > { %p3362_p11 = scmp.lt.u32.totalorder %s3355_s22, %s5128_s1 }
  0x14   : > { %p3787_p8 = pneg %p3771_p6 }
  0x16   : > { %p3358_p9 = pnand %p3787_p8, %p3356_p7 }
  0x18   : > { %p3359_p10 = pneg %p3358_p9 }
  0x1a   : > { %p3364_p12 = pnand %p3362_p11, %p3359_p10 }
  0x1c   : > { %3367 = shalt.err (!%p3364_p12)
}
  0x1d   : > { %s3368_s13 = scalar_lea.vmem %s3758_s10, 64  ;;  %p3376_p5 = scmp.lt.s32.totalorder %s3758_s10, %s3758_s10 }
  0x1e   : > { %p3369_p13 = scmp.ne.s32.totalorder %s3758_s10, %s3368_s13  ;;  %p3377_p4 = scmp.lt.s32.totalorder %s3368_s13, %s3368_s13 }
  0x20   : > { %p3371_p0 = pnand %p3369_p13, %p3787_p8  ;;  %p3378_p7 = por %p3377_p4, %p3376_p5 }
  0x22   : > { %p3372_p2 = pneg %p3371_p0 }
  0x24   : > { %p3379_p9 = pnand %p3378_p7, %p3372_p2 }
  0x26   : > { %3382 = shalt.err (!%p3379_p9)
}
  0x27   : > { %3172 = dma.hbm_to_vmem [thread:$0]  (!%p3771_p6), %s5128_s1, 64, %s3758_s10, [#allocation6]  }
  0x28   : > { %s3383_s22 = scalar_lea.hbm %s5130_s3, 16 }
  0x29   : > { %p3384_p10 = scmp.ne.s32.totalorder %s5130_s3, %s3383_s22  ;;  %p3390_p12 = scmp.lt.u32.totalorder %s3383_s22, %s5130_s3 }
  0x2b   : > { %p3386_p4 = pnand %p3384_p10, %p3787_p8 }
  0x2d   : > { %p3387_p11 = pneg %p3386_p4 }
  0x2f   : > { %p3392_p13 = pnand %p3390_p12, %p3387_p11 }
  0x31   : > { %3395 = shalt.err (!%p3392_p13)
}
  0x32   : > { %s3396_s10 = scalar_lea.vmem %s3767_s14, 16  ;;  %s3403_s13 = scalar_lea.vmem %s3767_s14, 32 }
  0x33   : > { %p3397_p0 = scmp.ne.s32.totalorder %s3767_s14, %s3396_s10  ;;  %p3404_p7 = scmp.lt.s32.totalorder %s3767_s14, %s3767_s14 }
  0x34   : > { %p3405_p9 = scmp.lt.s32.totalorder %s3403_s13, %s3396_s10 }
  0x35   : > { %p3399_p2 = pnand %p3397_p0, %p3787_p8 }
  0x36   : > { %p3406_p10 = por %p3405_p9, %p3404_p7 }
  0x37   : > { %p3400_p5 = pneg %p3399_p2 }
  0x39   : > { %p3407_p4 = pnand %p3406_p10, %p3400_p5 }
  0x3b   : > { %3410 = shalt.err (!%p3407_p4)
}
  0x3c   : > { %3178 = dma.hbm_to_vmem [thread:$0]  (!%p3771_p6), %s5130_s3, 16, %s3767_s14, [#allocation9]  }
  0x3d   : > { %s3411_s22 = scalar_lea.hbm %s5132_s5, 16 }
  0x3e   : > { %p3412_p11 = scmp.ne.s32.totalorder %s5132_s5, %s3411_s22  ;;  %p3418_p0 = scmp.lt.u32.totalorder %s3411_s22, %s5132_s5 }
  0x40   : > { %p3414_p12 = pnand %p3412_p11, %p3787_p8 }
  0x42   : > { %p3415_p13 = pneg %p3414_p12 }
  0x44   : > { %p3420_p2 = pnand %p3418_p0, %p3415_p13 }
  0x46   : > { %3423 = shalt.err (!%p3420_p2)
}
  0x47   : > { %s3424_s14 = scalar_lea.vmem %s3775_s16, 16  ;;  %s3431_s10 = scalar_lea.vmem %s3775_s16, 32 }
  0x48   : > { %p3425_p5 = scmp.ne.s32.totalorder %s3775_s16, %s3424_s14  ;;  %p3432_p10 = scmp.lt.s32.totalorder %s3775_s16, %s3775_s16 }
  0x49   : > { %p3433_p4 = scmp.lt.s32.totalorder %s3431_s10, %s3424_s14 }
  0x4a   : > { %p3427_p7 = pnand %p3425_p5, %p3787_p8 }
  0x4b   : > { %p3434_p11 = por %p3433_p4, %p3432_p10 }
  0x4c   : > { %p3428_p9 = pneg %p3427_p7 }
  0x4e   : > { %p3435_p12 = pnand %p3434_p11, %p3428_p9 }
  0x50   : > { %3438 = shalt.err (!%p3435_p12)
}
  0x51   : > { %3184 = dma.hbm_to_vmem [thread:$0]  (!%p3771_p6), %s5132_s5, 16, %s3775_s16, [#allocation12]  }
  0x52   : > { %s3439_s21 = scalar_lea.hbm %s5129_s2, 256 }
  0x53   : > { %p3440_p13 = scmp.ne.s32.totalorder %s5129_s2, %s3439_s21  ;;  %p3446_p5 = scmp.lt.u32.totalorder %s3439_s21, %s5129_s2 }
  0x55   : > { %p3442_p0 = pnand %p3440_p13, %p3787_p8 }
  0x57   : > { %p3443_p2 = pneg %p3442_p0 }
  0x59   : > { %p3448_p7 = pnand %p3446_p5, %p3443_p2 }
  0x5b   : > { %3451 = shalt.err (!%p3448_p7)
}
  0x5c   : > { %s3452_s9 = scalar_lea.vmem %s256_s19, 256  ;;  %p3460_p11 = scmp.lt.s32.totalorder %s256_s19, %s256_s19 }
  0x5d   : > { %p3453_p9 = scmp.ne.s32.totalorder %s256_s19, %s3452_s9  ;;  %p3461_p12 = scmp.lt.s32.totalorder %s3452_s9, %s3452_s9 }
  0x5f   : > { %p3455_p10 = pnand %p3453_p9, %p3787_p8  ;;  %p3462_p1 = por %p3461_p12, %p3460_p11 }
  0x61   : > { %p3456_p4 = pneg %p3455_p10 }
  0x63   : > { %p3463_p3 = pnand %p3462_p1, %p3456_p4 }
  0x65   : > { %3466 = shalt.err (!%p3463_p3)
}
  0x66   : > { %s3669_s16 = smov 64   ;;  %s3670_s14 = smov 4  }
  0x67   : > { %3175 = dma.hbm_to_vmem [thread:$0]  (!%p3771_p6), %s5129_s2, 256, %s256_s19, [#allocation6], %s3669_s16, %s3669_s16, %s3670_s14  }
  0x68   : > { %s3671_s15 = smov [#allocation10]   ;;  %s3672_s20 = smov [#allocation13]  }
  0x69   : > { %s279_s18 = sshll.u32 %s3671_s15, 4  ;;  %s303_s21 = sshll.u32 %s3672_s20, 4  ;;  %s280_s18 = int_to_ptr.vmem [resolvable:$true] %s279_s18  ;;  %s3878_s21 = int_to_ptr.vmem [resolvable:$true] %s303_s21 }
  0x6a   : > { %s3467_s24 = scalar_lea.hbm %s5131_s4, 256 }
  0x6b   : > { %p3468_p1 = scmp.ne.s32.totalorder %s5131_s4, %s3467_s24  ;;  %p3474_p0 = scmp.lt.u32.totalorder %s3467_s24, %s5131_s4 }
  0x6d   : > { %p3470_p3 = pnand %p3468_p1, %p3787_p8 }
  0x6f   : > { %p3471_p13 = pneg %p3470_p3 }
  0x71   : > { %p3476_p2 = pnand %p3474_p0, %p3471_p13 }
  0x73   : > { %3479 = shalt.err (!%p3476_p2)
}
  0x74   : > { %s3480_s13 = scalar_lea.vmem %s280_s18, 256  ;;  %p3488_p10 = scmp.lt.s32.totalorder %s280_s18, %s280_s18 }
  0x75   : > { %p3481_p5 = scmp.ne.s32.totalorder %s280_s18, %s3480_s13  ;;  %p3489_p4 = scmp.lt.s32.totalorder %s3480_s13, %s3480_s13 }
  0x77   : > { %p3483_p7 = pnand %p3481_p5, %p3787_p8  ;;  %p3490_p11 = por %p3489_p4, %p3488_p10 }
  0x79   : > { %p3484_p9 = pneg %p3483_p7 }
  0x7b   : > { %p3491_p12 = pnand %p3490_p11, %p3484_p9 }
  0x7d   : > { %3494 = shalt.err (!%p3491_p12)
}
  0x7e   : > { %3181 = dma.hbm_to_vmem [thread:$0]  (!%p3771_p6), %s5131_s4, 256, %s280_s18, [#allocation9], %s3669_s16, %s3669_s16, %s3670_s14  }
  0x7f   : > { %s3495_s24 = scalar_lea.hbm %s5133_s6, 256 }
  0x80   : > { %p3496_p1 = scmp.ne.s32.totalorder %s5133_s6, %s3495_s24  ;;  %p3502_p0 = scmp.lt.u32.totalorder %s3495_s24, %s5133_s6 }
  0x82   : > { %p3498_p3 = pnand %p3496_p1, %p3787_p8 }
  0x84   : > { %p3499_p13 = pneg %p3498_p3 }
  0x86   : > { %p3504_p2 = pnand %p3502_p0, %p3499_p13 }
  0x88   : > { %3507 = shalt.err (!%p3504_p2)
}
  0x89   : > { %s3508_s18 = scalar_lea.vmem %s3878_s21, 256  ;;  %p3516_p10 = scmp.lt.s32.totalorder %s3878_s21, %s3878_s21 }
  0x8a   : > { %p3509_p5 = scmp.ne.s32.totalorder %s3878_s21, %s3508_s18  ;;  %p3517_p4 = scmp.lt.s32.totalorder %s3508_s18, %s3508_s18 }
  0x8c   : > { %p3511_p7 = pnand %p3509_p5, %p3787_p8  ;;  %p3518_p11 = por %p3517_p4, %p3516_p10 }
  0x8e   : > { %p3512_p9 = pneg %p3511_p7 }
  0x90   : > { %p3519_p12 = pnand %p3518_p11, %p3512_p9 }
  0x92   : > { %3522 = shalt.err (!%p3519_p12)
}
  0x93   : > { %3187 = dma.hbm_to_vmem [thread:$0]  (!%p3771_p6), %s5133_s6, 256, %s3878_s21, [#allocation12], %s3669_s16, %s3669_s16, %s3670_s14  }
  0x94   : > { %s3673_s20 = smov [#allocation14]   ;;  %s3523_s26 = scalar_lea.hbm %s5134_s7, 16 }
  0x95   : > { %s317_s22 = sshll.u32 %s3673_s20, 4  ;;  %p3524_p1 = scmp.ne.s32.totalorder %s5134_s7, %s3523_s26  ;;  %s318_s22 = int_to_ptr.vmem [resolvable:$true] %s317_s22 }
  0x96   : > { %p3530_p0 = scmp.lt.u32.totalorder %s3523_s26, %s5134_s7 }
  0x97   : > { %p3526_p3 = pnand %p3524_p1, %p3787_p8 }
  0x99   : > { %p3527_p13 = pneg %p3526_p3 }
  0x9b   : > { %p3532_p2 = pnand %p3530_p0, %p3527_p13 }
  0x9d   : > { %3535 = shalt.err (!%p3532_p2)
}
  0x9e   : > { %s3536_s16 = scalar_lea.vmem %s318_s22, 16  ;;  %s3543_s14 = scalar_lea.vmem %s318_s22, 32 }
  0x9f   : > { %p3537_p5 = scmp.ne.s32.totalorder %s318_s22, %s3536_s16  ;;  %p3544_p10 = scmp.lt.s32.totalorder %s318_s22, %s318_s22 }
  0xa0   : > { %p3545_p4 = scmp.lt.s32.totalorder %s3543_s14, %s3536_s16 }
  0xa1   : > { %p3539_p7 = pnand %p3537_p5, %p3787_p8 }
  0xa2   : > { %p3546_p11 = por %p3545_p4, %p3544_p10 }
  0xa3   : > { %p3540_p9 = pneg %p3539_p7 }
  0xa5   : > { %p3547_p12 = pnand %p3546_p11, %p3540_p9 }
  0xa7   : > { %3550 = shalt.err (!%p3547_p12)
}
  0xa8   : > { %3190 = dma.hbm_to_vmem [thread:$0]  (!%p3771_p6), %s5134_s7, 16, %s318_s22, [#allocation15]  }
  0xa9   : > { %s2994_s25 = sadd.s32 4294967294, %s3663_s30   ;;  %s3947_s17 = sadd.s32 1, %s3663_s30  }
  0xaa   : > { %s35_s15 = sadd.s32 1, %s3659_s29  ;;  %s32_s20 = ssub.s32 %s3663_s30, %s3947_s17 }
  0xab   : > { %p42_p8 = scmp.ne.s32.totalorder %s3659_s29, %s3655_s28  ;;  %p33_p1 = scmp.eq.s32.totalorder %s32_s20, 0 }
  0xac   : > { %p43_p3 = scmp.eq.s32.totalorder %s3663_s30, 0  ;;  %p48_p13 = scmp.ne.s32.totalorder %s3655_s28, %s3651_s27 }
  0xad   : > { %p219_p0 = scmp.eq.s32.totalorder %s3753_s11, 1  ;;  %p5158_p5 = scmp.eq.s32.totalorder %s3753_s11, 0 }
  0xae   : > { %s3959_s23 = scalar_select %p33_p1, %s3659_s29, %s35_s15  }
  0xaf   : > { %p44_p2 = por %p43_p3, %p42_p8  ;;  %p3963_p7 = por %p5158_p5, %p48_p13 }
  0xb0   : > { %p3967_p6 = por %p219_p0, %p42_p8  ;;  %p225_p9 = scmp.eq.s32.totalorder %s2994_s25, 1 }
  0xb1   : > { %p3206_p10 = scmp.lt.s32.totalorder %s3663_s30, 2  ;;  %s328_s26 = sand.u32 1, %s3659_s29  }
  0xb2   : > { %s5160_s22 = scalar_select %p3967_p6, 1, 0 }
  0xb3   : > { %p3973_p4 = por %p225_p9, %p48_p13  ;;  %s3004_s10 = sshll.u32 %s328_s26, 2 }
  0xb4   : > { %s3005_s19 = sshll.u32 %s3663_s30, 6  ;;  %s332_s21 = scalar_lea.vmem [#allocation2], %s3004_s10 }
  0xb5   : > { %s5161_s9 = scalar_select %p3973_p4, 1, 0 }
  0xb6   : > { %s3981_s14 = scalar_lea.hbm %s5127_s0, %s3005_s19  ;;  %s339_s13 = sshll.u32 %s332_s21, 4  ;;  %s3987_s13 = int_to_ptr.vmem [resolvable:$true] %s339_s13 }
  0xb7   : > { %p3983_p11 = pnand %p3206_p10, %p44_p2  ;;  %s329_s15 = scalar_lea.sflag [#allocation3], %s328_s26 }
  0xb8   : > { %s3551_s20 = scalar_lea.hbm %s3981_s14, 64  ;;  %s3556_s18 = scalar_lea.hbm %s5127_s0, 128 }
  0xb9   : > { %p3552_p12 = scmp.ne.s32.totalorder %s3981_s14, %s3551_s20  ;;  %p3553_p8 = pneg %p3983_p11 }
  0xba   : > { %p3557_p13 = scmp.lt.u32.totalorder %s3981_s14, %s5127_s0  ;;  %p3558_p0 = scmp.lt.u32.totalorder %s3556_s18, %s3551_s20 }
  0xbb   : > { %p3554_p1 = pnand %p3553_p8, %p3552_p12  ;;  %p3560_p5 = scmp.lt.u32.totalorder %s3551_s20, %s3981_s14 }
  0xbc   : > { %p3559_p2 = por %p3558_p0, %p3557_p13 }
  0xbd   : > { %p3555_p3 = pneg %p3554_p1 }
  0xbe   : > { %p3561_p9 = por %p3560_p5, %p3559_p2 }
  0xc0   : > { %p3562_p10 = pnand %p3561_p9, %p3555_p3 }
  0xc2   : > { %3565 = shalt.err (!%p3562_p10)
}
  0xc3   : > { %s3566_s26 = scalar_lea.vmem %s3987_s13, 64  ;;  %s3674_s19 = smov [#allocation2]  }
  0xc4   : > { %p3567_p12 = scmp.ne.s32.totalorder %s3987_s13, %s3566_s26  ;;  %s3571_s10 = sshll.u32 %s3674_s19, 4  ;;  %s3572_s10 = int_to_ptr.vmem [resolvable:$false] %s3571_s10 }
  0xc5   : > { %s3573_s16 = scalar_lea.vmem %s3572_s10, 128  ;;  %p3574_p6 = scmp.lt.s32.totalorder %s3987_s13, %s3572_s10 }
  0xc6   : > { %p3569_p1 = pnand %p3567_p12, %p3553_p8  ;;  %p3575_p13 = scmp.lt.s32.totalorder %s3573_s16, %s3566_s26 }
  0xc8   : > { %p3570_p4 = pneg %p3569_p1  ;;  %p3576_p0 = por %p3575_p13, %p3574_p6 }
  0xca   : > { %p3577_p2 = pnand %p3576_p0, %p3570_p4 }
  0xcc   : > { %3580 = shalt.err (!%p3577_p2)
}
  0xcd   : > { %3194 = dma.hbm_to_vmem [thread:$0]  (!%p3983_p11), %s3981_s14, 64, %s3987_s13, %s329_s15  }
  0xce   : > { %p5163_p3 = scmp.ne.s32.totalorder %s5155_s12, 0 }
  0xd0   : > { %348 = sbr.rel (%p5163_p3) target bundleno = 2247 (0x8c7), region = 52 }
  0xd7   : > { %s4017_s20 = sand.u32 1, %s3655_s28  }
  0xd8   : > { %s3007_s18 = sshll.u32 %s4017_s20, 2  ;;  %s351_s21 = scalar_lea.sflag [#allocation3], %s4017_s20 }
  0xd9   : > { %s354_s26 = scalar_lea.vmem [#allocation2], %s3007_s18 }
  0xda   : > { %3626 = dma.done.wait (%p3963_p7), %s351_s21, 64  }
  0xdb   : > { %3628 = vsyncadd (%p3963_p7), %s351_s21, 4294967232  ;;  %p5164_p6 = scmp.eq.s32.totalorder %s3753_s11, 0 }
  0xdd   : > { %3630 = dma.done.wait (%p5164_p6), [#allocation6], 320   ;;  %p5165_p4 = pmov %p5164_p6 }
  0xdf   : > { %3632 = vsyncadd (%p5165_p4), [#allocation6], 4294966976  ;;  %p5166_p11 = pmov %p5165_p4 }
  0xe0   : > { %p5167_p8 = pmov %p5165_p4 }
  0xe1   : > { %3634 = dma.done.wait (%p5166_p11), [#allocation9], 272  }
  0xe2   : > { %3636 = vsyncadd (%p5167_p8), [#allocation9], 4294967024  ;;  %p5168_p5 = pmov %p5165_p4 }
  0xe3   : > { %p5169_p9 = pmov %p5165_p4 }
  0xe4   : > { %3638 = dma.done.wait (%p5168_p5), [#allocation12], 272  }
  0xe5   : > { %3640 = vsyncadd (%p5169_p9), [#allocation12], 4294967024  ;;  %p5170_p7 = pmov %p5165_p4 }
  0xe6   : > { %p5171_p10 = pmov %p5165_p4 }
  0xe7   : > { %3642 = dma.done.wait (%p5170_p7), [#allocation15], 16  }
  0xe8   : > { %3644 = vsyncadd (%p5171_p10), [#allocation15], 4294967280  ;;  %v5139_v0 = vmov 0.0   ;;  %vm3676_vm0 = vmmov 0   ;;  %v3269_v1 = vld [vmem:[#allocation7] sm:$0xff]   ;;  %v3270_v2 = vld [vmem:[#allocation7 + $0x8] sm:$0xff]   ;;  %v756_v51 = vlaneseq }
  0xe9   : > { %3065 = vmatprep.subr.bf16.mxu0 %v5139_v0  ;;  %3069 = vmatprep.mubr.msk.bf16.mxu0 %vm3676_vm0, %v5139_v0  ;;  %v416_v3 = vld [vmem:[%s354_s26] sm:$0xf]  ;;  %v418_v4 = vld [vmem:[#allocation5] sm:$0xf]  ;;  %vm445_vm1 = vcmask 261120   ;;  %s3677_s12 = smov 104  }
  0xea   : > { %3073 = vmatprep.subr.bf16.mxu1 %v5139_v0  ;;  %3075 = vmatprep.mubr.msk.bf16.mxu1 %vm3676_vm0, %v5139_v0  ;;  %v417_v5 = vunpack.c.l.bf16 %v416_v3  ;;  %v419_v6 = vunpack.c.l.bf16 %v418_v4  ;;  %v3016_v9 = vld [vmem:[#allocation8] ss:$0 sm:$0xff]  ;;  %s3678_s24 = smov 120   ;;  %s3679_s14 = smov 112   ;;  %vm503_vm2 = vcmask 64512   ;;  %v1053_v52 = vand.u32 127, %v756_v51 }
  0xeb   : > { %3066 = vmatpush3.bf16.msra.mxu0 %v3269_v1  ;;  %s3680_s13 = smov 96   ;;  %v757_v53 = vshrl.u32 %v756_v51, 7  ;;  %s3682_s25 = smov 64  }
  0xec   : > { %3067 = vmatprep.subr.bf16.mxu0 %v5139_v0  ;;  %v420_v7 = vadd.f32 %v419_v6, %v417_v5  ;;  %s3683_s15 = smov 16   ;;  %s3684_s19 = smov 8  }
  0xed   : > { %v4103_v56 = vsub.s32 %v1053_v52, %v757_v53  ;;  %v4112_v62 = vsub.s32 0, %v757_v53  ;;  %v4114_v63 = vsub.s32 1, %v757_v53  ;;  %v4124_v6 = vsub.s32 3, %v757_v53  ;;  %s3685_s10 = smov 24   ;;  %s3015_s16 = sshll.u32 %s4017_s20, 3 }
  0xee   : > { %v421_v8 = vpack.c.bf16 %v420_v7, %v420_v7  ;;  %v4126_v7 = vsub.s32 2, %v757_v53  ;;  %s3037_s18 = sshll.u32 %s3753_s11, 7  ;;  %s414_s21 = scalar_lea.vmem [#allocation16], %s3015_s16 }
  0xef   : > { %3068 = vmatpush3.bf16.msra.mxu0 %v3270_v2  ;;  %5176 = vst [vmem:[#allocation27_spill] sm:$0xff] %v4103_v56  ;;  %s2857_s26 = sshll.u32 %s414_s21, 4  ;;  %s2844_s11 = scalar_lea.sflag [#allocation4], %s4017_s20  ;;  %s5084_s26 = int_to_ptr.vmem [resolvable:$true] %s2857_s26 }
  0xf0   : > { %3079 = vmatprep.subr.bf16.mxu0 %v5139_v0  ;;  %p5230_p1 = scmp.ne.s32.totalorder %s5160_s22, 0 }
  0xf2   : > { %3070 = vmatmul.mubr.msk.bf16.vlgmr.msra.gmra.mrb[0].mxu0 %vm445_vm1, %v421_v8 }
  0xf3   : > { %3081 = vmatprep.mubr.msk.bf16.mxu0 %vm3676_vm0, %v5139_v0 }
 0x1c5   : > { %v483_v10 = vpop.f32.mrb[0].mxu0 }
 0x1c6   : > { %v484_v11 = vadd.f32 %v3016_v9, %v483_v10  ;;  %v3071_v12 = vpop.f32.mrb[1].mxu0  ;;  %v4130_v10 = vsub.s32 4, %v757_v53 }
 0x1c7   : > { %v486_v13 = vpop.f32.mrb[2].mxu0 }
 0x1c8   : > { %496 = vrot.lane.b32.xlu1 %v484_v11, %s3677_s12  ;;  %490 = vrot.lane.b32.xlu0 %v484_v11, %s3678_s24  ;;  %v3072_v14 = vpop.f32.mrb[3].mxu0  ;;  %v4052_v15 = vpack.c.bf16 %v484_v11, %v484_v11  ;;  %v499_v25 = vmul.f32 %v484_v11, %v484_v11  ;;  %v4135_v13 = vsub.s32 5, %v757_v53 }
 0x1ca   : > { %5172 = vst [vmem:[#allocation23_spill] sm:$0xff] %v4052_v15  ;;  %v504_v28 = vsel %vm503_vm2, %v499_v25, 0.0 }
 0x1cc   : > { %493 = vrot.lane.b32.xlu0 %v484_v11, %s3679_s14  ;;  %549 = vrot.lane.b32.xlu1 %v4052_v15, %s3680_s13  ;;  %s5082_s14 = scalar_lea.hbm %s5135_s8, %s3037_s18 }
 0x23a   : > { %v497_v16 = vpop.permute.xlu1 %496  ;;  %v491_v17 = vpop.permute.xlu0 %490 }
 0x23b   : > { %v4055_v18 = vpack.c.bf16 %v491_v17, %v491_v17  ;;  %v4058_v21 = vpack.c.bf16 %v497_v16, %v497_v16  ;;  %v500_v24 = vmul.f32 %v491_v17, %v491_v17  ;;  %v502_v26 = vmul.f32 %v497_v16, %v497_v16 }
 0x23c   : > { %v4140_v17 = vsub.s32 6, %v757_v53 }
 0x23d   : > { %5173 = vst [vmem:[#allocation24_spill] sm:$0xff] %v4055_v18  ;;  %598 = vrot.lane.b32.xlu0 %v4055_v18, %s3680_s13  ;;  %5174 = vst [vmem:[#allocation25_spill] sm:$0xff] %v4058_v21  ;;  %v507_v27 = vsel %vm503_vm2, %v500_v24, 0.0  ;;  %v513_v30 = vsel %vm503_vm2, %v502_v26, 0.0 }
 0x23e   : > { %v494_v19 = vpop.permute.xlu0 %493  ;;  %v550_v20 = vpop.permute.xlu1 %549 }
 0x23f   : > { %v4060_v22 = vpack.c.bf16 %v494_v19, %v494_v19  ;;  %v555_v23 = vsel %vm503_vm2, %v550_v20, 0  ;;  %v501_v29 = vmul.f32 %v494_v19, %v494_v19 }
 0x240   : > { %3074 = vmatpush3.bf16.xpose.msra.mxu1 %v555_v23 }
 0x241   : > { %5175 = vst [vmem:[#allocation26_spill] sm:$0xff] %v4060_v22  ;;  %696 = vrot.lane.b32.xlu0 %v4058_v21, %s3680_s13  ;;  %647 = vrot.lane.b32.xlu1 %v4060_v22, %s3680_s13  ;;  %v510_v42 = vsel %vm503_vm2, %v501_v29, 0.0 }
 0x242   : > { %3085 = vmatprep.subr.bf16.mxu1 %v5139_v0 }
 0x245   : > { %522 = vrot.lane.b32.xlu0 %v500_v24, %s3680_s13  ;;  %520 = vrot.lane.b32.xlu1 %v499_v25, %s3680_s13  ;;  %v4147_v24 = vsub.s32 7, %v757_v53 }
 0x247   : > { %3076 = vmatmul.mubr.msk.bf16.vlgmr.msra.gmra.mrb[0].mxu1 %vm503_vm2, %v4052_v15 }
 0x248   : > { %3087 = vmatprep.mubr.msk.bf16.mxu1 %vm3676_vm0, %v5139_v0 }
 0x249   : > { %526 = vrot.lane.b32.xlu0 %v502_v26, %s3680_s13 }
 0x268   : > { %508 = vadd.xlane.f32.xlu0 %v507_v27 }
 0x269   : > { %505 = vadd.xlane.f32.xlu1 %v504_v28 }
 0x27a   : > { %524 = vrot.lane.b32.xlu1 %v501_v29, %s3680_s13  ;;  %s3581_s13 = scalar_lea.vmem %s5084_s26, 128 }
 0x27b   : > { %p3582_p12 = scmp.ne.s32.totalorder %s5084_s26, %s3581_s13 }
 0x27d   : > { %p3583_p13 = pnand %p3582_p12, %p5230_p1 }
 0x27f   : > { %p3584_p0 = pneg %p3583_p13 }
 0x29e   : > { %514 = vadd.xlane.f32.xlu1 %v513_v30 }
 0x2af   : > { %v599_v31 = vpop.permute.xlu0 %598 }
 0x2b0   : > { %v604_v32 = vsel %vm503_vm2, %v599_v31, 0 }
 0x2b1   : > { %3080 = vmatpush3.bf16.xpose.msra.mxu0 %v604_v32 }
 0x2b2   : > { %3091 = vmatprep.subr.bf16.mxu0 %v5139_v0 }
 0x2b3   : > { %v697_v33 = vpop.permute.xlu0 %696  ;;  %v648_v34 = vpop.permute.xlu1 %647 }
 0x2b4   : > { %v653_v35 = vsel %vm503_vm2, %v648_v34, 0  ;;  %v702_v38 = vsel %vm503_vm2, %v697_v33, 0 }
 0x2b5   : > { %3086 = vmatpush3.bf16.xpose.msra.mxu1 %v653_v35 }
 0x2b6   : > { %3097 = vmatprep.subr.bf16.mxu1 %v5139_v0 }
 0x2b7   : > { %v523_v36 = vpop.permute.xlu0 %522  ;;  %v521_v37 = vpop.permute.xlu1 %520 }
 0x2b8   : > { %3082 = vmatmul.mubr.msk.bf16.vlgmr.msra.gmra.mrb[4].mxu0 %vm503_vm2, %v4055_v18  ;;  %v532_v39 = vsel %vm503_vm2, %v521_v37, 0.0  ;;  %v535_v40 = vsel %vm503_vm2, %v523_v36, 0.0  ;;  %v3681_v36 = vmov 0  }
 0x2b9   : > { %3092 = vmatpush3.bf16.xpose.msra.mxu0 %v702_v38  ;;  %533 = vadd.xlane.f32.xlu0 %v532_v39 }
 0x2ba   : > { %536 = vadd.xlane.f32.xlu1 %v535_v40  ;;  %3093 = vmatprep.mubr.msk.bf16.mxu0 %vm3676_vm0, %v5139_v0 }
 0x2bb   : > { %v527_v41 = vpop.permute.xlu0 %526  ;;  %3103 = vmatprep.subr.bf16.mxu0 %v5139_v0  ;;  %3267 = vset.pattern.permute.xlu1 %v3681_v36 }
 0x2bc   : > { %3088 = vmatmul.mubr.msk.bf16.vlgmr.msra.gmra.mrb[4].mxu1 %vm503_vm2, %v4060_v22  ;;  %v541_v43 = vsel %vm503_vm2, %v527_v41, 0.0  ;;  %3268 = vset.pattern.permute.xlu0 %v3681_v36 }
 0x2bd   : > { %511 = vadd.xlane.f32.xlu0 %v510_v42  ;;  %3099 = vmatprep.mubr.msk.bf16.mxu1 %vm3676_vm0, %v5139_v0 }
 0x2be   : > { %542 = vadd.xlane.f32.xlu1 %v541_v43 }
 0x2c0   : > { %3094 = vmatmul.mubr.msk.bf16.vlgmr.msra.gmra.mrb[8].mxu0 %vm503_vm2, %v4058_v21 }
 0x2c1   : > { %3105 = vmatprep.mubr.msk.bf16.mxu0 %vm3676_vm0, %v5139_v0 }
 0x2f5   : > { %v4098_v54 = vpop.xlane.xlu0 %508 }
 0x2f6   : > { %v4095_v44 = vpop.xlane.xlu1 %505  ;;  %v4155_v28 = vsub.f32 1.0, %v4098_v54 }
 0x2f7   : > { %v4101_v55 = vsub.f32 1.0, %v4095_v44 }
 0x2f8   : > { %v1610_v32 = vmul.f32 %v4155_v28, %v4155_v28 }
 0x2f9   : > { %v1609_v59 = vmul.f32 %v4101_v55, %v4101_v55 }
 0x2fa   : > { %v525_v45 = vpop.permute.xlu1 %524 }
 0x2fb   : > { %v538_v46 = vsel %vm503_vm2, %v525_v45, 0.0 }
 0x2fc   : > { %539 = vadd.xlane.f32.xlu0 %v538_v46 }
 0x31a   : > { %v591_v47 = vpop.f32.mrb[0].mxu1 }
 0x31b   : > { %v3077_v48 = vpop.f32.mrb[1].mxu1  ;;  %v4116_v1 = vadd.f32 %v591_v47, %v591_v47 }
 0x31c   : > { %v594_v49 = vpop.f32.mrb[2].mxu1 }
 0x31d   : > { %v3078_v50 = vpop.f32.mrb[3].mxu1  ;;  %5177 = vst [vmem:[#allocation28_spill] sm:$0xff] %v4116_v1  ;;  %v759_v12 = vrot.slane %v4116_v1, %v4112_v62  ;;  %v780_v16 = vrot.slane %v4116_v1, %v4124_v6  ;;  %v787_v20 = vrot.slane %v4116_v1, %v4130_v10  ;;  %v794_v26 = vrot.slane %v4116_v1, %v4135_v13 }
 0x31e   : > { %v766_v30 = vrot.slane %v4116_v1, %v4114_v63  ;;  %v801_v31 = vrot.slane %v4116_v1, %v4140_v17  ;;  %v773_v34 = vrot.slane %v4116_v1, %v4126_v7  ;;  %v808_v35 = vrot.slane %v4116_v1, %v4147_v24 }
 0x32b   : > { %v4145_v23 = vpop.xlane.xlu1 %514 }
 0x32c   : > { %v4185_v49 = vsub.f32 1.0, %v4145_v23 }
 0x346   : > { %v4105_v57 = vpop.xlane.xlu0 %533 }
 0x347   : > { %v1057_v58 = vrot.slane %v4105_v57, %v4103_v56  ;;  %v4152_v27 = vpop.xlane.xlu1 %536 }
 0x348   : > { %v1061_v29 = vrot.slane %v4152_v27, %v4103_v56 }
 0x349   : > { %v1105_v60 = vmul.f32 %v1057_v58, %v4095_v44  ;;  %v1613_v61 = vmul.f32 %v1609_v59, %v1057_v58  ;;  %v1612_v59 = vmul.f32 %v4185_v49, %v4185_v49 }
 0x34a   : > { %v1614_v33 = vmul.f32 %v1610_v32, %v1061_v29  ;;  %v4176_v45 = vpop.xlane.xlu0 %511 }
 0x34b   : > { %v4118_v2 = vadd.f32 1.0, %v1105_v60  ;;  %v1624_v3 = vrot.slane %v1613_v61, %v4112_v62  ;;  %v1631_v4 = vrot.slane %v1613_v61, %v4114_v63  ;;  %v1645_v8 = vrot.slane %v1613_v61, %v4124_v6  ;;  %v4182_v48 = vpop.xlane.xlu1 %542 }
 0x34c   : > { %v1638_v9 = vrot.slane %v1613_v61, %v4126_v7  ;;  %v1652_v11 = vrot.slane %v1613_v61, %v4130_v10  ;;  %v1659_v14 = vrot.slane %v1613_v61, %v4135_v13  ;;  %v1666_v19 = vrot.slane %v1613_v61, %v4140_v17 }
 0x34d   : > { %5178 = vst [vmem:[#allocation29_spill] sm:$0xff] %v4118_v2  ;;  %1626 = vbcast.lane.b32.xlu1 %v1624_v3, 256  ;;  %1633 = vbcast.lane.b32.xlu0 %v1631_v4, 256  ;;  %v1673_v25 = vrot.slane %v1613_v61, %v4147_v24  ;;  %v1687_v37 = vrot.slane %v1614_v33, %v4114_v63  ;;  %v4180_v47 = vsub.f32 1.0, %v4176_v45 }
 0x34e   : > { %v1680_v38 = vrot.slane %v1614_v33, %v4112_v62  ;;  %v1694_v39 = vrot.slane %v1614_v33, %v4126_v7  ;;  %v1701_v40 = vrot.slane %v1614_v33, %v4124_v6  ;;  %v1708_v41 = vrot.slane %v1614_v33, %v4130_v10 }
 0x34f   : > { %v1715_v42 = vrot.slane %v1614_v33, %v4135_v13  ;;  %v1722_v43 = vrot.slane %v1614_v33, %v4140_v17  ;;  %v1729_v46 = vrot.slane %v1614_v33, %v4147_v24  ;;  %v1069_v51 = vrot.slane %v4182_v48, %v4103_v56 }
 0x350   : > { %v1611_v52 = vmul.f32 %v4180_v47, %v4180_v47 }
 0x351   : > { %1647 = vbcast.lane.b32.xlu1 %v1645_v8, 256  ;;  %1640 = vbcast.lane.b32.xlu0 %v1638_v9, 256  ;;  %v4199_v4 = vmul.f32 %v1612_v59, %v1069_v51 }
 0x355   : > { %1654 = vbcast.lane.b32.xlu1 %v1652_v11, 256  ;;  %761 = vbcast.lane.b32.xlu0 %v759_v12, 256  ;;  %v1106_v12 = vmul.f32 %v1061_v29, %v4098_v54  ;;  %v1792_v29 = vrot.slane %v4199_v4, %v4112_v62 }
 0x357   : > { %v4216_v33 = vadd.f32 1.0, %v1106_v12 }
 0x359   : > { %1661 = vbcast.lane.b32.xlu1 %v1659_v14, 256  ;;  %782 = vbcast.lane.b32.xlu0 %v780_v16, 256  ;;  %5181 = vst [vmem:[#allocation32_spill] sm:$0xff] %v4216_v33 }
 0x35d   : > { %1668 = vbcast.lane.b32.xlu1 %v1666_v19, 256  ;;  %789 = vbcast.lane.b32.xlu0 %v787_v20, 256 }
 0x361   : > { %1675 = vbcast.lane.b32.xlu1 %v1673_v25, 256  ;;  %796 = vbcast.lane.b32.xlu0 %v794_v26, 256 }
 0x365   : > { %768 = vbcast.lane.b32.xlu1 %v766_v30, 256  ;;  %803 = vbcast.lane.b32.xlu0 %v801_v31, 256  ;;  %v1108_v30 = vmul.f32 %v1069_v51, %v4145_v23 }
 0x369   : > { %775 = vbcast.lane.b32.xlu1 %v773_v34, 256  ;;  %810 = vbcast.lane.b32.xlu0 %v808_v35, 256 }
 0x36d   : > { %1689 = vbcast.lane.b32.xlu0 %v1687_v37, 256  ;;  %1682 = vbcast.lane.b32.xlu1 %v1680_v38, 256 }
 0x371   : > { %1696 = vbcast.lane.b32.xlu0 %v1694_v39, 256 }
 0x375   : > { %1703 = vbcast.lane.b32.xlu0 %v1701_v40, 256 }
 0x379   : > { %1710 = vbcast.lane.b32.xlu0 %v1708_v41, 256  ;;  %v4226_v41 = vadd.f32 1.0, %v1108_v30 }
 0x37b   : > { %5184 = vst [vmem:[#allocation35_spill] sm:$0xff] %v4226_v41 }
 0x37d   : > { %1717 = vbcast.lane.b32.xlu0 %v1715_v42, 256 }
 0x381   : > { %1724 = vbcast.lane.b32.xlu0 %v1722_v43, 256  ;;  %v1799_v43 = vrot.slane %v4199_v4, %v4114_v63 }
 0x385   : > { %1731 = vbcast.lane.b32.xlu0 %v1729_v46, 256 }
 0x389   : > { %v4187_v50 = vpop.xlane.xlu0 %539 }
 0x38a   : > { %v1065_v53 = vrot.slane %v4187_v50, %v4103_v56 }
 0x38b   : > { %v640_v58 = vpop.f32.mrb[4].mxu0 }
 0x38c   : > { %v4197_v60 = vmul.f32 %v1611_v52, %v1065_v53  ;;  %v3083_v61 = vpop.f32.mrb[5].mxu0  ;;  %v1107_v14 = vmul.f32 %v1065_v53, %v4176_v45  ;;  %v4207_v20 = vadd.f32 %v640_v58, %v640_v58  ;;  %v1806_v52 = vrot.slane %v4199_v4, %v4126_v7 }
 0x38d   : > { %v643_v3 = vpop.f32.mrb[6].mxu0  ;;  %v1813_v58 = vrot.slane %v4199_v4, %v4124_v6 }
 0x38e   : > { %v3084_v8 = vpop.f32.mrb[7].mxu0  ;;  %v1743_v9 = vrot.slane %v4197_v60, %v4114_v63  ;;  %v1736_v11 = vrot.slane %v4197_v60, %v4112_v62  ;;  %5179 = vst [vmem:[#allocation30_spill] sm:$0xff] %v4207_v20  ;;  %v1750_v32 = vrot.slane %v4197_v60, %v4126_v7  ;;  %v4218_v34 = vadd.f32 1.0, %v1107_v14 }
 0x38f   : > { %v689_v16 = vpop.f32.mrb[4].mxu1  ;;  %v1757_v46 = vrot.slane %v4197_v60, %v4124_v6  ;;  %v1764_v53 = vrot.slane %v4197_v60, %v4130_v10  ;;  %v1771_v59 = vrot.slane %v4197_v60, %v4135_v13  ;;  %v822_v61 = vrot.slane %v4207_v20, %v4114_v63 }
 0x390   : > { %v3089_v19 = vpop.f32.mrb[5].mxu1  ;;  %1745 = vbcast.lane.b32.xlu0 %v1743_v9, 256  ;;  %1738 = vbcast.lane.b32.xlu1 %v1736_v11, 256  ;;  %v4209_v25 = vadd.f32 %v689_v16, %v689_v16  ;;  %5182 = vst [vmem:[#allocation33_spill] sm:$0xff] %v4218_v34  ;;  %v815_v3 = vrot.slane %v4207_v20, %v4112_v62 }
 0x391   : > { %v692_v26 = vpop.f32.mrb[6].mxu1  ;;  %v829_v8 = vrot.slane %v4207_v20, %v4126_v7  ;;  %v864_v9 = vrot.slane %v4207_v20, %v4147_v24  ;;  %v836_v11 = vrot.slane %v4207_v20, %v4124_v6  ;;  %v843_v14 = vrot.slane %v4207_v20, %v4130_v10 }
 0x392   : > { %5180 = vst [vmem:[#allocation31_spill] sm:$0xff] %v4209_v25  ;;  %v3090_v31 = vpop.f32.mrb[7].mxu1  ;;  %v878_v12 = vrot.slane %v4209_v25, %v4114_v63  ;;  %v850_v19 = vrot.slane %v4207_v20, %v4135_v13  ;;  %v857_v30 = vrot.slane %v4207_v20, %v4140_v17 }
 0x393   : > { %v738_v35 = vpop.f32.mrb[8].mxu0 }
 0x394   : > { %v4220_v36 = vadd.f32 %v738_v35, %v738_v35  ;;  %1752 = vbcast.lane.b32.xlu1 %v1750_v32, 256  ;;  %1794 = vbcast.lane.b32.xlu0 %v1792_v29, 256  ;;  %v3095_v37 = vpop.f32.mrb[9].mxu0  ;;  %v871_v32 = vrot.slane %v4209_v25, %v4112_v62  ;;  %v885_v35 = vrot.slane %v4209_v25, %v4126_v7 }
 0x395   : > { %v741_v38 = vpop.f32.mrb[10].mxu0 }
 0x396   : > { %5183 = vst [vmem:[#allocation34_spill] sm:$0xff] %v4220_v36  ;;  %v3096_v42 = vpop.f32.mrb[11].mxu0  ;;  %v927_v16 = vrot.slane %v4220_v36, %v4112_v62  ;;  %v941_v26 = vrot.slane %v4220_v36, %v4126_v7  ;;  %v948_v31 = vrot.slane %v4220_v36, %v4124_v6  ;;  %v955_v29 = vrot.slane %v4220_v36, %v4130_v10 }
 0x397   : > { %v962_v37 = vrot.slane %v4220_v36, %v4135_v13  ;;  %v976_v18 = vrot.slane %v4220_v36, %v4147_v24 }
 0x398   : > { %1801 = vbcast.lane.b32.xlu1 %v1799_v43, 256  ;;  %1759 = vbcast.lane.b32.xlu0 %v1757_v46, 256  ;;  %v892_v43 = vrot.slane %v4209_v25, %v4124_v6  ;;  %v969_v46 = vrot.slane %v4220_v36, %v4140_v17 }
 0x39c   : > { %1808 = vbcast.lane.b32.xlu1 %v1806_v52, 256  ;;  %1766 = vbcast.lane.b32.xlu0 %v1764_v53, 256 }
 0x3a0   : > { %1815 = vbcast.lane.b32.xlu1 %v1813_v58, 256  ;;  %1773 = vbcast.lane.b32.xlu0 %v1771_v59, 256  ;;  %v4285_v58 = vadd.f32 1.0, %v4105_v57  ;;  %v899_v59 = vrot.slane %v4209_v25, %v4130_v10  ;;  %v1160_v57 = vrot.slane %v4095_v44, %v4112_v62 }
 0x3a4   : > { %824 = vbcast.lane.b32.xlu1 %v822_v61, 256  ;;  %817 = vbcast.lane.b32.xlu0 %v815_v3, 256  ;;  %v1778_v61 = vrot.slane %v4197_v60, %v4140_v17 }
 0x3a8   : > { %831 = vbcast.lane.b32.xlu1 %v829_v8, 256  ;;  %866 = vbcast.lane.b32.xlu0 %v864_v9, 256  ;;  %v1356_v9 = vrot.slane %v4101_v55, %v4112_v62 }
 0x3ac   : > { %838 = vbcast.lane.b32.xlu1 %v836_v11, 256  ;;  %880 = vbcast.lane.b32.xlu0 %v878_v12, 256 }
 0x3b0   : > { %845 = vbcast.lane.b32.xlu1 %v843_v14, 256  ;;  %929 = vbcast.lane.b32.xlu0 %v927_v16, 256  ;;  %v906_v16 = vrot.slane %v4209_v25, %v4135_v13 }
 0x3b4   : > { %852 = vbcast.lane.b32.xlu1 %v850_v19, 256  ;;  %943 = vbcast.lane.b32.xlu0 %v941_v26, 256  ;;  %v1785_v19 = vrot.slane %v4197_v60, %v4147_v24  ;;  %v1841_v60 = vrot.slane %v4199_v4, %v4147_v24 }
 0x3b8   : > { %859 = vbcast.lane.b32.xlu1 %v857_v30, 256  ;;  %950 = vbcast.lane.b32.xlu0 %v948_v31, 256 }
 0x3bc   : > { %873 = vbcast.lane.b32.xlu1 %v871_v32, 256  ;;  %957 = vbcast.lane.b32.xlu0 %v955_v29, 256 }
 0x3bf   : > { %v4274_v38 = vpop.permute.xlu0 %1633  ;;  %v1627_v42 = vpop.permute.xlu1 %1626 }
 0x3c0   : > { %887 = vbcast.lane.b32.xlu1 %v885_v35, 256  ;;  %964 = vbcast.lane.b32.xlu0 %v962_v37, 256  ;;  %v1368_v37 = vrot.slane %v4101_v55, %v4124_v6 }
 0x3c3   : > { %v4280_v52 = vpop.permute.xlu0 %1640  ;;  %v4282_v53 = vpop.permute.xlu1 %1647 }
 0x3c4   : > { %894 = vbcast.lane.b32.xlu1 %v892_v43, 256  ;;  %971 = vbcast.lane.b32.xlu0 %v969_v46, 256  ;;  %v913_v43 = vrot.slane %v4209_v25, %v4140_v17 }
 0x3c7   : > { %v762_v3 = vpop.permute.xlu0 %761  ;;  %v4291_v8 = vpop.permute.xlu1 %1654 }
 0x3c8   : > { %v1012_v11 = vsub.f32 %v4285_v58, %v762_v3  ;;  %901 = vbcast.lane.b32.xlu1 %v899_v59, 256  ;;  %1780 = vbcast.lane.b32.xlu0 %v1778_v61, 256 }
 0x3ca   : > { %v1121_v12 = vmul.f32 %v1012_v11, %v1012_v11  ;;  %v1513_v14 = vmul.f32 %v1356_v9, %v1012_v11 }
 0x3cb   : > { %v783_v26 = vpop.permute.xlu0 %782  ;;  %v4302_v30 = vpop.permute.xlu1 %1661 }
 0x3cc   : > { %v1317_v31 = vmul.f32 %v1160_v57, %v1121_v12  ;;  %v1545_v32 = vmul.f32 %v1513_v14, %v762_v3  ;;  %v1015_v29 = vsub.f32 %v4285_v58, %v783_v26  ;;  %908 = vbcast.lane.b32.xlu1 %v906_v16, 256  ;;  %1787 = vbcast.lane.b32.xlu0 %v1785_v19, 256 }
 0x3cd   : > { %v1172_v57 = vrot.slane %v4095_v44, %v4124_v6  ;;  %v920_v12 = vrot.slane %v4209_v25, %v4147_v24  ;;  %v1372_v16 = vrot.slane %v4101_v55, %v4130_v10 }
 0x3ce   : > { %v1577_v35 = vsub.f32 %v1317_v31, %v1545_v32  ;;  %v1124_v9 = vmul.f32 %v1015_v29, %v1015_v29  ;;  %v1516_v3 = vmul.f32 %v1368_v37, %v1015_v29 }
 0x3cf   : > { %v790_v46 = vpop.permute.xlu0 %789  ;;  %v4309_v59 = vpop.permute.xlu1 %1668 }
 0x3d0   : > { %v1877_v61 = vadd.f32 %v1627_v42, %v1577_v35  ;;  %915 = vbcast.lane.b32.xlu1 %v913_v43, 256  ;;  %v1016_v11 = vsub.f32 %v4285_v58, %v790_v46  ;;  %1843 = vbcast.lane.b32.xlu0 %v1841_v60, 256  ;;  %v1320_v42 = vmul.f32 %v1172_v57, %v1124_v9 }
 0x3d1   : > { %v1548_v32 = vmul.f32 %v1516_v3, %v783_v26  ;;  %v934_v43 = vrot.slane %v4220_v36, %v4114_v63  ;;  %v1176_v60 = vrot.slane %v4095_v44, %v4130_v10  ;;  %v1180_v9 = vrot.slane %v4095_v44, %v4135_v13 }
 0x3d2   : > { %v4318_v14 = vmax.f32 %v1877_v61, 0.0  ;;  %v1125_v29 = vmul.f32 %v1016_v11, %v1016_v11  ;;  %v1517_v35 = vmul.f32 %v1372_v16, %v1016_v11  ;;  %v1376_v26 = vrot.slane %v4101_v55, %v4135_v13 }
 0x3d3   : > { %v797_v19 = vpop.permute.xlu0 %796  ;;  %v4322_v31 = vpop.permute.xlu1 %1675  ;;  %v1580_v0 = vsub.f32 %v1320_v42, %v1548_v32  ;;  %v1360_v57 = vrot.slane %v4101_v55, %v4114_v63  ;;  %v1820_v42 = vrot.slane %v4199_v4, %v4130_v10  ;;  %v1380_v32 = vrot.slane %v4101_v55, %v4140_v17 }
 0x3d4   : > { %922 = vbcast.lane.b32.xlu1 %v920_v12, 256  ;;  %v1017_v37 = vsub.f32 %v4285_v58, %v797_v19  ;;  %3275 = vrsqrt.f32 %v4318_v14  ;;  %v1321_v3 = vmul.f32 %v1176_v60, %v1125_v29  ;;  %v1549_v11 = vmul.f32 %v1517_v35, %v790_v46 }
 0x3d5   : > { %v1880_v5 = vadd.f32 %v4282_v53, %v1580_v0  ;;  %vm1943_vm3 = vcmp.eq.f32.partialorder %v4318_v14, inf  ;;  %vm1945_vm4 = vcmp.eq.f32.partialorder %v4318_v14, 0.0 }
 0x3d6   : > { %v1126_v16 = vmul.f32 %v1017_v37, %v1017_v37  ;;  %v1518_v40 = vmul.f32 %v1376_v26, %v1017_v37  ;;  %v1168_v37 = vrot.slane %v4095_v44, %v4126_v7  ;;  %v1364_v26 = vrot.slane %v4101_v55, %v4126_v7 }
 0x3d7   : > { %v804_v61 = vpop.permute.xlu0 %803  ;;  %v769_v51 = vpop.permute.xlu1 %768  ;;  %v1581_v41 = vsub.f32 %v1321_v3, %v1549_v11  ;;  %v1384_v3 = vrot.slane %v4101_v55, %v4147_v24 }
 0x3d8   : > { %936 = vbcast.lane.b32.xlu1 %v934_v43, 256  ;;  %v1013_v12 = vsub.f32 %v4285_v58, %v769_v51  ;;  %v1018_v39 = vsub.f32 %v4285_v58, %v804_v61  ;;  %v1164_v43 = vrot.slane %v4095_v44, %v4114_v63 }
 0x3da   : > { %v1122_v29 = vmul.f32 %v1013_v12, %v1013_v12  ;;  %v1514_v46 = vmul.f32 %v1360_v57, %v1013_v12  ;;  %v1322_v57 = vmul.f32 %v1180_v9, %v1126_v16  ;;  %v1550_v12 = vmul.f32 %v1518_v40, %v797_v19 }
 0x3db   : > { %v811_v35 = vpop.permute.xlu0 %810  ;;  %v776_v60 = vpop.permute.xlu1 %775  ;;  %v1127_v34 = vmul.f32 %v1018_v39, %v1018_v39  ;;  %v1519_v20 = vmul.f32 %v1380_v32, %v1018_v39  ;;  %v4361_v19 = vmax.f32 %v1880_v5, 0.0  ;;  %v1188_v5 = vrot.slane %v4095_v44, %v4147_v24 }
 0x3dc   : > { %1822 = vbcast.lane.b32.xlu1 %v1820_v42, 256  ;;  %v1318_v21 = vmul.f32 %v1164_v43, %v1122_v29  ;;  %v1546_v22 = vmul.f32 %v1514_v46, %v769_v51  ;;  %v1014_v25 = vsub.f32 %v4285_v58, %v776_v60  ;;  %v1019_v53 = vsub.f32 %v4285_v58, %v811_v35 }
 0x3dd   : > { %v1184_v42 = vrot.slane %v4095_v44, %v4140_v17  ;;  %v1827_v51 = vrot.slane %v4199_v4, %v4135_v13  ;;  %v1582_v58 = vsub.f32 %v1322_v57, %v1550_v12  ;;  %v1551_v11 = vmul.f32 %v1519_v20, %v804_v61 }
 0x3de   : > { %v1578_v0 = vsub.f32 %v1318_v21, %v1546_v22  ;;  %v1123_v33 = vmul.f32 %v1014_v25, %v1014_v25  ;;  %v1515_v1 = vmul.f32 %v1364_v26, %v1014_v25  ;;  %v3276_v40 = vpop.eup %3275  ;;  %v1881_v25 = vadd.f32 %v4291_v8, %v1581_v41 }
 0x3df   : > { %v4353_v2 = vpop.permute.xlu0 %1689  ;;  %v1323_v9 = vmul.f32 %v1184_v42, %v1127_v34  ;;  %v1128_v32 = vmul.f32 %v1019_v53, %v1019_v53  ;;  %v1520_v43 = vmul.f32 %v1384_v3, %v1019_v53  ;;  %v1942_v29 = vmul.f32 %v3276_v40, %v4318_v14 }
 0x3e0   : > { %978 = vbcast.lane.b32.xlu1 %v976_v18, 256  ;;  %v1878_v21 = vadd.f32 %v4274_v38, %v1578_v0  ;;  %v1319_v22 = vmul.f32 %v1168_v37, %v1123_v33  ;;  %v1547_v39 = vmul.f32 %v1515_v1, %v776_v60  ;;  %v1834_v1 = vrot.slane %v4199_v4, %v4140_v17 }
 0x3e1   : > { %v4373_v34 = vmax.f32 %v1881_v25, 0.0  ;;  %v1882_v20 = vadd.f32 %v4302_v30, %v1582_v58  ;;  %v1583_v41 = vsub.f32 %v1323_v9, %v1551_v11  ;;  %v1324_v38 = vmul.f32 %v1188_v5, %v1128_v32 }
 0x3e2   : > { %v1910_v16 = vmax.f32 %v1878_v21, 0.0  ;;  %v1579_v55 = vsub.f32 %v1319_v22, %v1547_v39  ;;  %v1552_v8 = vmul.f32 %v1520_v43, %v811_v35  ;;  %v1944_v44 = vsel %vm1943_vm3, %v4318_v14, %v1942_v29 }
 0x3e3   : > { %v4365_v18 = vpop.permute.xlu0 %1696  ;;  %v1946_v4 = vand.u32 2147483648, %v4318_v14  ;;  %v1883_v30 = vadd.f32 %v4309_v59, %v1583_v41  ;;  %vm1964_vm9 = vcmp.eq.f32.partialorder %v4361_v19, inf  ;;  %v1967_v43 = vand.u32 2147483648, %v4361_v19 }
 0x3e4   : > { %1829 = vbcast.lane.b32.xlu1 %v1827_v51, 256  ;;  %v1879_v33 = vadd.f32 %v4280_v52, %v1579_v55  ;;  %3277 = vrsqrt.f32 %v1910_v16  ;;  %v1914_v52 = vmax.f32 %v1882_v20, 0.0  ;;  %v1584_v60 = vsub.f32 %v1324_v38, %v1552_v8  ;;  %v4404_v20 = vpop.permute.xlu1 %1682 }
 0x3e5   : > { %3279 = vrsqrt.f32 %v4361_v19  ;;  %v1947_v37 = vsel %vm1945_vm4, %v1946_v4, %v1944_v44  ;;  %v4387_v57 = vmax.f32 %v1883_v30, 0.0  ;;  %vm1950_vm5 = vcmp.eq.f32.partialorder %v1910_v16, inf }
 0x3e6   : > { %v1911_v61 = vmax.f32 %v1879_v33, 0.0  ;;  %v1884_v12 = vadd.f32 %v4322_v31, %v1584_v60  ;;  %v1953_v14 = vand.u32 2147483648, %v1910_v16  ;;  %vm1952_vm6 = vcmp.eq.f32.partialorder %v1910_v16, 0.0 }
 0x3e7   : > { %v4378_v46 = vpop.permute.xlu0 %1703  ;;  %vm1966_vm10 = vcmp.eq.f32.partialorder %v4361_v19, 0.0  ;;  %vm1971_vm11 = vcmp.eq.f32.partialorder %v4373_v34, inf  ;;  %vm1973_vm12 = vcmp.eq.f32.partialorder %v4373_v34, 0.0  ;;  %vm1978_vm13 = vcmp.eq.f32.partialorder %v1914_v52, inf }
 0x3e8   : > { %1836 = vbcast.lane.b32.xlu1 %v1834_v1, 256  ;;  %3281 = vrsqrt.f32 %v1911_v61  ;;  %v1916_v51 = vmax.f32 %v1884_v12, 0.0  ;;  %vm1957_vm7 = vcmp.eq.f32.partialorder %v1911_v61, inf  ;;  %v1960_v31 = vand.u32 2147483648, %v1911_v61 }
 0x3e9   : > { %3283 = vrsqrt.f32 %v4373_v34  ;;  %vm1959_vm8 = vcmp.eq.f32.partialorder %v1911_v61, 0.0  ;;  %v1974_v1 = vand.u32 2147483648, %v4373_v34  ;;  %v1981_v44 = vand.u32 2147483648, %v1914_v52 }
 0x3ea   : > { %3285 = vrsqrt.f32 %v1914_v52  ;;  %vm1980_vm14 = vcmp.eq.f32.partialorder %v1914_v52, 0.0  ;;  %vm1985_vm15 = vcmp.eq.f32.partialorder %v4387_v57, inf  ;;  %vm1987_vm3 = vcmp.eq.f32.partialorder %v4387_v57, 0.0 }
 0x3eb   : > { %v4385_v26 = vpop.permute.xlu0 %1710  ;;  %3287 = vrsqrt.f32 %v4387_v57  ;;  %vm1992_vm4 = vcmp.eq.f32.partialorder %v1916_v51, inf }
 0x3ec   : > { %2198 = vperm.xlu1 %3267, %v1947_v37   ;;  %3289 = vrsqrt.f32 %v1916_v51 }
 0x3ee   : > { %v3278_v35 = vpop.eup %3277 }
 0x3ef   : > { %v3280_v0 = vpop.eup %3279  ;;  %v1949_v53 = vmul.f32 %v3278_v35, %v1910_v16  ;;  %v4390_v42 = vpop.permute.xlu0 %1717  ;;  %v1988_v35 = vand.u32 2147483648, %v4387_v57 }
 0x3f0   : > { %v1963_v39 = vmul.f32 %v3280_v0, %v4361_v19 }
 0x3f1   : > { %v1951_v3 = vsel %vm1950_vm5, %v1910_v16, %v1949_v53  ;;  %vm1994_vm5 = vcmp.eq.f32.partialorder %v1916_v51, 0.0 }
 0x3f2   : > { %v3282_v59 = vpop.eup %3281  ;;  %v1954_v40 = vsel %vm1952_vm6, %v1953_v14, %v1951_v3  ;;  %v1965_v11 = vsel %vm1964_vm9, %v4361_v19, %v1963_v39 }
 0x3f3   : > { %v3284_v21 = vpop.eup %3283  ;;  %2201 = vperm.xlu0 %3268, %v1954_v40   ;;  %v1956_v22 = vmul.f32 %v3282_v59, %v1911_v61  ;;  %v4395_v9 = vpop.permute.xlu0 %1724  ;;  %v1968_v55 = vsel %vm1966_vm10, %v1967_v43, %v1965_v11  ;;  %v1200_v11 = vrot.slane %v4098_v54, %v4126_v7  ;;  %v1416_v43 = vrot.slane %v4155_v28, %v4147_v24 }
 0x3f4   : > { %v1970_v16 = vmul.f32 %v3284_v21, %v4373_v34  ;;  %v3286_v32 = vpop.eup %3285 }
 0x3f5   : > { %v1958_v25 = vsel %vm1957_vm7, %v1911_v61, %v1956_v22  ;;  %v1977_v5 = vmul.f32 %v3286_v32, %v1914_v52  ;;  %v3288_v33 = vpop.eup %3287 }
 0x3f6   : > { %v1961_v58 = vsel %vm1959_vm8, %v1960_v31, %v1958_v25  ;;  %v1972_v29 = vsel %vm1971_vm11, %v4373_v34, %v1970_v16  ;;  %v1984_v8 = vmul.f32 %v3288_v33, %v4387_v57  ;;  %v3290_v61 = vpop.eup %3289  ;;  %v1392_v25 = vrot.slane %v4155_v28, %v4114_v63 }
 0x3f7   : > { %2204 = vperm.xlu1 %3267, %v1961_v58   ;;  %v4406_v41 = vpop.permute.xlu0 %1731  ;;  %v1975_v38 = vsel %vm1973_vm12, %v1974_v1, %v1972_v29  ;;  %v1979_v19 = vsel %vm1978_vm13, %v1914_v52, %v1977_v5  ;;  %v1991_v34 = vmul.f32 %v3290_v61, %v1916_v51  ;;  %v1995_v52 = vand.u32 2147483648, %v1916_v51 }
 0x3f8   : > { %v1982_v60 = vsel %vm1980_vm14, %v1981_v44, %v1979_v19  ;;  %v1986_v37 = vsel %vm1985_vm15, %v4387_v57, %v1984_v8  ;;  %v1196_v57 = vrot.slane %v4098_v54, %v4114_v63  ;;  %v1192_v58 = vrot.slane %v4098_v54, %v4112_v62 }
 0x3f9   : > { %v1989_v53 = vsel %vm1987_vm3, %v1988_v35, %v1986_v37  ;;  %v1993_v14 = vsel %vm1992_vm4, %v1916_v51, %v1991_v34  ;;  %v1388_v51 = vrot.slane %v4155_v28, %v4112_v62  ;;  %v1396_v16 = vrot.slane %v4155_v28, %v4126_v7 }
 0x3fa   : > { %v1996_v40 = vsel %vm1994_vm5, %v1995_v52, %v1993_v14  ;;  %v4453_v29 = vadd.f32 1.0, %v4152_v27  ;;  %v1400_v5 = vrot.slane %v4155_v28, %v4124_v6  ;;  %v1452_v35 = vrot.slane %v4185_v49, %v4112_v62 }
 0x3fb   : > { %2207 = vperm.xlu1 %3267, %v1968_v55   ;;  %v4516_v14 = vadd.f32 1.0, %v4182_v48  ;;  %v5185_v48 = vrot.slane %v4098_v54, %v4124_v6 }
 0x3ff   : > { %2210 = vperm.xlu1 %3267, %v1975_v38  }
 0x402   : > { %v4410_v4 = vpop.permute.xlu0 %1745  ;;  %v4412_v30 = vpop.permute.xlu1 %1738 }
 0x403   : > { %2213 = vperm.xlu1 %3267, %v1982_v60  }
 0x406   : > { %v4417_v12 = vpop.permute.xlu0 %1794  ;;  %v4419_v0 = vpop.permute.xlu1 %1752 }
 0x407   : > { %2216 = vperm.xlu1 %3267, %v1989_v53  }
 0x40a   : > { %v4422_v3 = vpop.permute.xlu0 %1759  ;;  %v4424_v59 = vpop.permute.xlu1 %1801 }
 0x40b   : > { %2219 = vperm.xlu1 %3267, %v1996_v40  }
 0x40e   : > { %v4426_v21 = vpop.permute.xlu0 %1766  ;;  %v4428_v22 = vpop.permute.xlu1 %1808 }
 0x412   : > { %v4430_v39 = vpop.permute.xlu0 %1773  ;;  %v4432_v31 = vpop.permute.xlu1 %1815 }
 0x416   : > { %v825_v38 = vpop.permute.xlu1 %824  ;;  %v818_v19 = vpop.permute.xlu0 %817 }
 0x417   : > { %v1021_v60 = vsub.f32 %v4453_v29, %v825_v38  ;;  %v1020_v37 = vsub.f32 %v4453_v29, %v818_v19 }
 0x419   : > { %v1130_v27 = vmul.f32 %v1021_v60, %v1021_v60  ;;  %v1522_v44 = vmul.f32 %v1392_v25, %v1021_v60  ;;  %v1129_v8 = vmul.f32 %v1020_v37, %v1020_v37  ;;  %v1521_v61 = vmul.f32 %v1388_v51, %v1020_v37 }
 0x41a   : > { %v832_v34 = vpop.permute.xlu1 %831  ;;  %v867_v33 = vpop.permute.xlu0 %866 }
 0x41b   : > { %v1326_v1 = vmul.f32 %v1196_v57, %v1130_v27  ;;  %v1554_v40 = vmul.f32 %v1522_v44, %v825_v38  ;;  %v1325_v32 = vmul.f32 %v1192_v58, %v1129_v8  ;;  %v1553_v25 = vmul.f32 %v1521_v61, %v818_v19 }
 0x41c   : > { %v1022_v51 = vsub.f32 %v4453_v29, %v832_v34  ;;  %v1027_v60 = vsub.f32 %v4453_v29, %v867_v33 }
 0x41d   : > { %v1586_v55 = vsub.f32 %v1326_v1, %v1554_v40  ;;  %v1585_v36 = vsub.f32 %v1325_v32, %v1553_v25  ;;  %v4508_v1 = vadd.f32 1.0, %v4187_v50  ;;  %v1228_v50 = vrot.slane %v4176_v45, %v4114_v63 }
 0x41e   : > { %v1131_v58 = vmul.f32 %v1022_v51, %v1022_v51  ;;  %v1523_v38 = vmul.f32 %v1396_v16, %v1022_v51  ;;  %v839_v19 = vpop.permute.xlu1 %838  ;;  %v4501_v8 = vpop.permute.xlu0 %880  ;;  %v1136_v44 = vmul.f32 %v1027_v60, %v1027_v60  ;;  %v1528_v52 = vmul.f32 %v1416_v43, %v1027_v60 }
 0x41f   : > { %v4511_v32 = vadd.f32 %v4353_v2, %v1586_v55  ;;  %v1023_v40 = vsub.f32 %v4453_v29, %v839_v19  ;;  %v1885_v16 = vadd.f32 %v4404_v20, %v1585_v36  ;;  %v1424_v2 = vrot.slane %v4180_v47, %v4114_v63 }
 0x420   : > { %v1327_v25 = vmul.f32 %v1200_v11, %v1131_v58  ;;  %v1555_v51 = vmul.f32 %v1523_v38, %v832_v34  ;;  %v1029_v55 = vsub.f32 %v4508_v1, %v4501_v8  ;;  %v5186_v38 = vrot.slane %v4098_v54, %v4147_v24 }
 0x421   : > { %v1132_v61 = vmul.f32 %v1023_v40, %v1023_v40  ;;  %v1524_v57 = vmul.f32 %v1400_v5, %v1023_v40  ;;  %v4531_v60 = vmax.f32 %v1885_v16, 0.0  ;;  %v1420_v16 = vrot.slane %v4180_v47, %v4112_v62 }
 0x422   : > { %v1587_v27 = vsub.f32 %v1327_v25, %v1555_v51  ;;  %v846_v53 = vpop.permute.xlu1 %845  ;;  %v930_v36 = vpop.permute.xlu0 %929  ;;  %v1332_v40 = vmul.f32 %v5186_v38, %v1136_v44  ;;  %v1560_v25 = vmul.f32 %v1528_v52, %v867_v33  ;;  %v5188_v52 = vrot.slane %v4098_v54, %v4130_v10 }
 0x423   : > { %v1328_v11 = vmul.f32 %v5185_v48, %v1132_v61  ;;  %v1556_v43 = vmul.f32 %v1524_v57, %v839_v19  ;;  %v1024_v5 = vsub.f32 %v4453_v29, %v846_v53  ;;  %v1036_v34 = vsub.f32 %v4516_v14, %v930_v36 }
 0x424   : > { %v4534_v58 = vadd.f32 %v4365_v18, %v1587_v27  ;;  %v5187_v61 = vrot.slane %v4155_v28, %v4130_v10  ;;  %v1592_v18 = vsub.f32 %v1332_v40, %v1560_v25  ;;  %3291 = vrsqrt.f32 %v4531_v60 }
 0x425   : > { %v1588_v51 = vsub.f32 %v1328_v11, %v1556_v43  ;;  %v1133_v37 = vmul.f32 %v1024_v5, %v1024_v5  ;;  %v1145_v19 = vmul.f32 %v1036_v34, %v1036_v34  ;;  %v1537_v48 = vmul.f32 %v1452_v35, %v1036_v34 }
 0x426   : > { %v1525_v57 = vmul.f32 %v5187_v61, %v1024_v5  ;;  %v853_v20 = vpop.permute.xlu1 %852  ;;  %v944_v56 = vpop.permute.xlu0 %943  ;;  %v5189_v35 = vrot.slane %v4145_v23, %v4112_v62  ;;  %v1530_v27 = vmul.f32 %v1424_v2, %v1029_v55  ;;  %v5191_v40 = vrot.slane %v4185_v49, %v4126_v7 }
 0x427   : > { %v4549_v33 = vadd.f32 %v4378_v46, %v1588_v51  ;;  %v1329_v44 = vmul.f32 %v5188_v52, %v1133_v37  ;;  %v1569_v5 = vmul.f32 %v1537_v48, %v930_v36  ;;  %v1025_v34 = vsub.f32 %v4453_v29, %v853_v20 }
 0x428   : > { %v1557_v11 = vmul.f32 %v1525_v57, %v846_v53  ;;  %v1341_v43 = vmul.f32 %v5189_v35, %v1145_v19  ;;  %v1038_v38 = vsub.f32 %v4516_v14, %v944_v56  ;;  %v1138_v46 = vmul.f32 %v1029_v55, %v1029_v55 }
 0x429   : > { %v1134_v53 = vmul.f32 %v1025_v34, %v1025_v34  ;;  %v5190_v57 = vrot.slane %v4155_v28, %v4135_v13  ;;  %v5192_v55 = vrot.slane %v4098_v54, %v4135_v13  ;;  %vm1999_vm6 = vcmp.eq.f32.partialorder %v4531_v60, inf }
 0x42a   : > { %v1589_v51 = vsub.f32 %v1329_v44, %v1557_v11  ;;  %v1601_v37 = vsub.f32 %v1341_v43, %v1569_v5  ;;  %v860_v36 = vpop.permute.xlu1 %859  ;;  %v951_v48 = vpop.permute.xlu0 %950  ;;  %v1147_v35 = vmul.f32 %v1038_v38, %v1038_v38  ;;  %v1539_v25 = vmul.f32 %v5191_v40, %v1038_v38 }
 0x42b   : > { %v1526_v19 = vmul.f32 %v5190_v57, %v1025_v34  ;;  %v1026_v44 = vsub.f32 %v4453_v29, %v860_v36  ;;  %v1330_v11 = vmul.f32 %v5192_v55, %v1134_v53  ;;  %v1039_v5 = vsub.f32 %v4516_v14, %v951_v48 }
 0x42c   : > { %v4566_v52 = vadd.f32 %v4385_v26, %v1589_v51  ;;  %v4573_v2 = vadd.f32 %v4417_v12, %v1601_v37  ;;  %v1334_v34 = vmul.f32 %v1228_v50, %v1138_v46  ;;  %v5193_v26 = vrot.slane %v4145_v23, %v4126_v7 }
 0x42d   : > { %v1558_v43 = vmul.f32 %v1526_v19, %v853_v20  ;;  %v1571_v57 = vmul.f32 %v1539_v25, %v944_v56  ;;  %v1135_v61 = vmul.f32 %v1026_v44, %v1026_v44  ;;  %v1562_v38 = vmul.f32 %v1530_v27, %v4501_v8 }
 0x42e   : > { %v1343_v51 = vmul.f32 %v5193_v26, %v1147_v35  ;;  %v5194_v12 = vrot.slane %v4155_v28, %v4140_v17  ;;  %v1148_v40 = vmul.f32 %v1039_v5, %v1039_v5  ;;  %v874_v15 = vpop.permute.xlu1 %873  ;;  %v5195_v20 = vrot.slane %v4098_v54, %v4140_v17 }
 0x42f   : > { %v1590_v29 = vsub.f32 %v1330_v11, %v1558_v43  ;;  %v5196_v46 = vrot.slane %v4185_v49, %v4124_v6  ;;  %v1028_v56 = vsub.f32 %v4508_v1, %v874_v15  ;;  %v1892_v8 = vadd.f32 %v4406_v41, %v1592_v18  ;;  %v3292_v18 = vpop.eup %3291 }
 0x430   : > { %v1527_v37 = vmul.f32 %v5194_v12, %v1026_v44  ;;  %v1603_v53 = vsub.f32 %v1343_v51, %v1571_v57  ;;  %v1331_v50 = vmul.f32 %v5195_v20, %v1135_v61  ;;  %v5197_v28 = vrot.slane %v4145_v23, %v4124_v6 }
 0x431   : > { %v1540_v19 = vmul.f32 %v5196_v46, %v1039_v5  ;;  %v1890_v27 = vadd.f32 %v4390_v42, %v1590_v29  ;;  %v1137_v54 = vmul.f32 %v1028_v56, %v1028_v56  ;;  %v1529_v61 = vmul.f32 %v1420_v16, %v1028_v56 }
 0x432   : > { %v1559_v35 = vmul.f32 %v1527_v37, %v860_v36  ;;  %v1344_v25 = vmul.f32 %v5197_v28, %v1148_v40  ;;  %v1903_v44 = vadd.f32 %v4428_v22, %v1603_v53  ;;  %v888_v43 = vpop.permute.xlu1 %887  ;;  %v1432_v5 = vrot.slane %v4180_v47, %v4124_v6 }
 0x433   : > { %v1572_v55 = vmul.f32 %v1540_v19, %v951_v48  ;;  %v1240_v41 = vrot.slane %v4176_v45, %v4130_v10  ;;  %v1436_v42 = vrot.slane %v4180_v47, %v4130_v10  ;;  %v4606_v36 = vmax.f32 %v4511_v32, 0.0  ;;  %v958_v48 = vpop.permute.xlu0 %957 }
 0x434   : > { %v1591_v11 = vsub.f32 %v1331_v50, %v1559_v35  ;;  %v1594_v26 = vsub.f32 %v1334_v34, %v1562_v38  ;;  %v1244_v16 = vrot.slane %v4176_v45, %v4135_v13  ;;  %v4610_v51 = vmax.f32 %v1892_v8, 0.0 }
 0x435   : > { %v1604_v22 = vsub.f32 %v1344_v25, %v1572_v55  ;;  %v1998_v29 = vmul.f32 %v3292_v18, %v4531_v60  ;;  %v5198_v32 = vrot.slane %v4176_v45, %v4112_v62  ;;  %v1561_v38 = vmul.f32 %v1529_v61, %v874_v15 }
 0x436   : > { %v1891_v57 = vadd.f32 %v4395_v9, %v1591_v11  ;;  %v2002_v37 = vand.u32 2147483648, %v4531_v60  ;;  %v1040_v40 = vsub.f32 %v4516_v14, %v958_v48  ;;  %v1030_v53 = vsub.f32 %v4508_v1, %v888_v43  ;;  %v895_v20 = vpop.permute.xlu1 %894 }
 0x437   : > { %v4616_v12 = vadd.f32 %v4432_v31, %v1604_v22  ;;  %v1333_v34 = vmul.f32 %v5198_v32, %v1137_v54  ;;  %v2000_v9 = vsel %vm1999_vm6, %v4531_v60, %v1998_v29  ;;  %vm2001_vm7 = vcmp.eq.f32.partialorder %v4531_v60, 0.0 }
 0x438   : > { %v1894_v50 = vadd.f32 %v4410_v4, %v1594_v26  ;;  %v2003_v31 = vsel %vm2001_vm7, %v2002_v37, %v2000_v9  ;;  %3293 = vrsqrt.f32 %v4606_v36  ;;  %v1440_v62 = vrot.slane %v4180_v47, %v4135_v13 }
 0x439   : > { %v4631_v15 = vmax.f32 %v4534_v58, 0.0  ;;  %2222 = vperm.xlu1 %3267, %v2003_v31   ;;  %v1248_v46 = vrot.slane %v4176_v45, %v4140_v17  ;;  %v1444_v19 = vrot.slane %v4180_v47, %v4140_v17  ;;  %v1252_v60 = vrot.slane %v4176_v45, %v4147_v24 }
 0x43a   : > { %v4640_v4 = vmax.f32 %v4549_v33, 0.0  ;;  %v1593_v56 = vsub.f32 %v1333_v34, %v1561_v38  ;;  %v1031_v8 = vsub.f32 %v4508_v1, %v895_v20  ;;  %v1448_v58 = vrot.slane %v4180_v47, %v4147_v24  ;;  %v902_v61 = vpop.permute.xlu1 %901  ;;  %v4664_v34 = vpop.permute.xlu0 %964 }
 0x43b   : > { %v5199_v35 = vrot.slane %v4185_v49, %v4130_v10  ;;  %v1139_v25 = vmul.f32 %v1030_v53, %v1030_v53  ;;  %v5200_v55 = vrot.slane %v4180_v47, %v4126_v7  ;;  %3295 = vrsqrt.f32 %v4610_v51 }
 0x43c   : > { %v4652_v33 = vmax.f32 %v1894_v50, 0.0  ;;  %v4655_v11 = vmax.f32 %v4566_v52, 0.0  ;;  %v1140_v18 = vmul.f32 %v1031_v8, %v1031_v8  ;;  %v1532_v26 = vmul.f32 %v1432_v5, %v1031_v8 }
 0x43d   : > { %v1541_v28 = vmul.f32 %v5199_v35, %v1040_v40  ;;  %v1531_v54 = vmul.f32 %v5200_v55, %v1030_v53  ;;  %v4658_v22 = vmax.f32 %v4573_v2, 0.0  ;;  %v4660_v29 = vmax.f32 %v1890_v27, 0.0 }
 0x43e   : > { %v4662_v32 = vmul.f32 %v1040_v40, %v1040_v40  ;;  %3297 = vrsqrt.f32 %v4631_v15  ;;  %v4667_v38 = vmax.f32 %v1903_v44, 0.0  ;;  %v1893_v37 = vadd.f32 %v4412_v30, %v1593_v56  ;;  %v909_v31 = vpop.permute.xlu1 %908 }
 0x43f   : > { %v5201_v52 = vrot.slane %v4176_v45, %v4124_v6  ;;  %v1564_v5 = vmul.f32 %v1532_v26, %v895_v20  ;;  %v4673_v9 = vmul.f32 %v1541_v28, %v958_v48  ;;  %v5202_v2 = vrot.slane %v4176_v45, %v4126_v7 }
 0x440   : > { %v1563_v40 = vmul.f32 %v1531_v54, %v888_v43  ;;  %v1032_v50 = vsub.f32 %v4508_v1, %v902_v61  ;;  %v4679_v8 = vmax.f32 %v1891_v57, 0.0  ;;  %v1041_v30 = vsub.f32 %v4516_v14, %v4664_v34 }
 0x441   : > { %v1336_v53 = vmul.f32 %v5201_v52, %v1140_v18  ;;  %v1335_v27 = vmul.f32 %v5202_v2, %v1139_v25  ;;  %3299 = vrsqrt.f32 %v4652_v33  ;;  %vm2006_vm8 = vcmp.eq.f32.partialorder %v4606_v36, inf }
 0x442   : > { %vm2008_vm9 = vcmp.eq.f32.partialorder %v4606_v36, 0.0  ;;  %v1141_v6 = vmul.f32 %v1032_v50, %v1032_v50  ;;  %v1533_v7 = vmul.f32 %v1436_v42, %v1032_v50  ;;  %v3294_v43 = vpop.eup %3293  ;;  %v4689_v48 = vmax.f32 %v1893_v37, 0.0  ;;  %v916_v55 = vpop.permute.xlu1 %915 }
 0x443   : > { %v1596_v44 = vsub.f32 %v1336_v53, %v1564_v5  ;;  %v2009_v57 = vand.u32 2147483648, %v4606_v36  ;;  %3301 = vrsqrt.f32 %v4640_v4  ;;  %v1595_v56 = vsub.f32 %v1335_v27, %v1563_v40 }
 0x444   : > { %v2005_v35 = vmul.f32 %v3294_v43, %v4606_v36  ;;  %v1337_v28 = vmul.f32 %v1240_v41, %v1141_v6  ;;  %v1565_v25 = vmul.f32 %v1533_v7, %v902_v61  ;;  %v4700_v42 = vmul.f32 %v1041_v30, %v1041_v30 }
 0x445   : > { %v4693_v20 = vadd.f32 %v4422_v3, %v1596_v44  ;;  %vm2048_vm10 = vcmp.eq.f32.partialorder %v4610_v51, inf  ;;  %vm2050_vm11 = vcmp.eq.f32.partialorder %v4610_v51, 0.0  ;;  %v1033_v3 = vsub.f32 %v4508_v1, %v909_v31  ;;  %v3296_v54 = vpop.eup %3295 }
 0x446   : > { %v2007_v18 = vsel %vm2006_vm8, %v4606_v36, %v2005_v35  ;;  %v5203_v26 = vrot.slane %v4185_v49, %v4135_v13  ;;  %v1597_v41 = vsub.f32 %v1337_v28, %v1565_v25  ;;  %3303 = vrsqrt.f32 %v4655_v11  ;;  %v4726_v36 = vpop.permute.xlu1 %922 }
 0x447   : > { %v2010_v61 = vsel %vm2008_vm9, %v2009_v57, %v2007_v18  ;;  %v2047_v52 = vmul.f32 %v3296_v54, %v4610_v51  ;;  %v1142_v53 = vmul.f32 %v1033_v3, %v1033_v3  ;;  %v1534_v5 = vmul.f32 %v1440_v62, %v1033_v3  ;;  %v4747_v18 = vpop.permute.xlu0 %971 }
 0x448   : > { %v4711_v37 = vmul.f32 %v5203_v26, %v1041_v30  ;;  %v3298_v2 = vpop.eup %3297  ;;  %2225 = vperm.xlu0 %3268, %v2010_v61   ;;  %v2051_v27 = vand.u32 2147483648, %v4610_v51  ;;  %vm2013_vm12 = vcmp.eq.f32.partialorder %v4631_v15, inf  ;;  %v4723_v40 = vadd.f32 %v4426_v21, %v1597_v41 }
 0x449   : > { %v1034_v50 = vsub.f32 %v4508_v1, %v916_v55  ;;  %v2049_v30 = vsel %vm2048_vm10, %v4610_v51, %v2047_v52  ;;  %v2012_v44 = vmul.f32 %v3298_v2, %v4631_v15  ;;  %v1338_v62 = vmul.f32 %v1244_v16, %v1142_v53 }
 0x44a   : > { %v1566_v6 = vmul.f32 %v1534_v5, %v909_v31  ;;  %v2052_v7 = vsel %vm2050_vm11, %v2051_v27, %v2049_v30  ;;  %vm2015_vm13 = vcmp.eq.f32.partialorder %v4631_v15, 0.0  ;;  %v2016_v21 = vand.u32 2147483648, %v4631_v15  ;;  %v937_v3 = vpop.permute.xlu1 %936 }
 0x44b   : > { %v1143_v43 = vmul.f32 %v1034_v50, %v1034_v50  ;;  %v3300_v57 = vpop.eup %3299  ;;  %2243 = vperm.xlu1 %3267, %v2052_v7   ;;  %v2014_v35 = vsel %vm2013_vm12, %v4631_v15, %v2012_v44  ;;  %v1535_v25 = vmul.f32 %v1444_v19, %v1034_v50  ;;  %3305 = vrsqrt.f32 %v4660_v29  ;;  %v1781_v47 = vpop.permute.xlu0 %1780 }
 0x44c   : > { %v1598_v28 = vsub.f32 %v1338_v62, %v1566_v6  ;;  %v1895_v16 = vadd.f32 %v4419_v0, %v1595_v56  ;;  %v2017_v51 = vsel %vm2015_vm13, %v2016_v21, %v2014_v35  ;;  %v2061_v31 = vmul.f32 %v3300_v57, %v4652_v33 }
 0x44d   : > { %vm2062_vm14 = vcmp.eq.f32.partialorder %v4652_v33, inf  ;;  %v3302_v54 = vpop.eup %3301  ;;  %2228 = vperm.xlu0 %3268, %v2017_v51   ;;  %vm2064_vm15 = vcmp.eq.f32.partialorder %v4652_v33, 0.0  ;;  %v2065_v15 = vand.u32 2147483648, %v4652_v33  ;;  %vm2020_vm3 = vcmp.eq.f32.partialorder %v4640_v4, inf }
 0x44e   : > { %v1898_v19 = vadd.f32 %v4430_v39, %v1598_v28  ;;  %v2063_v0 = vsel %vm2062_vm14, %v4652_v33, %v2061_v31  ;;  %v2019_v56 = vmul.f32 %v3302_v54, %v4640_v4  ;;  %v2023_v26 = vand.u32 2147483648, %v4640_v4 }
 0x44f   : > { %3307 = vrsqrt.f32 %v4679_v8  ;;  %v2066_v41 = vsel %vm2064_vm15, %v2065_v15, %v2063_v0  ;;  %v1339_v61 = vmul.f32 %v1248_v46, %v1143_v43  ;;  %v1567_v52 = vmul.f32 %v1535_v25, %v916_v55 }
 0x450   : > { %v1035_v53 = vsub.f32 %v4508_v1, %v4726_v36  ;;  %v3304_v5 = vpop.eup %3303  ;;  %v4762_v2 = vmax.f32 %v1895_v16, 0.0  ;;  %v1042_v39 = vsub.f32 %v4516_v14, %v4747_v18  ;;  %2249 = vperm.xlu1 %3267, %v2066_v41   ;;  %v2021_v33 = vsel %vm2020_vm3, %v4640_v4, %v2019_v56  ;;  %v4773_v1 = vpop.permute.xlu1 %1822 }
 0x451   : > { %vm2022_vm4 = vcmp.eq.f32.partialorder %v4640_v4, 0.0  ;;  %v4769_v27 = vmax.f32 %v4693_v20, 0.0  ;;  %v2026_v46 = vmul.f32 %v3304_v5, %v4655_v11  ;;  %vm2027_vm5 = vcmp.eq.f32.partialorder %v4655_v11, inf }
 0x452   : > { %v2024_v50 = vsel %vm2022_vm4, %v2023_v26, %v2021_v33  ;;  %vm2029_vm6 = vcmp.eq.f32.partialorder %v4655_v11, 0.0  ;;  %v2030_v55 = vand.u32 2147483648, %v4655_v11  ;;  %v1037_v30 = vsub.f32 %v4516_v14, %v937_v3 }
 0x453   : > { %2231 = vperm.xlu0 %3268, %v2024_v50   ;;  %3309 = vrsqrt.f32 %v4689_v48  ;;  %v2028_v4 = vsel %vm2027_vm5, %v4655_v11, %v2026_v46  ;;  %v1599_v20 = vsub.f32 %v1339_v61, %v1567_v52  ;;  %v1144_v44 = vmul.f32 %v1035_v53, %v1035_v53 }
 0x454   : > { %v1536_v62 = vmul.f32 %v1448_v58, %v1035_v53  ;;  %v4785_v6 = vmul.f32 %v4711_v37, %v4664_v34  ;;  %v2031_v7 = vsel %vm2029_vm6, %v2030_v55, %v2028_v4  ;;  %v1146_v21 = vmul.f32 %v1037_v30, %v1037_v30  ;;  %v979_v54 = vpop.permute.xlu1 %978 }
 0x455   : > { %v5204_v43 = vrot.slane %v4185_v49, %v4114_v63  ;;  %v3306_v35 = vpop.eup %3305  ;;  %v4790_v28 = vmul.f32 %v1042_v39, %v1042_v39  ;;  %v4793_v11 = vmax.f32 %v4723_v40, 0.0  ;;  %vm2034_vm7 = vcmp.eq.f32.partialorder %v4660_v29, inf }
 0x456   : > { %3311 = vrsqrt.f32 %v4762_v2  ;;  %v2033_v58 = vmul.f32 %v3306_v35, %v4660_v29  ;;  %v2037_v34 = vand.u32 2147483648, %v4660_v29  ;;  %v5205_v37 = vrot.slane %v4145_v23, %v4114_v63 }
 0x457   : > { %v1538_v57 = vmul.f32 %v5204_v43, %v1037_v30  ;;  %2234 = vperm.xlu0 %3268, %v2031_v7   ;;  %v1899_v51 = vadd.f32 %v1781_v47, %v1599_v20  ;;  %v1340_v40 = vmul.f32 %v1252_v60, %v1144_v44  ;;  %v1568_v31 = vmul.f32 %v1536_v62, %v4726_v36 }
 0x458   : > { %v1342_v25 = vmul.f32 %v5205_v37, %v1146_v21  ;;  %3313 = vrsqrt.f32 %v4769_v27  ;;  %v5206_v0 = vrot.slane %v4185_v49, %v4140_v17  ;;  %v4810_v26 = vmax.f32 %v1898_v19, 0.0 }
 0x459   : > { %v1570_v16 = vmul.f32 %v1538_v57, %v937_v3  ;;  %v3308_v15 = vpop.eup %3307  ;;  %v2035_v63 = vsel %vm2034_vm7, %v4660_v29, %v2033_v58  ;;  %vm2036_vm8 = vcmp.eq.f32.partialorder %v4660_v29, 0.0  ;;  %vm2041_vm9 = vcmp.eq.f32.partialorder %v4679_v8, inf }
 0x45a   : > { %v1543_v56 = vmul.f32 %v5206_v0, %v1042_v39  ;;  %v2038_v45 = vsel %vm2036_vm8, %v2037_v34, %v2035_v63  ;;  %v2040_v60 = vmul.f32 %v3308_v15, %v4679_v8  ;;  %v5207_v36 = vrot.slane %v4145_v23, %v4130_v10  ;;  %v1788_v39 = vpop.permute.xlu0 %1787 }
 0x45b   : > { %2237 = vperm.xlu0 %3268, %v2038_v45   ;;  %v2044_v19 = vand.u32 2147483648, %v4679_v8  ;;  %v1602_v41 = vsub.f32 %v1342_v25, %v1570_v16  ;;  %v1043_v61 = vsub.f32 %v4516_v14, %v979_v54  ;;  %3315 = vrsqrt.f32 %v4793_v11 }
 0x45c   : > { %v1345_v3 = vmul.f32 %v5207_v36, %v4662_v32  ;;  %v4825_v52 = vmax.f32 %v1899_v51, 0.0  ;;  %v1600_v29 = vsub.f32 %v1340_v40, %v1568_v31  ;;  %v2042_v53 = vsel %vm2041_vm9, %v4679_v8, %v2040_v60  ;;  %v1830_v51 = vpop.permute.xlu1 %1829 }
 0x45d   : > { %vm2043_vm10 = vcmp.eq.f32.partialorder %v4679_v8, 0.0  ;;  %v3310_v5 = vpop.eup %3309  ;;  %vm2055_vm11 = vcmp.eq.f32.partialorder %v4689_v48, inf  ;;  %v1152_v10 = vmul.f32 %v1043_v61, %v1043_v61  ;;  %v5208_v32 = vrot.slane %v4185_v49, %v4147_v24 }
 0x45e   : > { %v2045_v33 = vsel %vm2043_vm10, %v2044_v19, %v2042_v53  ;;  %v2054_v14 = vmul.f32 %v3310_v5, %v4689_v48  ;;  %vm2057_vm12 = vcmp.eq.f32.partialorder %v4689_v48, 0.0  ;;  %v2058_v46 = vand.u32 2147483648, %v4689_v48 }
 0x45f   : > { %v1544_v50 = vmul.f32 %v5208_v32, %v1043_v61  ;;  %v1605_v55 = vsub.f32 %v1345_v3, %v4673_v9  ;;  %2240 = vperm.xlu0 %3268, %v2045_v33   ;;  %v1902_v8 = vadd.f32 %v4424_v59, %v1602_v41  ;;  %v5209_v30 = vrot.slane %v4145_v23, %v4147_v24 }
 0x460   : > { %3317 = vrsqrt.f32 %v4810_v26  ;;  %v3312_v49 = vpop.eup %3311  ;;  %v1900_v44 = vadd.f32 %v1788_v39, %v1600_v29  ;;  %v2056_v62 = vsel %vm2055_vm11, %v4689_v48, %v2054_v14  ;;  %vm2069_vm13 = vcmp.eq.f32.partialorder %v4762_v2, inf  ;;  %v1844_v48 = vpop.permute.xlu0 %1843 }
 0x461   : > { %v1348_v4 = vmul.f32 %v5209_v30, %v1152_v10  ;;  %v1576_v20 = vmul.f32 %v1544_v50, %v979_v54  ;;  %v1905_v7 = vadd.f32 %v4773_v1, %v1605_v55  ;;  %v2059_v21 = vsel %vm2057_vm12, %v2058_v46, %v2056_v62  ;;  %v1837_v3 = vpop.permute.xlu1 %1836 }
 0x462   : > { %v2068_v9 = vmul.f32 %v3312_v49, %v4762_v2  ;;  %3319 = vrsqrt.f32 %v4825_v52  ;;  %v3314_v59 = vpop.eup %3313  ;;  %vm2071_vm14 = vcmp.eq.f32.partialorder %v4762_v2, 0.0  ;;  %v2072_v24 = vand.u32 2147483648, %v4762_v2 }
 0x463   : > { %v1608_v43 = vsub.f32 %v1348_v4, %v1576_v20  ;;  %vm2076_vm15 = vcmp.eq.f32.partialorder %v4769_v27, inf  ;;  %v2079_v57 = vand.u32 2147483648, %v4769_v27  ;;  %v4851_v35 = vmax.f32 %v1902_v8, 0.0  ;;  %2246 = vperm.xlu0 %3268, %v2059_v21  }
 0x464   : > { %v2070_v1 = vsel %vm2069_vm13, %v4762_v2, %v2068_v9  ;;  %v2075_v47 = vmul.f32 %v3314_v59, %v4769_v27  ;;  %v5210_v58 = vrot.slane %v4145_v23, %v4135_v13  ;;  %v4859_v37 = vmax.f32 %v1905_v7, 0.0 }
 0x465   : > { %v2073_v25 = vsel %vm2071_vm14, %v2072_v24, %v2070_v1  ;;  %v1908_v16 = vadd.f32 %v1844_v48, %v1608_v43  ;;  %3321 = vrsqrt.f32 %v4658_v22  ;;  %v3316_v40 = vpop.eup %3315  ;;  %v4863_v31 = vmax.f32 %v4616_v12, 0.0 }
 0x466   : > { %v1346_v34 = vmul.f32 %v5210_v58, %v4700_v42  ;;  %v4865_v54 = vmax.f32 %v1900_v44, 0.0  ;;  %v2077_v2 = vsel %vm2076_vm15, %v4769_v27, %v2075_v47  ;;  %vm2078_vm3 = vcmp.eq.f32.partialorder %v4769_v27, 0.0 }
 0x467   : > { %v1575_v13 = vmul.f32 %v1543_v56, %v4747_v18  ;;  %v2080_v42 = vsel %vm2078_vm3, %v2079_v57, %v2077_v2  ;;  %v2082_v15 = vmul.f32 %v3316_v40, %v4793_v11  ;;  %vm2083_vm4 = vcmp.eq.f32.partialorder %v4793_v11, inf  ;;  %2252 = vperm.xlu0 %3268, %v2073_v25  }
 0x468   : > { %2255 = vperm.xlu1 %3267, %v2080_v42   ;;  %v2086_v12 = vand.u32 2147483648, %v4793_v11  ;;  %v1606_v0 = vsub.f32 %v1346_v34, %v4785_v6  ;;  %v5211_v63 = vrot.slane %v4145_v23, %v4140_v17  ;;  %3323 = vrsqrt.f32 %v4851_v35 }
 0x469   : > { %3325 = vrsqrt.f32 %v4859_v37  ;;  %v4882_v18 = vmax.f32 %v1908_v16, 0.0  ;;  %v2084_v27 = vsel %vm2083_vm4, %v4793_v11, %v2082_v15  ;;  %vm2085_vm5 = vcmp.eq.f32.partialorder %v4793_v11, 0.0 }
 0x46a   : > { %v1347_v45 = vmul.f32 %v5211_v63, %v4790_v28  ;;  %v3318_v56 = vpop.eup %3317  ;;  %v2087_v60 = vsel %vm2085_vm5, %v2086_v12, %v2084_v27  ;;  %v1906_v36 = vadd.f32 %v1830_v51, %v1606_v0  ;;  %3327 = vrsqrt.f32 %v4865_v54 }
 0x46b   : > { %v2089_v6 = vmul.f32 %v3318_v56, %v4810_v26  ;;  %3329 = vrsqrt.f32 %v4667_v38  ;;  %vm2090_vm6 = vcmp.eq.f32.partialorder %v4810_v26, inf  ;;  %v2093_v23 = vand.u32 2147483648, %v4810_v26  ;;  %v4920_v9 = vpop.permute.xlu1 %2198 }
 0x46c   : > { %v3320_v17 = vpop.eup %3319  ;;  %2258 = vperm.xlu1 %3267, %v2087_v60   ;;  %v1607_v28 = vsub.f32 %v1347_v45, %v1575_v13  ;;  %3331 = vrsqrt.f32 %v4863_v31  ;;  %vm2092_vm7 = vcmp.eq.f32.partialorder %v4810_v26, 0.0  ;;  %v4896_v41 = vmax.f32 %v1906_v36, 0.0 }
 0x46d   : > { %v2091_v11 = vsel %vm2090_vm6, %v4810_v26, %v2089_v6  ;;  %v2096_v19 = vmul.f32 %v3320_v17, %v4825_v52  ;;  %3333 = vrsqrt.f32 %v4882_v18  ;;  %vm2097_vm8 = vcmp.eq.f32.partialorder %v4825_v52, inf  ;;  %v5213_v6 = vld [vmem:[#allocation27_spill] sm:$0xff] }
 0x46e   : > { %v2094_v61 = vsel %vm2092_vm7, %v2093_v23, %v2091_v11  ;;  %v1907_v29 = vadd.f32 %v1837_v3, %v1607_v28  ;;  %v2100_v39 = vand.u32 2147483648, %v4825_v52  ;;  %vm2099_vm9 = vcmp.eq.f32.partialorder %v4825_v52, 0.0 }
 0x46f   : > { %v3322_v53 = vpop.eup %3321  ;;  %v2098_v5 = vsel %vm2097_vm8, %v4825_v52, %v2096_v19  ;;  %3335 = vrsqrt.f32 %v4896_v41  ;;  %vm2111_vm10 = vcmp.eq.f32.partialorder %v4658_v22, inf  ;;  %vm2118_vm11 = vcmp.eq.f32.partialorder %v4851_v35, inf }
 0x470   : > { %2261 = vperm.xlu1 %3267, %v2094_v61   ;;  %v2110_v26 = vmul.f32 %v3322_v53, %v4658_v22  ;;  %v2101_v33 = vsel %vm2099_vm9, %v2100_v39, %v2098_v5  ;;  %v4904_v32 = vmax.f32 %v1907_v29, 0.0  ;;  %v2121_v52 = vand.u32 2147483648, %v4851_v35 }
 0x471   : > { %v2114_v30 = vand.u32 2147483648, %v4658_v22  ;;  %vm2120_vm12 = vcmp.eq.f32.partialorder %v4851_v35, 0.0  ;;  %vm2113_vm13 = vcmp.eq.f32.partialorder %v4658_v22, 0.0  ;;  %vm2104_vm14 = vcmp.eq.f32.partialorder %v4865_v54, inf }
 0x472   : > { %v3324_v10 = vpop.eup %3323  ;;  %v2112_v55 = vsel %vm2111_vm10, %v4658_v22, %v2110_v26  ;;  %3337 = vrsqrt.f32 %v4904_v32  ;;  %vm2125_vm15 = vcmp.eq.f32.partialorder %v4667_v38, inf  ;;  %v2128_v22 = vand.u32 2147483648, %v4667_v38  ;;  %v2202_v56 = vpop.permute.xlu0 %2201 }
 0x473   : > { %v3326_v50 = vpop.eup %3325  ;;  %v2117_v14 = vmul.f32 %v3324_v10, %v4851_v35  ;;  %v2115_v21 = vsel %vm2113_vm13, %v2114_v30, %v2112_v55  ;;  %v2107_v48 = vand.u32 2147483648, %v4865_v54  ;;  %vm2127_vm3 = vcmp.eq.f32.partialorder %v4667_v38, 0.0  ;;  %v5215_v55 = vld [vmem:[#allocation28_spill] sm:$0xff] }
 0x474   : > { %v3328_v46 = vpop.eup %3327  ;;  %2264 = vperm.xlu1 %3267, %v2101_v33   ;;  %vm2160_vm4 = vcmp.eq.f32.partialorder %v4882_v18, inf  ;;  %vm2106_vm5 = vcmp.eq.f32.partialorder %v4865_v54, 0.0  ;;  %vm2132_vm6 = vcmp.eq.f32.partialorder %v4863_v31, inf  ;;  %v2163_v34 = vand.u32 2147483648, %v4882_v18 }
 0x475   : > { %v3330_v8 = vpop.eup %3329  ;;  %v2119_v4 = vsel %vm2118_vm11, %v4851_v35, %v2117_v14  ;;  %v2103_v20 = vmul.f32 %v3328_v46, %v4865_v54  ;;  %v2138_v25 = vmul.f32 %v3326_v50, %v4859_v37  ;;  %vm2162_vm7 = vcmp.eq.f32.partialorder %v4882_v18, 0.0  ;;  %v5214_v46 = vld [vmem:[#allocation29_spill] sm:$0xff] }
 0x476   : > { %v3332_v49 = vpop.eup %3331  ;;  %v2122_v44 = vsel %vm2120_vm12, %v2121_v52, %v2119_v4  ;;  %v2124_v62 = vmul.f32 %v3330_v8, %v4667_v38  ;;  %v2205_v16 = vpop.permute.xlu1 %2204  ;;  %vm2134_vm8 = vcmp.eq.f32.partialorder %v4863_v31, 0.0  ;;  %vm2139_vm9 = vcmp.eq.f32.partialorder %v4859_v37, inf }
 0x477   : > { %v3334_v7 = vpop.eup %3333  ;;  %2273 = vperm.xlu0 %3268, %v2122_v44   ;;  %v2131_v43 = vmul.f32 %v3332_v49, %v4863_v31  ;;  %v2105_v59 = vsel %vm2104_vm14, %v4865_v54, %v2103_v20  ;;  %v2140_v2 = vsel %vm2139_vm9, %v4859_v37, %v2138_v25  ;;  %v2142_v12 = vand.u32 2147483648, %v4859_v37 }
 0x478   : > { %2270 = vperm.xlu1 %3267, %v2115_v21   ;;  %v2126_v24 = vsel %vm2125_vm15, %v4667_v38, %v2124_v62  ;;  %v2159_v57 = vmul.f32 %v3334_v7, %v4882_v18  ;;  %v2108_v47 = vsel %vm2106_vm5, %v2107_v48, %v2105_v59  ;;  %v2135_v38 = vand.u32 2147483648, %v4863_v31 }
 0x479   : > { %v2129_v35 = vsel %vm2127_vm3, %v2128_v22, %v2126_v24  ;;  %v2133_v58 = vsel %vm2132_vm6, %v4863_v31, %v2131_v43  ;;  %v3336_v51 = vpop.eup %3335  ;;  %vm2141_vm10 = vcmp.eq.f32.partialorder %v4859_v37, 0.0  ;;  %vm2146_vm11 = vcmp.eq.f32.partialorder %v4896_v41, inf }
 0x47a   : > { %v2161_v1 = vsel %vm2160_vm4, %v4882_v18, %v2159_v57  ;;  %v2136_v54 = vsel %vm2134_vm8, %v2135_v38, %v2133_v58  ;;  %v2145_v13 = vmul.f32 %v3336_v51, %v4896_v41  ;;  %v2208_v42 = vpop.permute.xlu1 %2207  ;;  %v2143_v0 = vsel %vm2141_vm10, %v2142_v12, %v2140_v2  ;;  %v5212_v18 = vld [vmem:[#allocation23_spill] sm:$0xff]  ;;  %v5218_v12 = vld [vmem:[#allocation30_spill] sm:$0xff] }
 0x47b   : > { %2276 = vperm.xlu0 %3268, %v2129_v35   ;;  %v2164_v40 = vsel %vm2162_vm7, %v2163_v34, %v2161_v1  ;;  %v2149_v27 = vand.u32 2147483648, %v4896_v41  ;;  %vm2148_vm12 = vcmp.eq.f32.partialorder %v4896_v41, 0.0  ;;  %vm2153_vm13 = vcmp.eq.f32.partialorder %v4904_v32, inf }
 0x47c   : > { %2267 = vperm.xlu1 %3267, %v2108_v47   ;;  %v3338_v15 = vpop.eup %3337  ;;  %v2147_v31 = vsel %vm2146_vm11, %v4896_v41, %v2145_v13  ;;  %v2300_v3 = vrot.slane %v2202_v56, %v5213_v6  ;;  %v2156_v17 = vand.u32 2147483648, %v4904_v32  ;;  %vm1070_vm14 = vcmask 1041409  }
 0x47d   : > { %v2152_v63 = vmul.f32 %v3338_v15, %v4904_v32  ;;  %v2150_v60 = vsel %vm2148_vm12, %v2149_v27, %v2147_v31  ;;  %v2304_v23 = vrot.slane %v2205_v16, %v5213_v6  ;;  %vm2155_vm15 = vcmp.eq.f32.partialorder %v4904_v32, 0.0  ;;  %v5217_v15 = vld [vmem:[#allocation32_spill] sm:$0xff] }
 0x47e   : > { %v2211_v45 = vpop.permute.xlu1 %2210  ;;  %v2296_v28 = vrot.slane %v4920_v9, %v5213_v6  ;;  %vm1071_vm3 = vcmask 1042434   ;;  %v2308_v11 = vrot.slane %v2208_v42, %v5213_v6  ;;  %vm1073_vm4 = vcmask 1043459  }
 0x47f   : > { %2279 = vperm.xlu0 %3268, %v2136_v54   ;;  %v2154_v37 = vsel %vm2153_vm13, %v4904_v32, %v2152_v63  ;;  %v2312_v41 = vrot.slane %v2211_v45, %v5213_v6  ;;  %vm1075_vm5 = vcmask 1044484   ;;  %vm1077_vm6 = vcmask 1045509  }
 0x480   : > { %2291 = vperm.xlu1 %3267, %v2164_v40   ;;  %v2157_v19 = vsel %vm2155_vm15, %v2156_v17, %v2154_v37  ;;  %v2421_v29 = vsel %vm1070_vm14, %v2300_v3, %v2296_v28  ;;  %vm1079_vm7 = vcmask 1046534   ;;  %vm1081_vm8 = vcmask 1047559  }
 0x481   : > { %v2422_v5 = vsel %vm1071_vm3, %v2304_v23, %v2421_v29  ;;  %v5216_v52 = vsub.f32 %v5214_v46, %v5215_v55  ;;  %vm2502_vm9 = vcmask 1043456   ;;  %vm2705_vm10 = vcmask 195584  }
 0x482   : > { %v2214_v36 = vpop.permute.xlu1 %2213  ;;  %v2423_v26 = vsel %vm1073_vm4, %v2308_v11, %v2422_v5 }
 0x483   : > { %2282 = vperm.xlu0 %3268, %v2143_v0   ;;  %v2316_v53 = vrot.slane %v2214_v36, %v5213_v6  ;;  %v2424_v33 = vsel %vm1075_vm5, %v2312_v41, %v2423_v26  ;;  %v1117_v8 = vmax.f32 %v5216_v52, 1e-15  ;;  %v5219_v0 = vsub.f32 %v5217_v15, %v5218_v12  ;;  %v5225_v12 = vld [vmem:[#allocation25_spill] sm:$0xff] }
 0x484   : > { %2497 = vrot.lane.b32.xlu1 %v5212_v18, %s3682_s25 }
 0x485   : > { %v2425_v32 = vsel %vm1077_vm6, %v2316_v53, %v2424_v33  ;;  %v1118_v31 = vmax.f32 %v5219_v0, 1e-15 }
 0x486   : > { %v2217_v61 = vpop.permute.xlu1 %2216 }
 0x487   : > { %2285 = vperm.xlu0 %3268, %v2150_v60   ;;  %v2320_v39 = vrot.slane %v2217_v61, %v5213_v6 }
 0x489   : > { %v2426_v14 = vsel %vm1079_vm7, %v2320_v39, %v2425_v32 }
 0x48a   : > { %v2220_v10 = vpop.permute.xlu1 %2219 }
 0x48b   : > { %2288 = vperm.xlu0 %3268, %v2157_v19   ;;  %v2324_v50 = vrot.slane %v2220_v10, %v5213_v6 }
 0x48d   : > { %v2427_v30 = vsel %vm1081_vm8, %v2324_v50, %v2426_v14 }
 0x48e   : > { %v2457_v4 = vadd.f32 %v2427_v30, %v1117_v8  ;;  %v2453_v20 = vsub.f32 %v1117_v8, %v2427_v30 }
 0x490   : > { %3339 = vrcp.f32 %v2457_v4 }
 0x49a   : > { %v3340_v49 = vpop.eup %3339 }
 0x49b   : > { %v4974_v44 = vmul.f32 %v3340_v49, %v2453_v20  ;;  %v5220_v20 = vld [vmem:[#allocation33_spill] sm:$0xff]  ;;  %v5221_v49 = vld [vmem:[#allocation31_spill] sm:$0xff] }
 0x49d   : > { %v2469_v62 = vmax.f32 %v4974_v44, 5.000025e-06 }
 0x49f   : > { %v2473_v7 = vsel %vm503_vm2, %v2469_v62, 0.0 }
 0x4aa   : > { %2474 = vadd.xlane.f32.xlu0 %v2473_v7  ;;  %v5222_v7 = vsub.f32 %v5220_v20, %v5221_v49 }
 0x4b8   : > { %v2223_v59 = vpop.permute.xlu1 %2222 }
 0x4b9   : > { %v2328_v22 = vrot.slane %v2223_v59, %v5213_v6 }
 0x4c7   : > { %v2226_v21 = vpop.permute.xlu0 %2225 }
 0x4c8   : > { %v2332_v57 = vrot.slane %v2226_v21, %v5213_v6  ;;  %v1119_v21 = vmax.f32 %v5222_v7, 1e-15 }
 0x4ca   : > { %v2428_v58 = vsel %vm1070_vm14, %v2332_v57, %v2328_v22  ;;  %v2244_v34 = vpop.permute.xlu1 %2243 }
 0x4cb   : > { %v2356_v2 = vrot.slane %v2244_v34, %v5213_v6 }
 0x4cc   : > { %v2229_v9 = vpop.permute.xlu0 %2228 }
 0x4cd   : > { %v2336_v48 = vrot.slane %v2229_v9, %v5213_v6 }
 0x4cf   : > { %v2429_v16 = vsel %vm1071_vm3, %v2336_v48, %v2428_v58  ;;  %v2250_v63 = vpop.permute.xlu1 %2249 }
 0x4d0   : > { %v2364_v29 = vrot.slane %v2250_v63, %v5213_v6 }
 0x4d2   : > { %v2232_v43 = vpop.permute.xlu0 %2231 }
 0x4d3   : > { %v2340_v35 = vrot.slane %v2232_v43, %v5213_v6 }
 0x4d5   : > { %v2430_v51 = vsel %vm1073_vm4, %v2340_v35, %v2429_v16  ;;  %v5224_v16 = vld [vmem:[#allocation26_spill] sm:$0xff] }
 0x4d6   : > { %v2235_v24 = vpop.permute.xlu0 %2234 }
 0x4d7   : > { %v2344_v47 = vrot.slane %v2235_v24, %v5213_v6 }
 0x4d9   : > { %v2431_v40 = vsel %vm1075_vm5, %v2344_v47, %v2430_v51 }
 0x4da   : > { %v2238_v1 = vpop.permute.xlu0 %2237 }
 0x4db   : > { %v2348_v25 = vrot.slane %v2238_v1, %v5213_v6 }
 0x4dd   : > { %v2432_v13 = vsel %vm1077_vm6, %v2348_v25, %v2431_v40  ;;  %v5223_v25 = vmov 0.0  }
 0x4de   : > { %v2241_v38 = vpop.permute.xlu0 %2240 }
 0x4df   : > { %v2352_v54 = vrot.slane %v2241_v38, %v5213_v6 }
 0x4e1   : > { %v2433_v42 = vsel %vm1079_vm7, %v2352_v54, %v2432_v13 }
 0x4e2   : > { %v2434_v45 = vsel %vm1081_vm8, %v2356_v2, %v2433_v42  ;;  %v2247_v60 = vpop.permute.xlu0 %2246 }
 0x4e3   : > { %v2458_v18 = vadd.f32 %v2434_v45, %v1118_v31  ;;  %v2454_v36 = vsub.f32 %v1118_v31, %v2434_v45  ;;  %v2360_v19 = vrot.slane %v2247_v60, %v5213_v6  ;;  %v5227_v60 = vld [vmem:[#allocation34_spill] sm:$0xff] }
 0x4e5   : > { %3341 = vrcp.f32 %v2458_v18  ;;  %v2435_v33 = vsel %vm1070_vm14, %v2364_v29, %v2360_v19 }
 0x4e6   : > { %v2253_v23 = vpop.permute.xlu0 %2252 }
 0x4e7   : > { %v2256_v27 = vpop.permute.xlu1 %2255  ;;  %v2368_v41 = vrot.slane %v2253_v23, %v5213_v6 }
 0x4e8   : > { %v2372_v53 = vrot.slane %v2256_v27, %v5213_v6 }
 0x4e9   : > { %v2436_v32 = vsel %vm1071_vm3, %v2368_v41, %v2435_v33 }
 0x4ea   : > { %v2437_v14 = vsel %vm1073_vm4, %v2372_v53, %v2436_v32 }
 0x4eb   : > { %v2259_v56 = vpop.permute.xlu1 %2258 }
 0x4ec   : > { %v2376_v39 = vrot.slane %v2259_v56, %v5213_v6  ;;  %v5226_v56 = vld [vmem:[#allocation35_spill] sm:$0xff] }
 0x4ee   : > { %v2438_v55 = vsel %vm1075_vm5, %v2376_v39, %v2437_v14 }
 0x4ef   : > { %v2262_v37 = vpop.permute.xlu1 %2261  ;;  %v3342_v3 = vpop.eup %3341 }
 0x4f0   : > { %v4998_v17 = vmul.f32 %v3342_v3, %v2454_v36  ;;  %v2380_v10 = vrot.slane %v2262_v37, %v5213_v6  ;;  %v5228_v37 = vsub.f32 %v5226_v56, %v5227_v60 }
 0x4f2   : > { %v2470_v28 = vmax.f32 %v4998_v17, 5.000025e-06  ;;  %v2439_v8 = vsel %vm1077_vm6, %v2380_v10, %v2438_v55  ;;  %v1120_v36 = vmax.f32 %v5228_v37, 1e-15 }
 0x4f3   : > { %v2265_v11 = vpop.permute.xlu1 %2264 }
 0x4f4   : > { %v2476_v61 = vsel %vm503_vm2, %v2470_v28, 0.0  ;;  %v2384_v50 = vrot.slane %v2265_v11, %v5213_v6 }
 0x4f5   : > { %2477 = vadd.xlane.f32.xlu1 %v2476_v61 }
 0x4f6   : > { %v2274_v5 = vpop.permute.xlu0 %2273  ;;  %v2440_v4 = vsel %vm1079_vm7, %v2384_v50, %v2439_v8 }
 0x4f7   : > { %v2271_v26 = vpop.permute.xlu1 %2270  ;;  %v2396_v48 = vrot.slane %v2274_v5, %v5213_v6  ;;  %v5229_v5 = vld [vmem:[#allocation24_spill] sm:$0xff] }
 0x4f8   : > { %v2392_v47 = vrot.slane %v2271_v26, %v5213_v6 }
 0x4fa   : > { %v2277_v46 = vpop.permute.xlu0 %2276  ;;  %v2442_v38 = vsel %vm1070_vm14, %v2396_v48, %v2392_v47 }
 0x4fb   : > { %v2268_v52 = vpop.permute.xlu1 %2267  ;;  %v2400_v1 = vrot.slane %v2277_v46, %v5213_v6 }
 0x4fc   : > { %v2388_v30 = vrot.slane %v2268_v52, %v5213_v6 }
 0x4fd   : > { %v2443_v54 = vsel %vm1071_vm3, %v2400_v1, %v2442_v38 }
 0x4fe   : > { %v2441_v9 = vsel %vm1081_vm8, %v2388_v30, %v2440_v4  ;;  %v2280_v43 = vpop.permute.xlu0 %2279 }
 0x4ff   : > { %v2459_v59 = vadd.f32 %v2441_v9, %v1119_v21  ;;  %v2292_v24 = vpop.permute.xlu1 %2291  ;;  %v2404_v58 = vrot.slane %v2280_v43, %v5213_v6  ;;  %v2455_v2 = vsub.f32 %v1119_v21, %v2441_v9 }
 0x500   : > { %v2420_v63 = vrot.slane %v2292_v24, %v5213_v6 }
 0x501   : > { %3343 = vrcp.f32 %v2459_v59  ;;  %v2444_v13 = vsel %vm1073_vm4, %v2404_v58, %v2443_v54  ;;  %v3272_v58 = vld [vmem:[#allocation10 + $0x8] sm:$0xff]  }
 0x502   : > { %v2283_v22 = vpop.permute.xlu0 %2282 }
 0x503   : > { %v2498_v57 = vpop.permute.xlu1 %2497  ;;  %v2408_v51 = vrot.slane %v2283_v22, %v5213_v6 }
 0x504   : > { %v2504_v35 = vsel %vm2502_vm9, %v2498_v57, 0  ;;  %v3271_v57 = vld [vmem:[#allocation10] sm:$0xff]  }
 0x505   : > { %3098 = vmatpush3.bf16.msra.mxu1 %v2504_v35  ;;  %v2445_v0 = vsel %vm1075_vm5, %v2408_v51, %v2444_v13 }
 0x506   : > { %v2286_v34 = vpop.permute.xlu0 %2285  ;;  %3109 = vmatprep.subr.bf16.mxu1 %v5223_v25  ;;  %2594 = vrot.lane.b32.xlu1 %v5224_v16, %s3682_s25 }
 0x507   : > { %v2412_v40 = vrot.slane %v2286_v34, %v5213_v6  ;;  %v3273_v34 = vld [vmem:[#allocation13] sm:$0xff]  }
 0x509   : > { %v2446_v45 = vsel %vm1077_vm6, %v2412_v40, %v2445_v0 }
 0x50a   : > { %v2289_v42 = vpop.permute.xlu0 %2288  ;;  %2642 = vrot.lane.b32.xlu1 %v5225_v12, %s3682_s25 }
 0x50b   : > { %v3344_v15 = vpop.eup %3343  ;;  %v2416_v31 = vrot.slane %v2289_v42, %v5213_v6 }
 0x50c   : > { %v2467_v18 = vmul.f32 %v3344_v15, %v2455_v2 }
 0x50d   : > { %v2447_v27 = vsel %vm1079_vm7, %v2416_v31, %v2446_v45 }
 0x50e   : > { %v2471_v3 = vmax.f32 %v2467_v18, 5.000025e-06  ;;  %v2448_v23 = vsel %vm1081_vm8, %v2420_v63, %v2447_v27  ;;  %v3028_v27 = vld [vmem:[#allocation11] ss:$0 sm:$0xff] }
 0x50f   : > { %v2460_v11 = vadd.f32 %v2448_v23, %v1120_v36  ;;  %v2456_v41 = vsub.f32 %v1120_v36, %v2448_v23 }
 0x510   : > { %v2479_v19 = vsel %vm503_vm2, %v2471_v3, 0.0 }
 0x511   : > { %2480 = vadd.xlane.f32.xlu0 %v2479_v19  ;;  %3345 = vrcp.f32 %v2460_v11  ;;  %v3032_v11 = vld [vmem:[#allocation14] ss:$0 sm:$0xff] }
 0x51b   : > { %v3346_v61 = vpop.eup %3345 }
 0x51c   : > { %v2468_v6 = vmul.f32 %v3346_v61, %v2456_v41 }
 0x51e   : > { %v2472_v29 = vmax.f32 %v2468_v6, 5.000025e-06 }
 0x520   : > { %v2482_v53 = vsel %vm503_vm2, %v2472_v29, 0.0 }
 0x521   : > { %2483 = vadd.xlane.f32.xlu0 %v2482_v53 }
 0x537   : > { %2546 = vrot.lane.b32.xlu0 %v5229_v5, %s3682_s25  ;;  %v2475_v39 = vpop.xlane.xlu0 %2474  ;;  %s3686_s25 = smov [#allocation16]  }
 0x538   : > { %3347 = vrcp.f32 %v2475_v39 }
 0x542   : > { %v3348_v26 = vpop.eup %3347 }
 0x543   : > { %v2489_v33 = vmul.f32 %v3348_v26, %v2469_v62 }
 0x545   : > { %v2493_v10 = vpack.c.bf16 %v2489_v33, %v2489_v33 }
 0x547   : > { %3100 = vmatmul.mubr.msk.bf16.vlgmr.msra.gmra.mrb[8].mxu1 %vm503_vm2, %v2493_v10 }
 0x548   : > { %3111 = vmatprep.mubr.msk.bf16.mxu1 %vm3676_vm0, %v5223_v25 }
 0x582   : > { %v2478_v32 = vpop.xlane.xlu1 %2477 }
 0x586   : > { %v2595_v50 = vpop.permute.xlu1 %2594 }
 0x587   : > { %v2600_v14 = vsel %vm2502_vm9, %v2595_v50, 0 }
 0x588   : > { %3110 = vmatpush3.bf16.msra.mxu1 %v2600_v14 }
 0x589   : > { %3121 = vmatprep.subr.bf16.mxu1 %v5223_v25 }
 0x58a   : > { %v2643_v49 = vpop.permute.xlu1 %2642 }
 0x58b   : > { %v2648_v21 = vsel %vm2502_vm9, %v2643_v49, 0 }
 0x59e   : > { %v2481_v46 = vpop.xlane.xlu0 %2480 }
 0x59f   : > { %3349 = vrcp.f32 %v2481_v46 }
 0x5a0   : > { %3351 = vrcp.f32 %v2478_v32 }
 0x5a9   : > { %v3350_v55 = vpop.eup %3349 }
 0x5aa   : > { %v2491_v52 = vmul.f32 %v3350_v55, %v2471_v3  ;;  %v3352_v62 = vpop.eup %3351 }
 0x5ab   : > { %v2490_v30 = vmul.f32 %v3352_v62, %v2470_v28 }
 0x5ac   : > { %v2495_v44 = vpack.c.bf16 %v2491_v52, %v2491_v52 }
 0x5ad   : > { %v2494_v7 = vpack.c.bf16 %v2490_v30, %v2490_v30 }
 0x5ae   : > { %3112 = vmatmul.mubr.msk.bf16.vlgmr.msra.gmra.mrb[12].mxu1 %vm503_vm2, %v2495_v44  ;;  %v2484_v8 = vpop.xlane.xlu0 %2483 }
 0x5af   : > { %3353 = vrcp.f32 %v2484_v8  ;;  %3125 = vmatprep.mubr.msk.bf16.mxu1 %vm3676_vm0, %v5223_v25  ;;  %3122 = vmatpush3.bf16.msra.mxu1 %v3271_v57 }
 0x5b0   : > { %3123 = vmatprep.subr.bf16.mxu1 %v5223_v25 }
 0x5b2   : > { %v2547_v4 = vpop.permute.xlu0 %2546 }
 0x5b3   : > { %v2552_v20 = vsel %vm2502_vm9, %v2547_v4, 0  ;;  %3124 = vmatpush3.bf16.msra.mxu1 %v3272_v58 }
 0x5b4   : > { %3104 = vmatpush3.bf16.msra.mxu0 %v2552_v20 }
 0x5b5   : > { %3115 = vmatprep.subr.bf16.mxu0 %v5223_v25 }
 0x5b7   : > { %3106 = vmatmul.mubr.msk.bf16.vlgmr.msra.gmra.mrb[12].mxu0 %vm503_vm2, %v2494_v7 }
 0x5b8   : > { %3116 = vmatpush3.bf16.msra.mxu0 %v2648_v21  ;;  %3117 = vmatprep.mubr.msk.bf16.mxu0 %vm3676_vm0, %v5223_v25 }
 0x5b9   : > { %v3354_v9 = vpop.eup %3353  ;;  %3129 = vmatprep.subr.bf16.mxu0 %v5223_v25 }
 0x5ba   : > { %v2492_v17 = vmul.f32 %v3354_v9, %v2472_v29 }
 0x5bc   : > { %v2496_v28 = vpack.c.bf16 %v2492_v17, %v2492_v17 }
 0x5bf   : > { %3118 = vmatmul.mubr.msk.bf16.vlgmr.msra.gmra.mrb[16].mxu0 %vm503_vm2, %v2496_v28 }
 0x5c0   : > { %3133 = vmatprep.mubr.msk.bf16.mxu0 %vm3676_vm0, %v5223_v25  ;;  %3130 = vmatpush3.bf16.msra.mxu0 %v3273_v34  ;;  %vm2703_vm0 = vcmask 130048  }
 0x5c1   : > { %3131 = vmatprep.subr.bf16.mxu0 %v5223_v25  ;;  %v3274_v25 = vld [vmem:[#allocation13 + $0x8] sm:$0xff]  }
 0x5c4   : > { %3132 = vmatpush3.bf16.msra.mxu0 %v3274_v25 }
 0x61a   : > { %v2540_v43 = vpop.f32.mrb[8].mxu1 }
 0x61b   : > { %v3101_v59 = vpop.f32.mrb[9].mxu1 }
 0x61c   : > { %v2543_v24 = vpop.f32.mrb[10].mxu1 }
 0x61d   : > { %v3102_v22 = vpop.f32.mrb[11].mxu1 }
 0x681   : > { %v2636_v48 = vpop.f32.mrb[12].mxu1 }
 0x682   : > { %2695 = vrot.lane.b32.xlu1 %v2636_v48, %s3683_s15  ;;  %v3113_v35 = vpop.f32.mrb[13].mxu1  ;;  %s3585_s15 = sshll.u32 %s3686_s25, 4  ;;  %s3586_s15 = int_to_ptr.vmem [resolvable:$false] %s3585_s15 }
 0x683   : > { %v2639_v1 = vpop.f32.mrb[14].mxu1  ;;  %p3588_p2 = scmp.lt.s32.totalorder %s5084_s26, %s3586_s15 }
 0x684   : > { %v3114_v47 = vpop.f32.mrb[15].mxu1 }
 0x68a   : > { %v2588_v16 = vpop.f32.mrb[12].mxu0 }
 0x68b   : > { %2691 = vrot.lane.b32.xlu0 %v2588_v16, %s3684_s19  ;;  %v3107_v51 = vpop.f32.mrb[13].mxu0  ;;  %s3587_s19 = scalar_lea.vmem %s3586_s15, 256 }
 0x68c   : > { %v2591_v38 = vpop.f32.mrb[14].mxu0  ;;  %p3589_p3 = scmp.lt.s32.totalorder %s3587_s19, %s3581_s13 }
 0x68d   : > { %v3108_v40 = vpop.f32.mrb[15].mxu0 }
 0x68e   : > { %p3590_p6 = por %p3589_p3, %p3588_p2 }
 0x690   : > { %p3591_p4 = pnand %p3590_p6, %p3584_p0 }
 0x692   : > { %v2684_v54 = vpop.f32.mrb[16].mxu0 }
 0x693   : > { %2699 = vrot.lane.b32.xlu0 %v2684_v54, %s3685_s10  ;;  %v3119_v2 = vpop.f32.mrb[17].mxu0 }
 0x694   : > { %v2687_v13 = vpop.f32.mrb[18].mxu0 }
 0x695   : > { %v3120_v42 = vpop.f32.mrb[19].mxu0 }
 0x6f4   : > { %v2696_v0 = vpop.permute.xlu1 %2695 }
 0x6fd   : > { %v2692_v15 = vpop.permute.xlu0 %2691 }
 0x6fe   : > { %v2702_v12 = vsel %vm503_vm2, %v2540_v43, %v2692_v15 }
 0x6ff   : > { %v2704_v31 = vsel %vm2703_vm0, %v2702_v12, %v2696_v0 }
 0x705   : > { %v2700_v63 = vpop.permute.xlu0 %2699 }
 0x706   : > { %v2706_v45 = vsel %vm2705_vm10, %v2704_v31, %v2700_v63 }
 0x707   : > { %v2707_v18 = vpack.c.bf16 %v2706_v45, %v2706_v45 }
 0x709   : > { %3126 = vmatmul.mubr.msk.bf16.vlgmr.msra.gmra.mrb[16].mxu1 %vm445_vm1, %v2707_v18 }
 0x7dc   : > { %v2768_v56 = vpop.f32.mrb[16].mxu1 }
 0x7dd   : > { %v2769_v60 = vadd.f32 %v3028_v27, %v2768_v56  ;;  %v3127_v37 = vpop.f32.mrb[17].mxu1 }
 0x7de   : > { %v2771_v36 = vpop.f32.mrb[18].mxu1 }
 0x7df   : > { %v2774_v3 = vpack.c.bf16 %v2769_v60, %v2769_v60  ;;  %v3128_v23 = vpop.f32.mrb[19].mxu1 }
 0x7e1   : > { %3134 = vmatmul.mubr.msk.bf16.vlgmr.msra.gmra.mrb[20].mxu0 %vm445_vm1, %v2774_v3 }
 0x8b4   : > { %v2835_v19 = vpop.f32.mrb[20].mxu0 }
 0x8b5   : > { %v2836_v41 = vadd.f32 %v3032_v11, %v2835_v19  ;;  %v3135_v61 = vpop.f32.mrb[21].mxu0 }
 0x8b6   : > { %v2838_v6 = vpop.f32.mrb[22].mxu0 }
 0x8b7   : > { %v2841_v29 = vmax.f32 %v2836_v41, 0.0  ;;  %v3136_v53 = vpop.f32.mrb[23].mxu0 }
 0x8b9   : > { %2842 = vst.msk [vmem:[%s414_s21] sm:$0xff] %vm445_vm1, %v2841_v29 }
 0x8ba   : > { %3594 = shalt.err (!%p3591_p4)
}
 0x8bb   : > { %s3595_s20 = scalar_lea.hbm %s5082_s14, 128  ;;  %s3599_s18 = scalar_lea.hbm %s5135_s8, 256 }
 0x8bc   : > { %p3596_p11 = scmp.ne.s32.totalorder %s5082_s14, %s3595_s20  ;;  %p3600_p9 = scmp.lt.u32.totalorder %s5082_s14, %s5135_s8 }
 0x8bd   : > { %p3601_p7 = scmp.lt.u32.totalorder %s3599_s18, %s3595_s20  ;;  %p3603_p12 = scmp.lt.u32.totalorder %s3595_s20, %s5082_s14 }
 0x8be   : > { %p3597_p8 = pnand %p3596_p11, %p5230_p1 }
 0x8bf   : > { %p3602_p10 = por %p3601_p7, %p3600_p9 }
 0x8c0   : > { %p3598_p5 = pneg %p3597_p8 }
 0x8c1   : > { %p3604_p13 = por %p3603_p12, %p3602_p10 }
 0x8c3   : > { %p3605_p0 = pnand %p3604_p13, %p3598_p5 }
 0x8c5   : > { %3608 = shalt.err (!%p3605_p0)
}
 0x8c6   : > { %3167 = dma.vmem_to_hbm [thread:$0]  (%p5230_p1), %s5084_s26, 128, %s5082_s14, %s2844_s11  }
 0x8c7 PF: > { %s2869_s24 = sand.u32 1, %s3651_s27   ;;  %p5231_p2 = scmp.ne.s32.totalorder %s5161_s9, 0 }
 0x8c8   : > { %p5232_p3 = scmp.ge.s32.totalorder %s3663_s30, 2  ;;  %s2870_s13 = scalar_lea.sflag [#allocation4], %s2869_s24 }
 0x8ca   : > { %p3196_p6 = pnand %p5232_p3, %p5231_p2 }
 0x8cc   : > { %3646 = dma.done.wait (!%p3196_p6), %s2870_s13, 128  }
 0x8cd   : > { %3648 = vsyncadd (!%p3196_p6), %s2870_s13, 4294967168  ;;  %p25_p4 = scmp.ge.s32.totalorder %s3947_s17, 4   ;;  %s5233_s27 = smov %s3655_s28 }
 0x8ce   : > { %s5234_s28 = smov %s3659_s29  ;;  %s5235_s29 = smov %s3959_s23 }
 0x8cf   : > { %s5236_s30 = smov %s3947_s17  ;;  %27 = sbr.rel (!%p25_p4) target bundleno = 9 (0x9), region = 125 }
 0x8d6   :  { %2875 = vsyncpa [#allocation3], 1 }
 0x8d7   :  { %2877 = vsyncpa [#allocation3 + $0x1], 1 }
 0x8d8   :  { %2878 = vsyncpa [#allocation6], 1 }
 0x8d9   :  { %2879 = vsyncpa [#allocation9], 1 }
 0x8da   :  { %2880 = vsyncpa [#allocation12], 1 }
 0x8db   :  { %2881 = vsyncpa [#allocation15], 1 }
 0x8dc   :  { %2882 = vsyncpa [#allocation4], 1 }
 0x8dd   :  { %2884 = vsyncpa [#allocation4 + $0x1], 1 }

</bundles_post_ra>
